<compile_context>
chip_gen: v5e
topology: v5e:2x2
jax: 0.10.0
libtpu: 0.0.40
codegen_flags: <defaults>
</compile_context>

<pallas_src>
import math

import jax
import jax.numpy as jnp
from jax.experimental import pallas as pl
from jax.experimental.pallas import tpu as pltpu


# ----------------------------------------------------------------------------
# Fused Pallas kernel: both LSTM stacks + all layers + all timesteps + FC heads
# ----------------------------------------------------------------------------
def _make_fused_kernel(T, B, H, L):
    """Builds the fused kernel for fixed (T, B, H, L).

    Kernel ref layout (inputs..., output):
      x_flat (T*B, D0)                          time-major flattened embeds
      for each layer l: wih_l, whh_l, b_l       fused two-stack gate weights
         l == 0 : wih (D0, 8H)
         l >= 1 : wih (2H, 8H)   (block-diagonal per stack)
         whh (2H, 8H)            (block-diagonal per stack)
         b   (1, 8H)             (b_ih + b_hh, both stacks)
      h0 (L, B, 2H), c0 (L, B, 2H)              fused initial states [A | B]
      fcw (2H, C+1), fcb (1, C+1)               fused FC heads
      out (B, C+1)                              [fc output | fc_timestamp]
    """
    H2 = 2 * H  # fused hidden width (stack A lanes 0:H, stack B lanes H:2H)

    def kernel(*refs):
        x_ref = refs[0]
        layer_refs = [(refs[1 + 3 * l], refs[2 + 3 * l], refs[3 + 3 * l])
                      for l in range(L)]
        h0_ref, c0_ref, fcw_ref, fcb_ref, out_ref = refs[1 + 3 * L:6 + 3 * L]

        def lstm_cell(gates, h, c):
            # gate-major fused layout: [i_A i_B | f_A f_B | g_A g_B | o_A o_B]
            i = jax.nn.sigmoid(gates[:, 0 * H2:1 * H2])
            f = jax.nn.sigmoid(gates[:, 1 * H2:2 * H2])
            g = jnp.tanh(gates[:, 2 * H2:3 * H2])
            o = jax.nn.sigmoid(gates[:, 3 * H2:4 * H2])
            c_new = f * c + i * g
            h_new = o * jnp.tanh(c_new)
            return h_new, c_new

        # ---- layer 0: hoist the input projection for all timesteps ----
        wih0_ref, whh0_ref, b0_ref = layer_refs[0]
        xg0 = (jnp.dot(x_ref[...], wih0_ref[...],
                       preferred_element_type=jnp.float32)
               + b0_ref[...])                                  # (T*B, 8H)
        whh0 = whh0_ref[...]
        h = h0_ref[0].astype(jnp.float32)                      # (B, 2H)
        c = c0_ref[0].astype(jnp.float32)
        below = []                                             # layer-0 outputs
        for t in range(T):
            gates = (xg0[t * B:(t + 1) * B, :]
                     + jnp.dot(h, whh0, preferred_element_type=jnp.float32))
            h, c = lstm_cell(gates, h, c)
            below.append(h)

        # TODO(synk): dropout(p=0.2) between LSTM layers skipped (eval mode).

        # ---- layers 1..L-1 (stacked) ----
        for l in range(1, L):
            wih_ref, whh_ref, b_ref = layer_refs[l]
            wih = wih_ref[...]
            whh = whh_ref[...]
            b = b_ref[...]
            h = h0_ref[l].astype(jnp.float32)
            c = c0_ref[l].astype(jnp.float32)
            new_below = []
            for t in range(T):
                gates = (jnp.dot(below[t], wih,
                                 preferred_element_type=jnp.float32)
                         + jnp.dot(h, whh,
                                   preferred_element_type=jnp.float32)
                         + b)
                h, c = lstm_cell(gates, h, c)
                new_below.append(h)
            below = new_below

        # ---- fused FC heads on the last timestep of the top layer ----
        out_ref[...] = (jnp.dot(h, fcw_ref[...],
                                preferred_element_type=jnp.float32)
                        + fcb_ref[...]).astype(out_ref.dtype)

    return kernel


def fused_rnn(x_flat, layers, h0_f, c0_f, fc_w, fc_b, *, T, B, H):
    """Single pallas_call running both stacks end-to-end.  Returns (B, C+1)."""
    L = len(layers)
    c_plus_1 = fc_b.shape[1]
    args = [x_flat]
    for lp in layers:
        args += [lp["wih"], lp["whh"], lp["b"]]
    args += [h0_f, c0_f, fc_w, fc_b]
    return pl.pallas_call(
        _make_fused_kernel(T=T, B=B, H=H, L=L),
        out_shape=jax.ShapeDtypeStruct((B, c_plus_1), jnp.float32),
        compiler_params=pltpu.CompilerParams(
            vmem_limit_bytes=32 * 1024 * 1024),
    )(*args)


# ----------------------------------------------------------------------------
# Parameter construction (PyTorch shapes / init ranges, then fused packing)
# ----------------------------------------------------------------------------
def make_params(key, total_size, input_size, embedding_size, hidden_size,
                num_layers, num_classes):
    D0 = input_size + embedding_size - 1
    H = hidden_size
    k = 1.0 / math.sqrt(H)

    n_keys = 1 + 2 * num_layers * 4 + 4      # embedding + 2 LSTM stacks + 2 FC
    keys = jax.random.split(key, n_keys)
    ki = iter(keys)

    params = {}
    # nn.Embedding: N(0, 1)
    params["embedding"] = jax.random.normal(
        next(ki), (total_size, embedding_size), jnp.float32)

    def raw_lstm():
        layers = []
        for l in range(num_layers):
            d_in = D0 if l == 0 else H
            w_ih = jax.random.uniform(next(ki), (4 * H, d_in), jnp.float32, -k, k)
            w_hh = jax.random.uniform(next(ki), (4 * H, H), jnp.float32, -k, k)
            b_ih = jax.random.uniform(next(ki), (4 * H,), jnp.float32, -k, k)
            b_hh = jax.random.uniform(next(ki), (4 * H,), jnp.float32, -k, k)
            layers.append((w_ih, w_hh, b_ih + b_hh))
        return layers

    stack_a = raw_lstm()        # self.lstm
    stack_b = raw_lstm()        # self.lstm_timestamp

    # Fused, gate-major packing: columns [i_A i_B | f_A f_B | g_A g_B | o_A o_B]
    fused_layers = []
    for l in range(num_layers):
        d_in_fused = D0 if l == 0 else 2 * H
        wih_f = jnp.zeros((d_in_fused, 8 * H), jnp.float32)
        whh_f = jnp.zeros((2 * H, 8 * H), jnp.float32)
        b_f = jnp.zeros((8 * H,), jnp.float32)
        for s, stack in enumerate((stack_a, stack_b)):
            w_ih, w_hh, b = stack[l]
            for g in range(4):
                col = slice(g * 2 * H + s * H, g * 2 * H + (s + 1) * H)
                wih_block = jnp.transpose(w_ih[g * H:(g + 1) * H, :])  # (d_in,H)
                if l == 0:
                    wih_f = wih_f.at[:, col].set(wih_block)
                else:
                    wih_f = wih_f.at[s * H:(s + 1) * H, col].set(wih_block)
                whh_f = whh_f.at[s * H:(s + 1) * H, col].set(
                    jnp.transpose(w_hh[g * H:(g + 1) * H, :]))
                b_f = b_f.at[col].set(b[g * H:(g + 1) * H])
        fused_layers.append({"wih": wih_f, "whh": whh_f,
                             "b": b_f.reshape(1, 8 * H)})
    params["layers"] = fused_layers

    # nn.Linear(H, C) and nn.Linear(H, 1): U(-1/sqrt(H), 1/sqrt(H)),
    # fused block-diagonally into a single (2H, C+1) head.
    w_fc = jax.random.uniform(next(ki), (num_classes, H), jnp.float32, -k, k)
    b_fc = jax.random.uniform(next(ki), (num_classes,), jnp.float32, -k, k)
    w_ft = jax.random.uniform(next(ki), (1, H), jnp.float32, -k, k)
    b_ft = jax.random.uniform(next(ki), (1,), jnp.float32, -k, k)
    fcw = jnp.zeros((2 * H, num_classes + 1), jnp.float32)
    fcw = fcw.at[:H, :num_classes].set(jnp.transpose(w_fc))
    fcw = fcw.at[H:, num_classes:].set(jnp.transpose(w_ft))
    params["fc_w"] = fcw
    params["fc_b"] = jnp.concatenate([b_fc, b_ft]).reshape(1, num_classes + 1)
    params["num_classes"] = num_classes
    return params


def xavier_uniform(key, shape):
    # torch.nn.init.xavier_uniform_ on a 3-D (L, B, H) tensor:
    # fan_in = B*H, fan_out = L*H
    L, B, H = shape
    fan_in, fan_out = B * H, L * H
    a = math.sqrt(6.0 / (fan_in + fan_out))
    return jax.random.uniform(key, shape, jnp.float32, -a, a)


# ----------------------------------------------------------------------------
# Forward pass (mirrors RNN.forward, eval semantics)
# ----------------------------------------------------------------------------
def rnn_forward(params, x, hidden_size, num_layers, state_key):
    B, T, F = x.shape
    H = hidden_size
    C = params["num_classes"]

    # deterministic xavier-uniform initial states (PyTorch draws these
    # stochastically inside forward; a fixed key is used here).
    ks = jax.random.split(state_key, 4)
    h0 = xavier_uniform(ks[0], (num_layers, B, H))
    c0 = xavier_uniform(ks[1], (num_layers, B, H))
    ht = xavier_uniform(ks[2], (num_layers, B, H))
    ct = xavier_uniform(ks[3], (num_layers, B, H))
    h0_f = jnp.concatenate([h0, ht], axis=-1)     # (L, B, 2H): [lstm | lstm_ts]
    c0_f = jnp.concatenate([c0, ct], axis=-1)

    # embedding lookup + feature concat (glue, plain JAX/XLA)
    temp = x[:, :, 0].astype(jnp.int32)                        # (B, T)
    embeds = jnp.take(params["embedding"], temp, axis=0)       # (B, T, E)
    embeds = jnp.concatenate([embeds, x[:, :, 1:]], axis=2)    # (B, T, D0)

    # time-major flattening for the fused kernel: row index = t*B + b
    x_flat = jnp.transpose(embeds, (1, 0, 2)).reshape(T * B, -1)

    # single fused Pallas kernel: both LSTM stacks + both FC heads
    y = fused_rnn(x_flat, params["layers"], h0_f, c0_f,
                  params["fc_w"], params["fc_b"], T=T, B=B, H=H)   # (B, C+1)

    out = y[:, :C]                   # fc(lstm last hidden)        -> (B, C)
    out_timestamp = y[:, C]          # fc_timestamp(lstm_ts last)  -> (B,)
    return out, out_timestamp


# ----------------------------------------------------------------------------
# Main
# ----------------------------------------------------------------------------
if __name__ == "__main__":
    # small synthetic config consistent with the module's constructor
    total_size = 10
    input_size = 5
    embedding_size = 8
    hidden_size = 32
    num_layers = 2
    num_classes = 6
    B, T = 2, 8

    root = jax.random.PRNGKey(0)
    k_param, k_x, k_idx, k_state = jax.random.split(root, 4)

    params = make_params(k_param, total_size, input_size, embedding_size,
                         hidden_size, num_layers, num_classes)

    # x: (B, T, input_size) float32; channel 0 carries integer event ids
    idx = jax.random.randint(k_idx, (B, T, 1), 0, total_size).astype(jnp.float32)
    feats = jax.random.uniform(k_x, (B, T, input_size - 1), jnp.float32)
    x = jnp.concatenate([idx, feats], axis=2)

    out, out_timestamp = rnn_forward(params, x, hidden_size, num_layers, k_state)
    jax.block_until_ready((out, out_timestamp))

    assert out.shape == (B, num_classes)
    assert out_timestamp.shape == (B,)
    assert bool(jnp.all(jnp.isfinite(out))) and bool(jnp.all(jnp.isfinite(out_timestamp)))
    print("KERNEL_OK")
</pallas_src>

<mosaic_0001>
module attributes {stable_mosaic.version = 11 : i64} {
  func.func @kernel(%arg0: memref<16x12xf32, #tpu.memory_space<vmem>>, %arg1: memref<12x256xf32, #tpu.memory_space<vmem>>, %arg2: memref<64x256xf32, #tpu.memory_space<vmem>>, %arg3: memref<1x256xf32, #tpu.memory_space<vmem>>, %arg4: memref<64x256xf32, #tpu.memory_space<vmem>>, %arg5: memref<64x256xf32, #tpu.memory_space<vmem>>, %arg6: memref<1x256xf32, #tpu.memory_space<vmem>>, %arg7: memref<2x2x64xf32, #tpu.memory_space<vmem>>, %arg8: memref<2x2x64xf32, #tpu.memory_space<vmem>>, %arg9: memref<64x7xf32, #tpu.memory_space<vmem>>, %arg10: memref<1x7xf32, #tpu.memory_space<vmem>>, %arg11: memref<2x7xf32, #tpu.memory_space<vmem>>) attributes {dimension_semantics = [], scalar_prefetch = 0 : i64, scratch_operands = 0 : i64, tpu.core_type = #tpu.core_type<tc>} {
    %c0 = arith.constant 0 : index
    %c0_0 = arith.constant 0 : index
    %0 = vector.load %arg0[%c0, %c0_0] : memref<16x12xf32, #tpu.memory_space<vmem>>, vector<16x12xf32>
    %c0_1 = arith.constant 0 : index
    %c0_2 = arith.constant 0 : index
    %1 = vector.load %arg1[%c0_1, %c0_2] : memref<12x256xf32, #tpu.memory_space<vmem>>, vector<12x256xf32>
    %cst = arith.constant dense<0.000000e+00> : vector<16x256xf32>
    %2 = tpu.matmul %0, %1, %cst {dimension_numbers = #tpu.dot_dimension_numbers<[1], [0], [0], [1], [0, 0, 1, 1], [], []>} : vector<16x12xf32>, vector<12x256xf32>, vector<16x256xf32> -> vector<16x256xf32>
    %c0_3 = arith.constant 0 : index
    %c0_4 = arith.constant 0 : index
    %3 = vector.load %arg3[%c0_3, %c0_4] : memref<1x256xf32, #tpu.memory_space<vmem>>, vector<1x256xf32>
    %4 = vector.broadcast %3 : vector<1x256xf32> to vector<16x256xf32>
    %5 = arith.addf %2, %4 : vector<16x256xf32>
    %c0_5 = arith.constant 0 : index
    %c0_6 = arith.constant 0 : index
    %6 = vector.load %arg2[%c0_5, %c0_6] : memref<64x256xf32, #tpu.memory_space<vmem>>, vector<64x256xf32>
    %c0_7 = arith.constant 0 : index
    %c0_8 = arith.constant 0 : index
    %c0_9 = arith.constant 0 : index
    %7 = vector.load %arg7[%c0_7, %c0_8, %c0_9] : memref<2x2x64xf32, #tpu.memory_space<vmem>>, vector<1x2x64xf32>
    %8 = vector.shape_cast %7 : vector<1x2x64xf32> to vector<2x64xf32>
    %c0_10 = arith.constant 0 : index
    %c0_11 = arith.constant 0 : index
    %c0_12 = arith.constant 0 : index
    %9 = vector.load %arg8[%c0_10, %c0_11, %c0_12] : memref<2x2x64xf32, #tpu.memory_space<vmem>>, vector<1x2x64xf32>
    %10 = vector.shape_cast %9 : vector<1x2x64xf32> to vector<2x64xf32>
    %11 = vector.extract_strided_slice %5 {offsets = [0, 0], sizes = [2, 256], strides = [1, 1]} : vector<16x256xf32> to vector<2x256xf32>
    %cst_13 = arith.constant dense<0.000000e+00> : vector<2x256xf32>
    %12 = tpu.matmul %8, %6, %cst_13 {dimension_numbers = #tpu.dot_dimension_numbers<[1], [0], [0], [1], [0, 0, 1, 1], [], []>} : vector<2x64xf32>, vector<64x256xf32>, vector<2x256xf32> -> vector<2x256xf32>
    %13 = arith.addf %11, %12 : vector<2x256xf32>
    %14 = vector.extract_strided_slice %13 {offsets = [0, 0], sizes = [2, 64], strides = [1, 1]} : vector<2x256xf32> to vector<2x64xf32>
    %15 = arith.negf %14 : vector<2x64xf32>
    %16 = math.exp %15 : vector<2x64xf32>
    %cst_14 = arith.constant 1.000000e+00 : f32
    %17 = vector.broadcast %cst_14 : f32 to vector<2x64xf32>
    %18 = arith.addf %17, %16 : vector<2x64xf32>
    %19 = arith.divf %17, %18 : vector<2x64xf32>
    %20 = vector.extract_strided_slice %13 {offsets = [0, 64], sizes = [2, 64], strides = [1, 1]} : vector<2x256xf32> to vector<2x64xf32>
    %21 = arith.negf %20 : vector<2x64xf32>
    %22 = math.exp %21 : vector<2x64xf32>
    %cst_15 = arith.constant 1.000000e+00 : f32
    %23 = vector.broadcast %cst_15 : f32 to vector<2x64xf32>
    %24 = arith.addf %23, %22 : vector<2x64xf32>
    %25 = arith.divf %23, %24 : vector<2x64xf32>
    %26 = vector.extract_strided_slice %13 {offsets = [0, 128], sizes = [2, 64], strides = [1, 1]} : vector<2x256xf32> to vector<2x64xf32>
    %27 = math.tanh %26 : vector<2x64xf32>
    %28 = vector.extract_strided_slice %13 {offsets = [0, 192], sizes = [2, 64], strides = [1, 1]} : vector<2x256xf32> to vector<2x64xf32>
    %29 = arith.negf %28 : vector<2x64xf32>
    %30 = math.exp %29 : vector<2x64xf32>
    %cst_16 = arith.constant 1.000000e+00 : f32
    %31 = vector.broadcast %cst_16 : f32 to vector<2x64xf32>
    %32 = arith.addf %31, %30 : vector<2x64xf32>
    %33 = arith.divf %31, %32 : vector<2x64xf32>
    %34 = arith.mulf %25, %10 : vector<2x64xf32>
    %35 = arith.mulf %19, %27 : vector<2x64xf32>
    %36 = arith.addf %34, %35 : vector<2x64xf32>
    %37 = math.tanh %36 : vector<2x64xf32>
    %38 = arith.mulf %33, %37 : vector<2x64xf32>
    %39 = vector.extract_strided_slice %5 {offsets = [2, 0], sizes = [2, 256], strides = [1, 1]} : vector<16x256xf32> to vector<2x256xf32>
    %cst_17 = arith.constant dense<0.000000e+00> : vector<2x256xf32>
    %40 = tpu.matmul %38, %6, %cst_17 {dimension_numbers = #tpu.dot_dimension_numbers<[1], [0], [0], [1], [0, 0, 1, 1], [], []>} : vector<2x64xf32>, vector<64x256xf32>, vector<2x256xf32> -> vector<2x256xf32>
    %41 = arith.addf %39, %40 : vector<2x256xf32>
    %42 = vector.extract_strided_slice %41 {offsets = [0, 0], sizes = [2, 64], strides = [1, 1]} : vector<2x256xf32> to vector<2x64xf32>
    %43 = arith.negf %42 : vector<2x64xf32>
    %44 = math.exp %43 : vector<2x64xf32>
    %cst_18 = arith.constant 1.000000e+00 : f32
    %45 = vector.broadcast %cst_18 : f32 to vector<2x64xf32>
    %46 = arith.addf %45, %44 : vector<2x64xf32>
    %47 = arith.divf %45, %46 : vector<2x64xf32>
    %48 = vector.extract_strided_slice %41 {offsets = [0, 64], sizes = [2, 64], strides = [1, 1]} : vector<2x256xf32> to vector<2x64xf32>
    %49 = arith.negf %48 : vector<2x64xf32>
    %50 = math.exp %49 : vector<2x64xf32>
    %cst_19 = arith.constant 1.000000e+00 : f32
    %51 = vector.broadcast %cst_19 : f32 to vector<2x64xf32>
    %52 = arith.addf %51, %50 : vector<2x64xf32>
    %53 = arith.divf %51, %52 : vector<2x64xf32>
    %54 = vector.extract_strided_slice %41 {offsets = [0, 128], sizes = [2, 64], strides = [1, 1]} : vector<2x256xf32> to vector<2x64xf32>
    %55 = math.tanh %54 : vector<2x64xf32>
    %56 = vector.extract_strided_slice %41 {offsets = [0, 192], sizes = [2, 64], strides = [1, 1]} : vector<2x256xf32> to vector<2x64xf32>
    %57 = arith.negf %56 : vector<2x64xf32>
    %58 = math.exp %57 : vector<2x64xf32>
    %cst_20 = arith.constant 1.000000e+00 : f32
    %59 = vector.broadcast %cst_20 : f32 to vector<2x64xf32>
    %60 = arith.addf %59, %58 : vector<2x64xf32>
    %61 = arith.divf %59, %60 : vector<2x64xf32>
    %62 = arith.mulf %53, %36 : vector<2x64xf32>
    %63 = arith.mulf %47, %55 : vector<2x64xf32>
    %64 = arith.addf %62, %63 : vector<2x64xf32>
    %65 = math.tanh %64 : vector<2x64xf32>
    %66 = arith.mulf %61, %65 : vector<2x64xf32>
    %67 = vector.extract_strided_slice %5 {offsets = [4, 0], sizes = [2, 256], strides = [1, 1]} : vector<16x256xf32> to vector<2x256xf32>
    %cst_21 = arith.constant dense<0.000000e+00> : vector<2x256xf32>
    %68 = tpu.matmul %66, %6, %cst_21 {dimension_numbers = #tpu.dot_dimension_numbers<[1], [0], [0], [1], [0, 0, 1, 1], [], []>} : vector<2x64xf32>, vector<64x256xf32>, vector<2x256xf32> -> vector<2x256xf32>
    %69 = arith.addf %67, %68 : vector<2x256xf32>
    %70 = vector.extract_strided_slice %69 {offsets = [0, 0], sizes = [2, 64], strides = [1, 1]} : vector<2x256xf32> to vector<2x64xf32>
    %71 = arith.negf %70 : vector<2x64xf32>
    %72 = math.exp %71 : vector<2x64xf32>
    %cst_22 = arith.constant 1.000000e+00 : f32
    %73 = vector.broadcast %cst_22 : f32 to vector<2x64xf32>
    %74 = arith.addf %73, %72 : vector<2x64xf32>
    %75 = arith.divf %73, %74 : vector<2x64xf32>
    %76 = vector.extract_strided_slice %69 {offsets = [0, 64], sizes = [2, 64], strides = [1, 1]} : vector<2x256xf32> to vector<2x64xf32>
    %77 = arith.negf %76 : vector<2x64xf32>
    %78 = math.exp %77 : vector<2x64xf32>
    %cst_23 = arith.constant 1.000000e+00 : f32
    %79 = vector.broadcast %cst_23 : f32 to vector<2x64xf32>
    %80 = arith.addf %79, %78 : vector<2x64xf32>
    %81 = arith.divf %79, %80 : vector<2x64xf32>
    %82 = vector.extract_strided_slice %69 {offsets = [0, 128], sizes = [2, 64], strides = [1, 1]} : vector<2x256xf32> to vector<2x64xf32>
    %83 = math.tanh %82 : vector<2x64xf32>
    %84 = vector.extract_strided_slice %69 {offsets = [0, 192], sizes = [2, 64], strides = [1, 1]} : vector<2x256xf32> to vector<2x64xf32>
    %85 = arith.negf %84 : vector<2x64xf32>
    %86 = math.exp %85 : vector<2x64xf32>
    %cst_24 = arith.constant 1.000000e+00 : f32
    %87 = vector.broadcast %cst_24 : f32 to vector<2x64xf32>
    %88 = arith.addf %87, %86 : vector<2x64xf32>
    %89 = arith.divf %87, %88 : vector<2x64xf32>
    %90 = arith.mulf %81, %64 : vector<2x64xf32>
    %91 = arith.mulf %75, %83 : vector<2x64xf32>
    %92 = arith.addf %90, %91 : vector<2x64xf32>
    %93 = math.tanh %92 : vector<2x64xf32>
    %94 = arith.mulf %89, %93 : vector<2x64xf32>
    %95 = vector.extract_strided_slice %5 {offsets = [6, 0], sizes = [2, 256], strides = [1, 1]} : vector<16x256xf32> to vector<2x256xf32>
    %cst_25 = arith.constant dense<0.000000e+00> : vector<2x256xf32>
    %96 = tpu.matmul %94, %6, %cst_25 {dimension_numbers = #tpu.dot_dimension_numbers<[1], [0], [0], [1], [0, 0, 1, 1], [], []>} : vector<2x64xf32>, vector<64x256xf32>, vector<2x256xf32> -> vector<2x256xf32>
    %97 = arith.addf %95, %96 : vector<2x256xf32>
    %98 = vector.extract_strided_slice %97 {offsets = [0, 0], sizes = [2, 64], strides = [1, 1]} : vector<2x256xf32> to vector<2x64xf32>
    %99 = arith.negf %98 : vector<2x64xf32>
    %100 = math.exp %99 : vector<2x64xf32>
    %cst_26 = arith.constant 1.000000e+00 : f32
    %101 = vector.broadcast %cst_26 : f32 to vector<2x64xf32>
    %102 = arith.addf %101, %100 : vector<2x64xf32>
    %103 = arith.divf %101, %102 : vector<2x64xf32>
    %104 = vector.extract_strided_slice %97 {offsets = [0, 64], sizes = [2, 64], strides = [1, 1]} : vector<2x256xf32> to vector<2x64xf32>
    %105 = arith.negf %104 : vector<2x64xf32>
    %106 = math.exp %105 : vector<2x64xf32>
    %cst_27 = arith.constant 1.000000e+00 : f32
    %107 = vector.broadcast %cst_27 : f32 to vector<2x64xf32>
    %108 = arith.addf %107, %106 : vector<2x64xf32>
    %109 = arith.divf %107, %108 : vector<2x64xf32>
    %110 = vector.extract_strided_slice %97 {offsets = [0, 128], sizes = [2, 64], strides = [1, 1]} : vector<2x256xf32> to vector<2x64xf32>
    %111 = math.tanh %110 : vector<2x64xf32>
    %112 = vector.extract_strided_slice %97 {offsets = [0, 192], sizes = [2, 64], strides = [1, 1]} : vector<2x256xf32> to vector<2x64xf32>
    %113 = arith.negf %112 : vector<2x64xf32>
    %114 = math.exp %113 : vector<2x64xf32>
    %cst_28 = arith.constant 1.000000e+00 : f32
    %115 = vector.broadcast %cst_28 : f32 to vector<2x64xf32>
    %116 = arith.addf %115, %114 : vector<2x64xf32>
    %117 = arith.divf %115, %116 : vector<2x64xf32>
    %118 = arith.mulf %109, %92 : vector<2x64xf32>
    %119 = arith.mulf %103, %111 : vector<2x64xf32>
    %120 = arith.addf %118, %119 : vector<2x64xf32>
    %121 = math.tanh %120 : vector<2x64xf32>
    %122 = arith.mulf %117, %121 : vector<2x64xf32>
    %123 = vector.extract_strided_slice %5 {offsets = [8, 0], sizes = [2, 256], strides = [1, 1]} : vector<16x256xf32> to vector<2x256xf32>
    %cst_29 = arith.constant dense<0.000000e+00> : vector<2x256xf32>
    %124 = tpu.matmul %122, %6, %cst_29 {dimension_numbers = #tpu.dot_dimension_numbers<[1], [0], [0], [1], [0, 0, 1, 1], [], []>} : vector<2x64xf32>, vector<64x256xf32>, vector<2x256xf32> -> vector<2x256xf32>
    %125 = arith.addf %123, %124 : vector<2x256xf32>
    %126 = vector.extract_strided_slice %125 {offsets = [0, 0], sizes = [2, 64], strides = [1, 1]} : vector<2x256xf32> to vector<2x64xf32>
    %127 = arith.negf %126 : vector<2x64xf32>
    %128 = math.exp %127 : vector<2x64xf32>
    %cst_30 = arith.constant 1.000000e+00 : f32
    %129 = vector.broadcast %cst_30 : f32 to vector<2x64xf32>
    %130 = arith.addf %129, %128 : vector<2x64xf32>
    %131 = arith.divf %129, %130 : vector<2x64xf32>
    %132 = vector.extract_strided_slice %125 {offsets = [0, 64], sizes = [2, 64], strides = [1, 1]} : vector<2x256xf32> to vector<2x64xf32>
    %133 = arith.negf %132 : vector<2x64xf32>
    %134 = math.exp %133 : vector<2x64xf32>
    %cst_31 = arith.constant 1.000000e+00 : f32
    %135 = vector.broadcast %cst_31 : f32 to vector<2x64xf32>
    %136 = arith.addf %135, %134 : vector<2x64xf32>
    %137 = arith.divf %135, %136 : vector<2x64xf32>
    %138 = vector.extract_strided_slice %125 {offsets = [0, 128], sizes = [2, 64], strides = [1, 1]} : vector<2x256xf32> to vector<2x64xf32>
    %139 = math.tanh %138 : vector<2x64xf32>
    %140 = vector.extract_strided_slice %125 {offsets = [0, 192], sizes = [2, 64], strides = [1, 1]} : vector<2x256xf32> to vector<2x64xf32>
    %141 = arith.negf %140 : vector<2x64xf32>
    %142 = math.exp %141 : vector<2x64xf32>
    %cst_32 = arith.constant 1.000000e+00 : f32
    %143 = vector.broadcast %cst_32 : f32 to vector<2x64xf32>
    %144 = arith.addf %143, %142 : vector<2x64xf32>
    %145 = arith.divf %143, %144 : vector<2x64xf32>
    %146 = arith.mulf %137, %120 : vector<2x64xf32>
    %147 = arith.mulf %131, %139 : vector<2x64xf32>
    %148 = arith.addf %146, %147 : vector<2x64xf32>
    %149 = math.tanh %148 : vector<2x64xf32>
    %150 = arith.mulf %145, %149 : vector<2x64xf32>
    %151 = vector.extract_strided_slice %5 {offsets = [10, 0], sizes = [2, 256], strides = [1, 1]} : vector<16x256xf32> to vector<2x256xf32>
    %cst_33 = arith.constant dense<0.000000e+00> : vector<2x256xf32>
    %152 = tpu.matmul %150, %6, %cst_33 {dimension_numbers = #tpu.dot_dimension_numbers<[1], [0], [0], [1], [0, 0, 1, 1], [], []>} : vector<2x64xf32>, vector<64x256xf32>, vector<2x256xf32> -> vector<2x256xf32>
    %153 = arith.addf %151, %152 : vector<2x256xf32>
    %154 = vector.extract_strided_slice %153 {offsets = [0, 0], sizes = [2, 64], strides = [1, 1]} : vector<2x256xf32> to vector<2x64xf32>
    %155 = arith.negf %154 : vector<2x64xf32>
    %156 = math.exp %155 : vector<2x64xf32>
    %cst_34 = arith.constant 1.000000e+00 : f32
    %157 = vector.broadcast %cst_34 : f32 to vector<2x64xf32>
    %158 = arith.addf %157, %156 : vector<2x64xf32>
    %159 = arith.divf %157, %158 : vector<2x64xf32>
    %160 = vector.extract_strided_slice %153 {offsets = [0, 64], sizes = [2, 64], strides = [1, 1]} : vector<2x256xf32> to vector<2x64xf32>
    %161 = arith.negf %160 : vector<2x64xf32>
    %162 = math.exp %161 : vector<2x64xf32>
    %cst_35 = arith.constant 1.000000e+00 : f32
    %163 = vector.broadcast %cst_35 : f32 to vector<2x64xf32>
    %164 = arith.addf %163, %162 : vector<2x64xf32>
    %165 = arith.divf %163, %164 : vector<2x64xf32>
    %166 = vector.extract_strided_slice %153 {offsets = [0, 128], sizes = [2, 64], strides = [1, 1]} : vector<2x256xf32> to vector<2x64xf32>
    %167 = math.tanh %166 : vector<2x64xf32>
    %168 = vector.extract_strided_slice %153 {offsets = [0, 192], sizes = [2, 64], strides = [1, 1]} : vector<2x256xf32> to vector<2x64xf32>
    %169 = arith.negf %168 : vector<2x64xf32>
    %170 = math.exp %169 : vector<2x64xf32>
    %cst_36 = arith.constant 1.000000e+00 : f32
    %171 = vector.broadcast %cst_36 : f32 to vector<2x64xf32>
    %172 = arith.addf %171, %170 : vector<2x64xf32>
    %173 = arith.divf %171, %172 : vector<2x64xf32>
    %174 = arith.mulf %165, %148 : vector<2x64xf32>
    %175 = arith.mulf %159, %167 : vector<2x64xf32>
    %176 = arith.addf %174, %175 : vector<2x64xf32>
    %177 = math.tanh %176 : vector<2x64xf32>
    %178 = arith.mulf %173, %177 : vector<2x64xf32>
    %179 = vector.extract_strided_slice %5 {offsets = [12, 0], sizes = [2, 256], strides = [1, 1]} : vector<16x256xf32> to vector<2x256xf32>
    %cst_37 = arith.constant dense<0.000000e+00> : vector<2x256xf32>
    %180 = tpu.matmul %178, %6, %cst_37 {dimension_numbers = #tpu.dot_dimension_numbers<[1], [0], [0], [1], [0, 0, 1, 1], [], []>} : vector<2x64xf32>, vector<64x256xf32>, vector<2x256xf32> -> vector<2x256xf32>
    %181 = arith.addf %179, %180 : vector<2x256xf32>
    %182 = vector.extract_strided_slice %181 {offsets = [0, 0], sizes = [2, 64], strides = [1, 1]} : vector<2x256xf32> to vector<2x64xf32>
    %183 = arith.negf %182 : vector<2x64xf32>
    %184 = math.exp %183 : vector<2x64xf32>
    %cst_38 = arith.constant 1.000000e+00 : f32
    %185 = vector.broadcast %cst_38 : f32 to vector<2x64xf32>
    %186 = arith.addf %185, %184 : vector<2x64xf32>
    %187 = arith.divf %185, %186 : vector<2x64xf32>
    %188 = vector.extract_strided_slice %181 {offsets = [0, 64], sizes = [2, 64], strides = [1, 1]} : vector<2x256xf32> to vector<2x64xf32>
    %189 = arith.negf %188 : vector<2x64xf32>
    %190 = math.exp %189 : vector<2x64xf32>
    %cst_39 = arith.constant 1.000000e+00 : f32
    %191 = vector.broadcast %cst_39 : f32 to vector<2x64xf32>
    %192 = arith.addf %191, %190 : vector<2x64xf32>
    %193 = arith.divf %191, %192 : vector<2x64xf32>
    %194 = vector.extract_strided_slice %181 {offsets = [0, 128], sizes = [2, 64], strides = [1, 1]} : vector<2x256xf32> to vector<2x64xf32>
    %195 = math.tanh %194 : vector<2x64xf32>
    %196 = vector.extract_strided_slice %181 {offsets = [0, 192], sizes = [2, 64], strides = [1, 1]} : vector<2x256xf32> to vector<2x64xf32>
    %197 = arith.negf %196 : vector<2x64xf32>
    %198 = math.exp %197 : vector<2x64xf32>
    %cst_40 = arith.constant 1.000000e+00 : f32
    %199 = vector.broadcast %cst_40 : f32 to vector<2x64xf32>
    %200 = arith.addf %199, %198 : vector<2x64xf32>
    %201 = arith.divf %199, %200 : vector<2x64xf32>
    %202 = arith.mulf %193, %176 : vector<2x64xf32>
    %203 = arith.mulf %187, %195 : vector<2x64xf32>
    %204 = arith.addf %202, %203 : vector<2x64xf32>
    %205 = math.tanh %204 : vector<2x64xf32>
    %206 = arith.mulf %201, %205 : vector<2x64xf32>
    %207 = vector.extract_strided_slice %5 {offsets = [14, 0], sizes = [2, 256], strides = [1, 1]} : vector<16x256xf32> to vector<2x256xf32>
    %cst_41 = arith.constant dense<0.000000e+00> : vector<2x256xf32>
    %208 = tpu.matmul %206, %6, %cst_41 {dimension_numbers = #tpu.dot_dimension_numbers<[1], [0], [0], [1], [0, 0, 1, 1], [], []>} : vector<2x64xf32>, vector<64x256xf32>, vector<2x256xf32> -> vector<2x256xf32>
    %209 = arith.addf %207, %208 : vector<2x256xf32>
    %210 = vector.extract_strided_slice %209 {offsets = [0, 0], sizes = [2, 64], strides = [1, 1]} : vector<2x256xf32> to vector<2x64xf32>
    %211 = arith.negf %210 : vector<2x64xf32>
    %212 = math.exp %211 : vector<2x64xf32>
    %cst_42 = arith.constant 1.000000e+00 : f32
    %213 = vector.broadcast %cst_42 : f32 to vector<2x64xf32>
    %214 = arith.addf %213, %212 : vector<2x64xf32>
    %215 = arith.divf %213, %214 : vector<2x64xf32>
    %216 = vector.extract_strided_slice %209 {offsets = [0, 64], sizes = [2, 64], strides = [1, 1]} : vector<2x256xf32> to vector<2x64xf32>
    %217 = arith.negf %216 : vector<2x64xf32>
    %218 = math.exp %217 : vector<2x64xf32>
    %cst_43 = arith.constant 1.000000e+00 : f32
    %219 = vector.broadcast %cst_43 : f32 to vector<2x64xf32>
    %220 = arith.addf %219, %218 : vector<2x64xf32>
    %221 = arith.divf %219, %220 : vector<2x64xf32>
    %222 = vector.extract_strided_slice %209 {offsets = [0, 128], sizes = [2, 64], strides = [1, 1]} : vector<2x256xf32> to vector<2x64xf32>
    %223 = math.tanh %222 : vector<2x64xf32>
    %224 = vector.extract_strided_slice %209 {offsets = [0, 192], sizes = [2, 64], strides = [1, 1]} : vector<2x256xf32> to vector<2x64xf32>
    %225 = arith.negf %224 : vector<2x64xf32>
    %226 = math.exp %225 : vector<2x64xf32>
    %cst_44 = arith.constant 1.000000e+00 : f32
    %227 = vector.broadcast %cst_44 : f32 to vector<2x64xf32>
    %228 = arith.addf %227, %226 : vector<2x64xf32>
    %229 = arith.divf %227, %228 : vector<2x64xf32>
    %230 = arith.mulf %221, %204 : vector<2x64xf32>
    %231 = arith.mulf %215, %223 : vector<2x64xf32>
    %232 = arith.addf %230, %231 : vector<2x64xf32>
    %233 = math.tanh %232 : vector<2x64xf32>
    %234 = arith.mulf %229, %233 : vector<2x64xf32>
    %c0_45 = arith.constant 0 : index
    %c0_46 = arith.constant 0 : index
    %235 = vector.load %arg4[%c0_45, %c0_46] : memref<64x256xf32, #tpu.memory_space<vmem>>, vector<64x256xf32>
    %c0_47 = arith.constant 0 : index
    %c0_48 = arith.constant 0 : index
    %236 = vector.load %arg5[%c0_47, %c0_48] : memref<64x256xf32, #tpu.memory_space<vmem>>, vector<64x256xf32>
    %c0_49 = arith.constant 0 : index
    %c0_50 = arith.constant 0 : index
    %237 = vector.load %arg6[%c0_49, %c0_50] : memref<1x256xf32, #tpu.memory_space<vmem>>, vector<1x256xf32>
    %c1 = arith.constant 1 : index
    %c0_51 = arith.constant 0 : index
    %c0_52 = arith.constant 0 : index
    %238 = vector.load %arg7[%c1, %c0_51, %c0_52] : memref<2x2x64xf32, #tpu.memory_space<vmem>>, vector<1x2x64xf32>
    %239 = vector.shape_cast %238 : vector<1x2x64xf32> to vector<2x64xf32>
    %c1_53 = arith.constant 1 : index
    %c0_54 = arith.constant 0 : index
    %c0_55 = arith.constant 0 : index
    %240 = vector.load %arg8[%c1_53, %c0_54, %c0_55] : memref<2x2x64xf32, #tpu.memory_space<vmem>>, vector<1x2x64xf32>
    %241 = vector.shape_cast %240 : vector<1x2x64xf32> to vector<2x64xf32>
    %cst_56 = arith.constant dense<0.000000e+00> : vector<2x256xf32>
    %242 = tpu.matmul %38, %235, %cst_56 {dimension_numbers = #tpu.dot_dimension_numbers<[1], [0], [0], [1], [0, 0, 1, 1], [], []>} : vector<2x64xf32>, vector<64x256xf32>, vector<2x256xf32> -> vector<2x256xf32>
    %cst_57 = arith.constant dense<0.000000e+00> : vector<2x256xf32>
    %243 = tpu.matmul %239, %236, %cst_57 {dimension_numbers = #tpu.dot_dimension_numbers<[1], [0], [0], [1], [0, 0, 1, 1], [], []>} : vector<2x64xf32>, vector<64x256xf32>, vector<2x256xf32> -> vector<2x256xf32>
    %244 = arith.addf %242, %243 : vector<2x256xf32>
    %245 = vector.broadcast %237 : vector<1x256xf32> to vector<2x256xf32>
    %246 = arith.addf %244, %245 : vector<2x256xf32>
    %247 = vector.extract_strided_slice %246 {offsets = [0, 0], sizes = [2, 64], strides = [1, 1]} : vector<2x256xf32> to vector<2x64xf32>
    %248 = arith.negf %247 : vector<2x64xf32>
    %249 = math.exp %248 : vector<2x64xf32>
    %cst_58 = arith.constant 1.000000e+00 : f32
    %250 = vector.broadcast %cst_58 : f32 to vector<2x64xf32>
    %251 = arith.addf %250, %249 : vector<2x64xf32>
    %252 = arith.divf %250, %251 : vector<2x64xf32>
    %253 = vector.extract_strided_slice %246 {offsets = [0, 64], sizes = [2, 64], strides = [1, 1]} : vector<2x256xf32> to vector<2x64xf32>
    %254 = arith.negf %253 : vector<2x64xf32>
    %255 = math.exp %254 : vector<2x64xf32>
    %cst_59 = arith.constant 1.000000e+00 : f32
    %256 = vector.broadcast %cst_59 : f32 to vector<2x64xf32>
    %257 = arith.addf %256, %255 : vector<2x64xf32>
    %258 = arith.divf %256, %257 : vector<2x64xf32>
    %259 = vector.extract_strided_slice %246 {offsets = [0, 128], sizes = [2, 64], strides = [1, 1]} : vector<2x256xf32> to vector<2x64xf32>
    %260 = math.tanh %259 : vector<2x64xf32>
    %261 = vector.extract_strided_slice %246 {offsets = [0, 192], sizes = [2, 64], strides = [1, 1]} : vector<2x256xf32> to vector<2x64xf32>
    %262 = arith.negf %261 : vector<2x64xf32>
    %263 = math.exp %262 : vector<2x64xf32>
    %cst_60 = arith.constant 1.000000e+00 : f32
    %264 = vector.broadcast %cst_60 : f32 to vector<2x64xf32>
    %265 = arith.addf %264, %263 : vector<2x64xf32>
    %266 = arith.divf %264, %265 : vector<2x64xf32>
    %267 = arith.mulf %258, %241 : vector<2x64xf32>
    %268 = arith.mulf %252, %260 : vector<2x64xf32>
    %269 = arith.addf %267, %268 : vector<2x64xf32>
    %270 = math.tanh %269 : vector<2x64xf32>
    %271 = arith.mulf %266, %270 : vector<2x64xf32>
    %cst_61 = arith.constant dense<0.000000e+00> : vector<2x256xf32>
    %272 = tpu.matmul %66, %235, %cst_61 {dimension_numbers = #tpu.dot_dimension_numbers<[1], [0], [0], [1], [0, 0, 1, 1], [], []>} : vector<2x64xf32>, vector<64x256xf32>, vector<2x256xf32> -> vector<2x256xf32>
    %cst_62 = arith.constant dense<0.000000e+00> : vector<2x256xf32>
    %273 = tpu.matmul %271, %236, %cst_62 {dimension_numbers = #tpu.dot_dimension_numbers<[1], [0], [0], [1], [0, 0, 1, 1], [], []>} : vector<2x64xf32>, vector<64x256xf32>, vector<2x256xf32> -> vector<2x256xf32>
    %274 = arith.addf %272, %273 : vector<2x256xf32>
    %275 = vector.broadcast %237 : vector<1x256xf32> to vector<2x256xf32>
    %276 = arith.addf %274, %275 : vector<2x256xf32>
    %277 = vector.extract_strided_slice %276 {offsets = [0, 0], sizes = [2, 64], strides = [1, 1]} : vector<2x256xf32> to vector<2x64xf32>
    %278 = arith.negf %277 : vector<2x64xf32>
    %279 = math.exp %278 : vector<2x64xf32>
    %cst_63 = arith.constant 1.000000e+00 : f32
    %280 = vector.broadcast %cst_63 : f32 to vector<2x64xf32>
    %281 = arith.addf %280, %279 : vector<2x64xf32>
    %282 = arith.divf %280, %281 : vector<2x64xf32>
    %283 = vector.extract_strided_slice %276 {offsets = [0, 64], sizes = [2, 64], strides = [1, 1]} : vector<2x256xf32> to vector<2x64xf32>
    %284 = arith.negf %283 : vector<2x64xf32>
    %285 = math.exp %284 : vector<2x64xf32>
    %cst_64 = arith.constant 1.000000e+00 : f32
    %286 = vector.broadcast %cst_64 : f32 to vector<2x64xf32>
    %287 = arith.addf %286, %285 : vector<2x64xf32>
    %288 = arith.divf %286, %287 : vector<2x64xf32>
    %289 = vector.extract_strided_slice %276 {offsets = [0, 128], sizes = [2, 64], strides = [1, 1]} : vector<2x256xf32> to vector<2x64xf32>
    %290 = math.tanh %289 : vector<2x64xf32>
    %291 = vector.extract_strided_slice %276 {offsets = [0, 192], sizes = [2, 64], strides = [1, 1]} : vector<2x256xf32> to vector<2x64xf32>
    %292 = arith.negf %291 : vector<2x64xf32>
    %293 = math.exp %292 : vector<2x64xf32>
    %cst_65 = arith.constant 1.000000e+00 : f32
    %294 = vector.broadcast %cst_65 : f32 to vector<2x64xf32>
    %295 = arith.addf %294, %293 : vector<2x64xf32>
    %296 = arith.divf %294, %295 : vector<2x64xf32>
    %297 = arith.mulf %288, %269 : vector<2x64xf32>
    %298 = arith.mulf %282, %290 : vector<2x64xf32>
    %299 = arith.addf %297, %298 : vector<2x64xf32>
    %300 = math.tanh %299 : vector<2x64xf32>
    %301 = arith.mulf %296, %300 : vector<2x64xf32>
    %cst_66 = arith.constant dense<0.000000e+00> : vector<2x256xf32>
    %302 = tpu.matmul %94, %235, %cst_66 {dimension_numbers = #tpu.dot_dimension_numbers<[1], [0], [0], [1], [0, 0, 1, 1], [], []>} : vector<2x64xf32>, vector<64x256xf32>, vector<2x256xf32> -> vector<2x256xf32>
    %cst_67 = arith.constant dense<0.000000e+00> : vector<2x256xf32>
    %303 = tpu.matmul %301, %236, %cst_67 {dimension_numbers = #tpu.dot_dimension_numbers<[1], [0], [0], [1], [0, 0, 1, 1], [], []>} : vector<2x64xf32>, vector<64x256xf32>, vector<2x256xf32> -> vector<2x256xf32>
    %304 = arith.addf %302, %303 : vector<2x256xf32>
    %305 = vector.broadcast %237 : vector<1x256xf32> to vector<2x256xf32>
    %306 = arith.addf %304, %305 : vector<2x256xf32>
    %307 = vector.extract_strided_slice %306 {offsets = [0, 0], sizes = [2, 64], strides = [1, 1]} : vector<2x256xf32> to vector<2x64xf32>
    %308 = arith.negf %307 : vector<2x64xf32>
    %309 = math.exp %308 : vector<2x64xf32>
    %cst_68 = arith.constant 1.000000e+00 : f32
    %310 = vector.broadcast %cst_68 : f32 to vector<2x64xf32>
    %311 = arith.addf %310, %309 : vector<2x64xf32>
    %312 = arith.divf %310, %311 : vector<2x64xf32>
    %313 = vector.extract_strided_slice %306 {offsets = [0, 64], sizes = [2, 64], strides = [1, 1]} : vector<2x256xf32> to vector<2x64xf32>
    %314 = arith.negf %313 : vector<2x64xf32>
    %315 = math.exp %314 : vector<2x64xf32>
    %cst_69 = arith.constant 1.000000e+00 : f32
    %316 = vector.broadcast %cst_69 : f32 to vector<2x64xf32>
    %317 = arith.addf %316, %315 : vector<2x64xf32>
    %318 = arith.divf %316, %317 : vector<2x64xf32>
    %319 = vector.extract_strided_slice %306 {offsets = [0, 128], sizes = [2, 64], strides = [1, 1]} : vector<2x256xf32> to vector<2x64xf32>
    %320 = math.tanh %319 : vector<2x64xf32>
    %321 = vector.extract_strided_slice %306 {offsets = [0, 192], sizes = [2, 64], strides = [1, 1]} : vector<2x256xf32> to vector<2x64xf32>
    %322 = arith.negf %321 : vector<2x64xf32>
    %323 = math.exp %322 : vector<2x64xf32>
    %cst_70 = arith.constant 1.000000e+00 : f32
    %324 = vector.broadcast %cst_70 : f32 to vector<2x64xf32>
    %325 = arith.addf %324, %323 : vector<2x64xf32>
    %326 = arith.divf %324, %325 : vector<2x64xf32>
    %327 = arith.mulf %318, %299 : vector<2x64xf32>
    %328 = arith.mulf %312, %320 : vector<2x64xf32>
    %329 = arith.addf %327, %328 : vector<2x64xf32>
    %330 = math.tanh %329 : vector<2x64xf32>
    %331 = arith.mulf %326, %330 : vector<2x64xf32>
    %cst_71 = arith.constant dense<0.000000e+00> : vector<2x256xf32>
    %332 = tpu.matmul %122, %235, %cst_71 {dimension_numbers = #tpu.dot_dimension_numbers<[1], [0], [0], [1], [0, 0, 1, 1], [], []>} : vector<2x64xf32>, vector<64x256xf32>, vector<2x256xf32> -> vector<2x256xf32>
    %cst_72 = arith.constant dense<0.000000e+00> : vector<2x256xf32>
    %333 = tpu.matmul %331, %236, %cst_72 {dimension_numbers = #tpu.dot_dimension_numbers<[1], [0], [0], [1], [0, 0, 1, 1], [], []>} : vector<2x64xf32>, vector<64x256xf32>, vector<2x256xf32> -> vector<2x256xf32>
    %334 = arith.addf %332, %333 : vector<2x256xf32>
    %335 = vector.broadcast %237 : vector<1x256xf32> to vector<2x256xf32>
    %336 = arith.addf %334, %335 : vector<2x256xf32>
    %337 = vector.extract_strided_slice %336 {offsets = [0, 0], sizes = [2, 64], strides = [1, 1]} : vector<2x256xf32> to vector<2x64xf32>
    %338 = arith.negf %337 : vector<2x64xf32>
    %339 = math.exp %338 : vector<2x64xf32>
    %cst_73 = arith.constant 1.000000e+00 : f32
    %340 = vector.broadcast %cst_73 : f32 to vector<2x64xf32>
    %341 = arith.addf %340, %339 : vector<2x64xf32>
    %342 = arith.divf %340, %341 : vector<2x64xf32>
    %343 = vector.extract_strided_slice %336 {offsets = [0, 64], sizes = [2, 64], strides = [1, 1]} : vector<2x256xf32> to vector<2x64xf32>
    %344 = arith.negf %343 : vector<2x64xf32>
    %345 = math.exp %344 : vector<2x64xf32>
    %cst_74 = arith.constant 1.000000e+00 : f32
    %346 = vector.broadcast %cst_74 : f32 to vector<2x64xf32>
    %347 = arith.addf %346, %345 : vector<2x64xf32>
    %348 = arith.divf %346, %347 : vector<2x64xf32>
    %349 = vector.extract_strided_slice %336 {offsets = [0, 128], sizes = [2, 64], strides = [1, 1]} : vector<2x256xf32> to vector<2x64xf32>
    %350 = math.tanh %349 : vector<2x64xf32>
    %351 = vector.extract_strided_slice %336 {offsets = [0, 192], sizes = [2, 64], strides = [1, 1]} : vector<2x256xf32> to vector<2x64xf32>
    %352 = arith.negf %351 : vector<2x64xf32>
    %353 = math.exp %352 : vector<2x64xf32>
    %cst_75 = arith.constant 1.000000e+00 : f32
    %354 = vector.broadcast %cst_75 : f32 to vector<2x64xf32>
    %355 = arith.addf %354, %353 : vector<2x64xf32>
    %356 = arith.divf %354, %355 : vector<2x64xf32>
    %357 = arith.mulf %348, %329 : vector<2x64xf32>
    %358 = arith.mulf %342, %350 : vector<2x64xf32>
    %359 = arith.addf %357, %358 : vector<2x64xf32>
    %360 = math.tanh %359 : vector<2x64xf32>
    %361 = arith.mulf %356, %360 : vector<2x64xf32>
    %cst_76 = arith.constant dense<0.000000e+00> : vector<2x256xf32>
    %362 = tpu.matmul %150, %235, %cst_76 {dimension_numbers = #tpu.dot_dimension_numbers<[1], [0], [0], [1], [0, 0, 1, 1], [], []>} : vector<2x64xf32>, vector<64x256xf32>, vector<2x256xf32> -> vector<2x256xf32>
    %cst_77 = arith.constant dense<0.000000e+00> : vector<2x256xf32>
    %363 = tpu.matmul %361, %236, %cst_77 {dimension_numbers = #tpu.dot_dimension_numbers<[1], [0], [0], [1], [0, 0, 1, 1], [], []>} : vector<2x64xf32>, vector<64x256xf32>, vector<2x256xf32> -> vector<2x256xf32>
    %364 = arith.addf %362, %363 : vector<2x256xf32>
    %365 = vector.broadcast %237 : vector<1x256xf32> to vector<2x256xf32>
    %366 = arith.addf %364, %365 : vector<2x256xf32>
    %367 = vector.extract_strided_slice %366 {offsets = [0, 0], sizes = [2, 64], strides = [1, 1]} : vector<2x256xf32> to vector<2x64xf32>
    %368 = arith.negf %367 : vector<2x64xf32>
    %369 = math.exp %368 : vector<2x64xf32>
    %cst_78 = arith.constant 1.000000e+00 : f32
    %370 = vector.broadcast %cst_78 : f32 to vector<2x64xf32>
    %371 = arith.addf %370, %369 : vector<2x64xf32>
    %372 = arith.divf %370, %371 : vector<2x64xf32>
    %373 = vector.extract_strided_slice %366 {offsets = [0, 64], sizes = [2, 64], strides = [1, 1]} : vector<2x256xf32> to vector<2x64xf32>
    %374 = arith.negf %373 : vector<2x64xf32>
    %375 = math.exp %374 : vector<2x64xf32>
    %cst_79 = arith.constant 1.000000e+00 : f32
    %376 = vector.broadcast %cst_79 : f32 to vector<2x64xf32>
    %377 = arith.addf %376, %375 : vector<2x64xf32>
    %378 = arith.divf %376, %377 : vector<2x64xf32>
    %379 = vector.extract_strided_slice %366 {offsets = [0, 128], sizes = [2, 64], strides = [1, 1]} : vector<2x256xf32> to vector<2x64xf32>
    %380 = math.tanh %379 : vector<2x64xf32>
    %381 = vector.extract_strided_slice %366 {offsets = [0, 192], sizes = [2, 64], strides = [1, 1]} : vector<2x256xf32> to vector<2x64xf32>
    %382 = arith.negf %381 : vector<2x64xf32>
    %383 = math.exp %382 : vector<2x64xf32>
    %cst_80 = arith.constant 1.000000e+00 : f32
    %384 = vector.broadcast %cst_80 : f32 to vector<2x64xf32>
    %385 = arith.addf %384, %383 : vector<2x64xf32>
    %386 = arith.divf %384, %385 : vector<2x64xf32>
    %387 = arith.mulf %378, %359 : vector<2x64xf32>
    %388 = arith.mulf %372, %380 : vector<2x64xf32>
    %389 = arith.addf %387, %388 : vector<2x64xf32>
    %390 = math.tanh %389 : vector<2x64xf32>
    %391 = arith.mulf %386, %390 : vector<2x64xf32>
    %cst_81 = arith.constant dense<0.000000e+00> : vector<2x256xf32>
    %392 = tpu.matmul %178, %235, %cst_81 {dimension_numbers = #tpu.dot_dimension_numbers<[1], [0], [0], [1], [0, 0, 1, 1], [], []>} : vector<2x64xf32>, vector<64x256xf32>, vector<2x256xf32> -> vector<2x256xf32>
    %cst_82 = arith.constant dense<0.000000e+00> : vector<2x256xf32>
    %393 = tpu.matmul %391, %236, %cst_82 {dimension_numbers = #tpu.dot_dimension_numbers<[1], [0], [0], [1], [0, 0, 1, 1], [], []>} : vector<2x64xf32>, vector<64x256xf32>, vector<2x256xf32> -> vector<2x256xf32>
    %394 = arith.addf %392, %393 : vector<2x256xf32>
    %395 = vector.broadcast %237 : vector<1x256xf32> to vector<2x256xf32>
    %396 = arith.addf %394, %395 : vector<2x256xf32>
    %397 = vector.extract_strided_slice %396 {offsets = [0, 0], sizes = [2, 64], strides = [1, 1]} : vector<2x256xf32> to vector<2x64xf32>
    %398 = arith.negf %397 : vector<2x64xf32>
    %399 = math.exp %398 : vector<2x64xf32>
    %cst_83 = arith.constant 1.000000e+00 : f32
    %400 = vector.broadcast %cst_83 : f32 to vector<2x64xf32>
    %401 = arith.addf %400, %399 : vector<2x64xf32>
    %402 = arith.divf %400, %401 : vector<2x64xf32>
    %403 = vector.extract_strided_slice %396 {offsets = [0, 64], sizes = [2, 64], strides = [1, 1]} : vector<2x256xf32> to vector<2x64xf32>
    %404 = arith.negf %403 : vector<2x64xf32>
    %405 = math.exp %404 : vector<2x64xf32>
    %cst_84 = arith.constant 1.000000e+00 : f32
    %406 = vector.broadcast %cst_84 : f32 to vector<2x64xf32>
    %407 = arith.addf %406, %405 : vector<2x64xf32>
    %408 = arith.divf %406, %407 : vector<2x64xf32>
    %409 = vector.extract_strided_slice %396 {offsets = [0, 128], sizes = [2, 64], strides = [1, 1]} : vector<2x256xf32> to vector<2x64xf32>
    %410 = math.tanh %409 : vector<2x64xf32>
    %411 = vector.extract_strided_slice %396 {offsets = [0, 192], sizes = [2, 64], strides = [1, 1]} : vector<2x256xf32> to vector<2x64xf32>
    %412 = arith.negf %411 : vector<2x64xf32>
    %413 = math.exp %412 : vector<2x64xf32>
    %cst_85 = arith.constant 1.000000e+00 : f32
    %414 = vector.broadcast %cst_85 : f32 to vector<2x64xf32>
    %415 = arith.addf %414, %413 : vector<2x64xf32>
    %416 = arith.divf %414, %415 : vector<2x64xf32>
    %417 = arith.mulf %408, %389 : vector<2x64xf32>
    %418 = arith.mulf %402, %410 : vector<2x64xf32>
    %419 = arith.addf %417, %418 : vector<2x64xf32>
    %420 = math.tanh %419 : vector<2x64xf32>
    %421 = arith.mulf %416, %420 : vector<2x64xf32>
    %cst_86 = arith.constant dense<0.000000e+00> : vector<2x256xf32>
    %422 = tpu.matmul %206, %235, %cst_86 {dimension_numbers = #tpu.dot_dimension_numbers<[1], [0], [0], [1], [0, 0, 1, 1], [], []>} : vector<2x64xf32>, vector<64x256xf32>, vector<2x256xf32> -> vector<2x256xf32>
    %cst_87 = arith.constant dense<0.000000e+00> : vector<2x256xf32>
    %423 = tpu.matmul %421, %236, %cst_87 {dimension_numbers = #tpu.dot_dimension_numbers<[1], [0], [0], [1], [0, 0, 1, 1], [], []>} : vector<2x64xf32>, vector<64x256xf32>, vector<2x256xf32> -> vector<2x256xf32>
    %424 = arith.addf %422, %423 : vector<2x256xf32>
    %425 = vector.broadcast %237 : vector<1x256xf32> to vector<2x256xf32>
    %426 = arith.addf %424, %425 : vector<2x256xf32>
    %427 = vector.extract_strided_slice %426 {offsets = [0, 0], sizes = [2, 64], strides = [1, 1]} : vector<2x256xf32> to vector<2x64xf32>
    %428 = arith.negf %427 : vector<2x64xf32>
    %429 = math.exp %428 : vector<2x64xf32>
    %cst_88 = arith.constant 1.000000e+00 : f32
    %430 = vector.broadcast %cst_88 : f32 to vector<2x64xf32>
    %431 = arith.addf %430, %429 : vector<2x64xf32>
    %432 = arith.divf %430, %431 : vector<2x64xf32>
    %433 = vector.extract_strided_slice %426 {offsets = [0, 64], sizes = [2, 64], strides = [1, 1]} : vector<2x256xf32> to vector<2x64xf32>
    %434 = arith.negf %433 : vector<2x64xf32>
    %435 = math.exp %434 : vector<2x64xf32>
    %cst_89 = arith.constant 1.000000e+00 : f32
    %436 = vector.broadcast %cst_89 : f32 to vector<2x64xf32>
    %437 = arith.addf %436, %435 : vector<2x64xf32>
    %438 = arith.divf %436, %437 : vector<2x64xf32>
    %439 = vector.extract_strided_slice %426 {offsets = [0, 128], sizes = [2, 64], strides = [1, 1]} : vector<2x256xf32> to vector<2x64xf32>
    %440 = math.tanh %439 : vector<2x64xf32>
    %441 = vector.extract_strided_slice %426 {offsets = [0, 192], sizes = [2, 64], strides = [1, 1]} : vector<2x256xf32> to vector<2x64xf32>
    %442 = arith.negf %441 : vector<2x64xf32>
    %443 = math.exp %442 : vector<2x64xf32>
    %cst_90 = arith.constant 1.000000e+00 : f32
    %444 = vector.broadcast %cst_90 : f32 to vector<2x64xf32>
    %445 = arith.addf %444, %443 : vector<2x64xf32>
    %446 = arith.divf %444, %445 : vector<2x64xf32>
    %447 = arith.mulf %438, %419 : vector<2x64xf32>
    %448 = arith.mulf %432, %440 : vector<2x64xf32>
    %449 = arith.addf %447, %448 : vector<2x64xf32>
    %450 = math.tanh %449 : vector<2x64xf32>
    %451 = arith.mulf %446, %450 : vector<2x64xf32>
    %cst_91 = arith.constant dense<0.000000e+00> : vector<2x256xf32>
    %452 = tpu.matmul %234, %235, %cst_91 {dimension_numbers = #tpu.dot_dimension_numbers<[1], [0], [0], [1], [0, 0, 1, 1], [], []>} : vector<2x64xf32>, vector<64x256xf32>, vector<2x256xf32> -> vector<2x256xf32>
    %cst_92 = arith.constant dense<0.000000e+00> : vector<2x256xf32>
    %453 = tpu.matmul %451, %236, %cst_92 {dimension_numbers = #tpu.dot_dimension_numbers<[1], [0], [0], [1], [0, 0, 1, 1], [], []>} : vector<2x64xf32>, vector<64x256xf32>, vector<2x256xf32> -> vector<2x256xf32>
    %454 = arith.addf %452, %453 : vector<2x256xf32>
    %455 = vector.broadcast %237 : vector<1x256xf32> to vector<2x256xf32>
    %456 = arith.addf %454, %455 : vector<2x256xf32>
    %457 = vector.extract_strided_slice %456 {offsets = [0, 0], sizes = [2, 64], strides = [1, 1]} : vector<2x256xf32> to vector<2x64xf32>
    %458 = arith.negf %457 : vector<2x64xf32>
    %459 = math.exp %458 : vector<2x64xf32>
    %cst_93 = arith.constant 1.000000e+00 : f32
    %460 = vector.broadcast %cst_93 : f32 to vector<2x64xf32>
    %461 = arith.addf %460, %459 : vector<2x64xf32>
    %462 = arith.divf %460, %461 : vector<2x64xf32>
    %463 = vector.extract_strided_slice %456 {offsets = [0, 64], sizes = [2, 64], strides = [1, 1]} : vector<2x256xf32> to vector<2x64xf32>
    %464 = arith.negf %463 : vector<2x64xf32>
    %465 = math.exp %464 : vector<2x64xf32>
    %cst_94 = arith.constant 1.000000e+00 : f32
    %466 = vector.broadcast %cst_94 : f32 to vector<2x64xf32>
    %467 = arith.addf %466, %465 : vector<2x64xf32>
    %468 = arith.divf %466, %467 : vector<2x64xf32>
    %469 = vector.extract_strided_slice %456 {offsets = [0, 128], sizes = [2, 64], strides = [1, 1]} : vector<2x256xf32> to vector<2x64xf32>
    %470 = math.tanh %469 : vector<2x64xf32>
    %471 = vector.extract_strided_slice %456 {offsets = [0, 192], sizes = [2, 64], strides = [1, 1]} : vector<2x256xf32> to vector<2x64xf32>
    %472 = arith.negf %471 : vector<2x64xf32>
    %473 = math.exp %472 : vector<2x64xf32>
    %cst_95 = arith.constant 1.000000e+00 : f32
    %474 = vector.broadcast %cst_95 : f32 to vector<2x64xf32>
    %475 = arith.addf %474, %473 : vector<2x64xf32>
    %476 = arith.divf %474, %475 : vector<2x64xf32>
    %477 = arith.mulf %468, %449 : vector<2x64xf32>
    %478 = arith.mulf %462, %470 : vector<2x64xf32>
    %479 = arith.addf %477, %478 : vector<2x64xf32>
    %480 = math.tanh %479 : vector<2x64xf32>
    %481 = arith.mulf %476, %480 : vector<2x64xf32>
    %c0_96 = arith.constant 0 : index
    %c0_97 = arith.constant 0 : index
    %482 = vector.load %arg9[%c0_96, %c0_97] : memref<64x7xf32, #tpu.memory_space<vmem>>, vector<64x7xf32>
    %cst_98 = arith.constant dense<0.000000e+00> : vector<2x7xf32>
    %483 = tpu.matmul %481, %482, %cst_98 {dimension_numbers = #tpu.dot_dimension_numbers<[1], [0], [0], [1], [0, 0, 1, 1], [], []>} : vector<2x64xf32>, vector<64x7xf32>, vector<2x7xf32> -> vector<2x7xf32>
    %c0_99 = arith.constant 0 : index
    %c0_100 = arith.constant 0 : index
    %484 = vector.load %arg10[%c0_99, %c0_100] : memref<1x7xf32, #tpu.memory_space<vmem>>, vector<1x7xf32>
    %485 = vector.broadcast %484 : vector<1x7xf32> to vector<2x7xf32>
    %486 = arith.addf %483, %485 : vector<2x7xf32>
    %c0_101 = arith.constant 0 : index
    %c0_102 = arith.constant 0 : index
    %487 = vector.load %arg11[%c0_101, %c0_102] : memref<2x7xf32, #tpu.memory_space<vmem>>, vector<2x7xf32>
    tpu.vector_store %arg11[%c0_101, %c0_102], %486 {strides = array<i32>} : memref<2x7xf32, #tpu.memory_space<vmem>>, vector<2x7xf32>,
    return
  }
}

</mosaic_0001>

<bundles_post_ra>
// kernel: tpu_custom_call.1
= control target key start
LH: loop header
LB: loop body
LE: loop exit
PB: predicated region body
PF: predicated region fallthrough
CT: control target
= control target key end

     0   :  { %16 = vsyncpa [#allocation3], 0  ;;  %s3500_s0 = inlined_call_operand.vmem [shape: f32[16,12], index: 0, kind: input, shape index: {}]   ;;  %s3501_s1 = inlined_call_operand.vmem [shape: f32[12,256], index: 1, kind: input, shape index: {}]   ;;  %s3502_s2 = inlined_call_operand.hbm [shape: f32[64,256], index: 2, kind: input, shape index: {}]   ;;  %s3503_s3 = inlined_call_operand.vmem [shape: f32[1,256], index: 3, kind: input, shape index: {}]   ;;  %s3504_s4 = inlined_call_operand.hbm [shape: f32[64,256], index: 4, kind: input, shape index: {}]   ;;  %s3505_s5 = inlined_call_operand.hbm [shape: f32[64,256], index: 5, kind: input, shape index: {}]   ;;  %s3506_s6 = inlined_call_operand.vmem [shape: f32[1,256], index: 6, kind: input, shape index: {}]   ;;  %s3507_s7 = inlined_call_operand.vmem [shape: f32[2,2,64], index: 7, kind: input, shape index: {}]   ;;  %s3508_s8 = inlined_call_operand.vmem [shape: f32[2,2,64], index: 8, kind: input, shape index: {}]   ;;  %s3509_s9 = inlined_call_operand.vmem [shape: f32[64,7], index: 9, kind: input, shape index: {}]   ;;  %s3510_s10 = inlined_call_operand.vmem [shape: f32[1,7], index: 10, kind: input, shape index: {}]   ;;  %s3511_s11 = inlined_call_operand.hbm [shape: f32[2,7], index: 11, kind: output, shape index: {}]  }
   0x1   :  { %17 = vsyncpa [#allocation6], 0 }
   0x2   :  { %18 = vsyncpa [#allocation4], 0  ;;  %s42_s19 = sshll.u32 %s3504_s4, 4  ;;  %s2595_s20 = smov [#allocation5]   ;;  %s43_s19 = int_to_ptr.hbm [resolvable:$true] %s42_s19 }
   0x3   :  { %s44_s21 = sshll.u32 %s2595_s20, 4  ;;  %s27_s24 = sshll.u32 %s3502_s2, 4  ;;  %s45_s21 = int_to_ptr.vmem [resolvable:$true] %s44_s21  ;;  %s28_s24 = int_to_ptr.hbm [resolvable:$true] %s27_s24 }
   0x4   :  { %s2596_s25 = smov 256   ;;  %s2597_s26 = smov 16  }
   0x5   :  { %50 = dma.hbm_to_vmem [thread:$0]  %s43_s19, 2048, %s45_s21, [#allocation6], %s2596_s25, %s2596_s25, %s2597_s26  }
   0x6   :  { %s2598_s27 = smov [#allocation2]   ;;  %s55_s12 = sshll.u32 %s3505_s5, 4  ;;  %s56_s12 = int_to_ptr.hbm [resolvable:$true] %s55_s12 }
   0x7   :  { %s29_s28 = sshll.u32 %s2598_s27, 4  ;;  %s2599_s4 = smov [#allocation7]   ;;  %s30_s28 = int_to_ptr.vmem [resolvable:$true] %s29_s28 }
   0x8   :  { %35 = dma.hbm_to_vmem [thread:$0]  %s28_s24, 2048, %s30_s28, [#allocation3], %s2596_s25, %s2596_s25, %s2597_s26  }
   0x9   :  { %s57_s13 = sshll.u32 %s2599_s4, 4  ;;  %s58_s13 = int_to_ptr.vmem [resolvable:$true] %s57_s13 }
   0xa   :  { %63 = dma.hbm_to_vmem [thread:$0]  %s56_s12, 2048, %s58_s13, [#allocation6], %s2596_s25, %s2596_s25, %s2597_s26  }
   0xb   :  { %2589 = dma.done.wait [#allocation3], 2048  }
   0xc   :  { %2590 = vsyncadd [#allocation3], 4294965248 }
   0xd   :  { %2591 = dma.done.wait [#allocation6], 4096  }
   0xe   :  { %2592 = vsyncadd [#allocation6], 4294963200  ;;  %v2671_v0 = vld [vmem:[#allocation2 + $0x70] sm:$0xff]  ;;  %v2673_v1 = vld [vmem:[#allocation2 + $0x60] sm:$0xff]  ;;  %vm105_vm0 = vcmask 1043456   ;;  %vm98_vm1 = vcmask 97280  }
   0xf   :  { %188 = vmatpush.msra.mxu2 %v2671_v0  ;;  %v2676_v2 = vld [vmem:[#allocation2 + $0x78] sm:$0xff]  ;;  %v2678_v3 = vld [vmem:[#allocation2 + $0x50] sm:$0xff]  ;;  %v2681_v4 = vld [vmem:[#allocation2 + $0x68] sm:$0xff]  ;;  %s2600_s24 = smov 64   ;;  %vm176_vm2 = vcmask 523264   ;;  %s2601_s26 = smov [#allocation8]  }
  0x10   :  { %208 = vmatpush.msra.mxu3 %v2676_v2  ;;  %v2684_v5 = vld [vmem:[#allocation2 + $0x58] sm:$0xff]  ;;  %v2686_v6 = vld [vmem:[#allocation2 + $0x40] sm:$0xff]  ;;  %v90_v7 = vld [vmem:[%s3501_s1 + $0x10] sm:$0xf]  ;;  %s2175_s27 = sshll.u32 %s2601_s26, 4  ;;  %s2176_s27 = int_to_ptr.vmem [resolvable:$true] %s2175_s27 }
  0x11   :  { %189 = vmatpush.msra.mxu2 %v2673_v1  ;;  %v2693_v8 = vld [vmem:[#allocation2 + $0x48] sm:$0xff]  ;;  %2188 = vmatpush.msk.msra.mxu0 %vm105_vm0, %v90_v7  ;;  %v88_v9 = vld [vmem:[%s3501_s1] sm:$0xff]  ;;  %v2702_v11 = vld [vmem:[#allocation2 + $0x30] sm:$0xff] }
  0x12   :  { %209 = vmatpush.msra.mxu3 %v2681_v4  ;;  %v86_v10 = vld [vmem:[%s3500_s0] sm:$0xff]  ;;  %v91_v12 = vld [vmem:[%s3501_s1 + $0x18] sm:$0xf]  ;;  %v89_v16 = vld [vmem:[%s3501_s1 + $0x8] sm:$0xff] }
  0x13   :  { %190 = vmatpush.msra.mxu2 %v2678_v3  ;;  %v2709_v13 = vld [vmem:[#allocation2 + $0x38] sm:$0xff]  ;;  %127 = vmatpush.msra.mxu0 %v88_v9  ;;  %v175_v14 = vld [vmem:[%s3508_s8] sm:$0x3]  ;;  %v2722_v17 = vld [vmem:[#allocation2 + $0x28] sm:$0xff] }
  0x14   :  { %210 = vmatpush.msra.mxu3 %v2684_v5  ;;  %v2714_v15 = vld [vmem:[#allocation2 + $0x20] sm:$0xff]  ;;  %2189 = vmatmul.msk.f32.vlgmr.msra.gmra.mxu0 %vm98_vm1, %v86_v10  ;;  %v2725_v18 = vld [vmem:[#allocation2 + $0x10] sm:$0xff]  ;;  %v2730_v19 = vld [vmem:[#allocation2 + $0x18] sm:$0xff] }
  0x15   :  { %191 = vmatpush.msra.mxu2 %v2686_v6  ;;  %2191 = vmatpush.msk.msra.mxu1 %vm105_vm0, %v91_v12  ;;  %v2732_v20 = vld [vmem:[#allocation2] sm:$0xff]  ;;  %v2740_v22 = vld [vmem:[#allocation2 + $0x8] sm:$0xff] }
  0x16   :  { %211 = vmatpush.msra.mxu3 %v2693_v8  ;;  %262 = vrot.lane.b32.xlu0 %v175_v14, %s2600_s24  ;;  %v174_v21 = vld [vmem:[%s3507_s7] sm:$0x3]  ;;  %v87_v52 = vld [vmem:[%s3500_s0 + $0x8] sm:$0xff]  ;;  %s2177_s0 = sshll.u32 %s3511_s11, 4  ;;  %s2178_s0 = int_to_ptr.hbm [resolvable:$true] %s2177_s0 }
  0x17   :  { %192 = vmatpush.msra.mxu2 %v2702_v11  ;;  %150 = vmatpush.msra.mxu1 %v89_v16  ;;  %v2814_v23 = vld [vmem:[%s3503_s3] sm:$0x3] }
  0x18   :  { %212 = vmatpush.msra.mxu3 %v2709_v13  ;;  %2192 = vmatmul.msk.f32.vlgmr.msra.gmra.mxu1 %vm98_vm1, %v86_v10  ;;  %v94_v24 = vperm.slane %v2814_v23, 0  ;;  %v95_v32 = vperm.slane %v2814_v23, 1 }
  0x19   :  { %193 = vmatpush.msra.mxu2 %v2714_v15  ;;  %287 = vmatpush.msrb.mxu0 %v2671_v0 }
  0x1a   :  { %213 = vmatpush.msra.mxu3 %v2722_v17  ;;  %307 = vmatpush.msrb.mxu1 %v2676_v2 }
  0x1b   :  { %194 = vmatpush.msra.mxu2 %v2725_v18  ;;  %288 = vmatpush.msrb.mxu0 %v2673_v1 }
  0x1c   :  { %214 = vmatpush.msra.mxu3 %v2730_v19  ;;  %308 = vmatpush.msrb.mxu1 %v2681_v4 }
  0x1d   :  { %195 = vmatpush.msra.mxu2 %v2732_v20  ;;  %289 = vmatpush.msrb.mxu0 %v2678_v3 }
  0x1e   :  { %2194 = vmatmul.msk.f32.vlgmr.msra.gmra.mxu2 %vm176_vm2, %v174_v21  ;;  %215 = vmatpush.msra.mxu3 %v2740_v22 }
  0x1f   :  { %2195 = vmatmul.msk.f32.vlgmr.msra.gmra.mxu3 %vm176_vm2, %v174_v21  ;;  %392 = vmatpush.msrb.mxu2 %v2671_v0 }
  0x20   :  { %309 = vmatpush.msrb.mxu1 %v2684_v5  ;;  %412 = vmatpush.msrb.mxu3 %v2676_v2 }
  0x21   :  { %290 = vmatpush.msrb.mxu0 %v2686_v6  ;;  %393 = vmatpush.msrb.mxu2 %v2673_v1 }
  0x22   :  { %310 = vmatpush.msrb.mxu1 %v2693_v8  ;;  %413 = vmatpush.msrb.mxu3 %v2681_v4 }
  0x23   :  { %291 = vmatpush.msrb.mxu0 %v2702_v11  ;;  %394 = vmatpush.msrb.mxu2 %v2678_v3 }
  0x24   :  { %311 = vmatpush.msrb.mxu1 %v2709_v13  ;;  %414 = vmatpush.msrb.mxu3 %v2684_v5 }
  0x25   :  { %292 = vmatpush.msrb.mxu0 %v2714_v15  ;;  %395 = vmatpush.msrb.mxu2 %v2686_v6 }
  0x26   :  { %312 = vmatpush.msrb.mxu1 %v2722_v17  ;;  %415 = vmatpush.msrb.mxu3 %v2693_v8 }
  0x27   :  { %293 = vmatpush.msrb.mxu0 %v2725_v18  ;;  %396 = vmatpush.msrb.mxu2 %v2702_v11 }
  0x28   :  { %313 = vmatpush.msrb.mxu1 %v2730_v19  ;;  %416 = vmatpush.msrb.mxu3 %v2709_v13 }
  0x29   :  { %294 = vmatpush.msrb.mxu0 %v2732_v20  ;;  %397 = vmatpush.msrb.mxu2 %v2714_v15 }
  0x2a   :  { %314 = vmatpush.msrb.mxu1 %v2740_v22  ;;  %417 = vmatpush.msrb.mxu3 %v2722_v17 }
  0x2b   :  { %398 = vmatpush.msrb.mxu2 %v2725_v18  ;;  %497 = vmatpush.msra.mxu0 %v2671_v0 }
  0x2c   :  { %418 = vmatpush.msrb.mxu3 %v2730_v19  ;;  %517 = vmatpush.msra.mxu1 %v2676_v2 }
  0x2d   :  { %399 = vmatpush.msrb.mxu2 %v2732_v20  ;;  %498 = vmatpush.msra.mxu0 %v2673_v1 }
  0x2e   :  { %419 = vmatpush.msrb.mxu3 %v2740_v22  ;;  %518 = vmatpush.msra.mxu1 %v2681_v4 }
  0x2f   :  { %499 = vmatpush.msra.mxu0 %v2678_v3  ;;  %602 = vmatpush.msra.mxu2 %v2671_v0 }
  0x30   :  { %519 = vmatpush.msra.mxu1 %v2684_v5  ;;  %622 = vmatpush.msra.mxu3 %v2676_v2 }
  0x31   :  { %500 = vmatpush.msra.mxu0 %v2686_v6  ;;  %603 = vmatpush.msra.mxu2 %v2673_v1 }
  0x32   :  { %520 = vmatpush.msra.mxu1 %v2693_v8  ;;  %623 = vmatpush.msra.mxu3 %v2681_v4 }
  0x33   :  { %501 = vmatpush.msra.mxu0 %v2702_v11  ;;  %604 = vmatpush.msra.mxu2 %v2678_v3 }
  0x34   :  { %521 = vmatpush.msra.mxu1 %v2709_v13  ;;  %624 = vmatpush.msra.mxu3 %v2684_v5 }
  0x35   :  { %502 = vmatpush.msra.mxu0 %v2714_v15  ;;  %605 = vmatpush.msra.mxu2 %v2686_v6 }
  0x36   :  { %522 = vmatpush.msra.mxu1 %v2722_v17  ;;  %625 = vmatpush.msra.mxu3 %v2693_v8 }
  0x37   :  { %503 = vmatpush.msra.mxu0 %v2725_v18  ;;  %606 = vmatpush.msra.mxu2 %v2702_v11 }
  0x38   :  { %523 = vmatpush.msra.mxu1 %v2730_v19  ;;  %626 = vmatpush.msra.mxu3 %v2709_v13 }
  0x39   :  { %504 = vmatpush.msra.mxu0 %v2732_v20  ;;  %607 = vmatpush.msra.mxu2 %v2714_v15 }
  0x3a   :  { %524 = vmatpush.msra.mxu1 %v2740_v22  ;;  %627 = vmatpush.msra.mxu3 %v2722_v17 }
  0x3b   :  { %608 = vmatpush.msra.mxu2 %v2725_v18  ;;  %2190 = vmatmul.msk.f32.gmra.mxu0 %vm98_vm1, %v87_v52 }
  0x3c   :  { %628 = vmatpush.msra.mxu3 %v2730_v19  ;;  %2193 = vmatmul.msk.f32.gmra.mxu1 %vm98_vm1, %v87_v52 }
  0x3d   :  { %609 = vmatpush.msra.mxu2 %v2732_v20 }
  0x3e   :  { %629 = vmatpush.msra.mxu3 %v2740_v22 }
  0x88   :  { %v263_v55 = vpop.permute.xlu0 %262 }
  0x91   :  { %v129_v25 = vpop.f32.mrf.mxu0 }
  0x92   :  { %v2819_v26 = vadd.f32 %v129_v25, %v94_v24 }
  0x95   :  { %v152_v33 = vpop.f32.mrf.mxu1 }
  0x96   :  { %v2825_v34 = vadd.f32 %v152_v33, %v95_v32 }
  0xa1   :  { %v197_v27 = vpop.f32.mrf.mxu2 }
  0xa2   :  { %v220_v28 = vadd.f32 %v197_v27, %v2819_v26  ;;  %v217_v35 = vpop.f32.mrf.mxu3 }
  0xa3   :  { %v221_v37 = vadd.f32 %v217_v35, %v2825_v34 }
  0xa4   :  { %v2196_v29 = vmul.f32 -1.442695, %v220_v28 }
  0xa5   :  { %v2197_v49 = vmul.f32 -1.442695, %v221_v37 }
  0xa6   :  { %2285 = vpow2.f32 %v2196_v29 }
  0xac   :  { %v2286_v30 = vpop.eup %2285 }
  0xad   :  { %v225_v31 = vadd.f32 1.0, %v2286_v30 }
  0xaf   :  { %2287 = vrcp.f32 %v225_v31  ;;  %v237_v40 = vand.u32 2147483648, %v225_v31  ;;  %v235_v42 = vand.u32 2147483647, %v225_v31  ;;  %vm231_vm4 = vweird.f32 %v225_v31 }
  0xb0   :  { %2289 = vtanh.f32 %v221_v37 }
  0xb1   :  { %v238_v45 = vor.u32 1.1754944e-38, %v237_v40  ;;  %vm236_vm6 = vcmp.eq.f32.partialorder %v235_v42, 8.507059e+37  ;;  %2291 = vpow2.f32 %v2197_v49 }
  0xb5   :  { %v2288_v36 = vpop.eup %2287 }
  0xb6   :  { %v227_v38 = vmul.f32 %v2288_v36, %v225_v31  ;;  %vm232_vm3 = vweird.f32 %v2288_v36  ;;  %v2290_v44 = vpop.eup %2289 }
  0xb7   :  { %vm233_vm5 = vmor %vm231_vm4, %vm232_vm3  ;;  %v2292_v50 = vpop.eup %2291 }
  0xb8   :  { %v228_v39 = vsub.f32 1.0, %v227_v38  ;;  %v245_v51 = vadd.f32 1.0, %v2292_v50  ;;  %v2860_v21 = vpop.f32.mrf.mxu0 }
  0xb9   :  { %v2863_v29 = vpop.f32.mrf.mxu1 }
  0xba   :  { %v229_v41 = vmul.f32 %v2288_v36, %v228_v39  ;;  %2293 = vrcp.f32 %v245_v51  ;;  %vm251_vm7 = vweird.f32 %v245_v51  ;;  %v257_v61 = vand.u32 2147483648, %v245_v51 }
  0xbb   :  { %v255_v63 = vand.u32 2147483647, %v245_v51 }
  0xbc   :  { %v230_v43 = vadd.f32 %v2288_v36, %v229_v41  ;;  %v258_v7 = vor.u32 1.1754944e-38, %v257_v61 }
  0xbd   :  { %vm256_vm10 = vcmp.eq.f32.partialorder %v255_v63, 8.507059e+37 }
  0xbe   :  { %v234_v46 = vsel %vm233_vm5, %v2288_v36, %v230_v43 }
  0xbf   :  { %v239_v47 = vsel %vm236_vm6, %v238_v45, %v234_v46 }
  0xc0   :  { %v266_v48 = vmul.f32 %v2290_v44, %v239_v47  ;;  %v2294_v53 = vpop.eup %2293  ;;  %v265_v58 = vmul.f32 %v263_v55, %v239_v47 }
  0xc1   :  { %v247_v54 = vmul.f32 %v2294_v53, %v245_v51  ;;  %vm252_vm8 = vweird.f32 %v2294_v53 }
  0xc2   :  { %268 = vrot.lane.b32.xlu0 %v266_v48, %s2600_s24  ;;  %vm253_vm9 = vmor %vm251_vm7, %vm252_vm8 }
  0xc3   :  { %v248_v56 = vsub.f32 1.0, %v247_v54 }
  0xc5   :  { %v249_v57 = vmul.f32 %v2294_v53, %v248_v56 }
  0xc7   :  { %v250_v62 = vadd.f32 %v2294_v53, %v249_v57 }
  0xc9   :  { %v254_v9 = vsel %vm253_vm9, %v2294_v53, %v250_v62 }
  0xca   :  { %v259_v12 = vsel %vm256_vm10, %v258_v7, %v254_v9 }
 0x134   :  { %v269_v59 = vpop.permute.xlu0 %268 }
 0x135   :  { %v2834_v60 = vadd.f32 %v269_v59, %v265_v58 }
 0x137   :  { %2295 = vtanh.f32 %v2834_v60  ;;  %v367_v46 = vrot.slane %v2834_v60, 6 }
 0x13d   :  { %v2296_v10 = vpop.eup %2295 }
 0x13e   :  { %v273_v14 = vmul.f32 %v2296_v10, %v259_v12 }
 0x140   :  { %275 = vrot.lane.b32.xlu1 %v273_v14, %s2600_s24 }
 0x1b2   :  { %v2838_v16 = vpop.permute.xlu1 %275 }
 0x1b3   :  { %2198 = vmatmul.msk.f32.vlgmr.msrb.gmra.mxu0 %vm176_vm2, %v2838_v16  ;;  %2199 = vmatmul.msk.f32.vlgmr.msrb.gmra.mxu1 %vm176_vm2, %v2838_v16 }
 0x1b4   :  { %700 = vmatpush.msrb.mxu0 %v2671_v0  ;;  %720 = vmatpush.msrb.mxu1 %v2676_v2 }
 0x1b6   :  { %701 = vmatpush.msrb.mxu0 %v2673_v1  ;;  %721 = vmatpush.msrb.mxu1 %v2681_v4 }
 0x1b8   :  { %702 = vmatpush.msrb.mxu0 %v2678_v3  ;;  %722 = vmatpush.msrb.mxu1 %v2684_v5 }
 0x1ba   :  { %703 = vmatpush.msrb.mxu0 %v2686_v6  ;;  %723 = vmatpush.msrb.mxu1 %v2693_v8 }
 0x1bc   :  { %704 = vmatpush.msrb.mxu0 %v2702_v11  ;;  %724 = vmatpush.msrb.mxu1 %v2709_v13 }
 0x1be   :  { %705 = vmatpush.msrb.mxu0 %v2714_v15  ;;  %725 = vmatpush.msrb.mxu1 %v2722_v17 }
 0x1c0   :  { %706 = vmatpush.msrb.mxu0 %v2725_v18  ;;  %726 = vmatpush.msrb.mxu1 %v2730_v19 }
 0x1c2   :  { %707 = vmatpush.msrb.mxu0 %v2732_v20  ;;  %727 = vmatpush.msrb.mxu1 %v2740_v22 }
 0x230   :  { %v296_v25 = vpop.f32.mrf.mxu0  ;;  %v316_v35 = vpop.f32.mrf.mxu1 }
 0x231   :  { %v321_v27 = vrot.slane %v296_v25, 6  ;;  %v322_v36 = vrot.slane %v316_v35, 6 }
 0x233   :  { %v325_v28 = vadd.f32 %v321_v27, %v2819_v26  ;;  %v326_v38 = vadd.f32 %v322_v36, %v2825_v34 }
 0x235   :  { %v2200_v30 = vmul.f32 -1.442695, %v325_v28  ;;  %v2201_v52 = vmul.f32 -1.442695, %v326_v38 }
 0x237   :  { %2297 = vpow2.f32 %v2200_v30 }
 0x23d   :  { %v2298_v31 = vpop.eup %2297 }
 0x23e   :  { %v330_v33 = vadd.f32 1.0, %v2298_v31 }
 0x240   :  { %2299 = vrcp.f32 %v330_v33  ;;  %v342_v41 = vand.u32 2147483648, %v330_v33  ;;  %v340_v43 = vand.u32 2147483647, %v330_v33  ;;  %vm336_vm12 = vweird.f32 %v330_v33 }
 0x241   :  { %2301 = vtanh.f32 %v326_v38 }
 0x242   :  { %v343_v45 = vor.u32 1.1754944e-38, %v342_v41  ;;  %vm341_vm14 = vcmp.eq.f32.partialorder %v340_v43, 8.507059e+37  ;;  %2303 = vpow2.f32 %v2201_v52 }
 0x246   :  { %v2300_v37 = vpop.eup %2299 }
 0x247   :  { %v332_v39 = vmul.f32 %v2300_v37, %v330_v33  ;;  %vm337_vm11 = vweird.f32 %v2300_v37  ;;  %v2302_v48 = vpop.eup %2301 }
 0x248   :  { %vm338_vm13 = vmor %vm336_vm12, %vm337_vm11  ;;  %v2304_v53 = vpop.eup %2303 }
 0x249   :  { %v333_v40 = vsub.f32 1.0, %v332_v39  ;;  %v350_v54 = vadd.f32 1.0, %v2304_v53 }
 0x24b   :  { %v334_v42 = vmul.f32 %v2300_v37, %v333_v40  ;;  %2305 = vrcp.f32 %v350_v54  ;;  %v362_v62 = vand.u32 2147483648, %v350_v54  ;;  %vm356_vm0 = vweird.f32 %v350_v54 }
 0x24c   :  { %v360_v63 = vand.u32 2147483647, %v350_v54 }
 0x24d   :  { %v335_v44 = vadd.f32 %v2300_v37, %v334_v42  ;;  %v363_v9 = vor.u32 1.1754944e-38, %v362_v62 }
 0x24e   :  { %vm361_vm3 = vcmp.eq.f32.partialorder %v360_v63, 8.507059e+37 }
 0x24f   :  { %v339_v47 = vsel %vm338_vm13, %v2300_v37, %v335_v44 }
 0x250   :  { %v344_v49 = vsel %vm341_vm14, %v343_v45, %v339_v47 }
 0x251   :  { %v370_v50 = vmul.f32 %v2302_v48, %v344_v49  ;;  %v369_v51 = vmul.f32 %v367_v46, %v344_v49  ;;  %v2306_v55 = vpop.eup %2305 }
 0x252   :  { %v352_v56 = vmul.f32 %v2306_v55, %v350_v54  ;;  %vm357_vm15 = vweird.f32 %v2306_v55 }
 0x253   :  { %372 = vrot.lane.b32.xlu1 %v370_v50, %s2600_s24  ;;  %vm358_vm1 = vmor %vm356_vm0, %vm357_vm15 }
 0x254   :  { %v353_v57 = vsub.f32 1.0, %v352_v56 }
 0x256   :  { %v354_v58 = vmul.f32 %v2306_v55, %v353_v57 }
 0x258   :  { %v355_v60 = vadd.f32 %v2306_v55, %v354_v58 }
 0x25a   :  { %v359_v7 = vsel %vm358_vm1, %v2306_v55, %v355_v60 }
 0x25b   :  { %v364_v12 = vsel %vm361_vm3, %v363_v9, %v359_v7 }
 0x2c5   :  { %v373_v59 = vpop.permute.xlu1 %372 }
 0x2c6   :  { %v2868_v61 = vadd.f32 %v373_v59, %v369_v51 }
 0x2c8   :  { %2307 = vtanh.f32 %v2868_v61  ;;  %v472_v48 = vrot.slane %v2868_v61, 6 }
 0x2ce   :  { %v2308_v10 = vpop.eup %2307 }
 0x2cf   :  { %v377_v14 = vmul.f32 %v2308_v10, %v364_v12 }
 0x2d1   :  { %v379_v25 = vrot.slane %v377_v14, 2 }
 0x2d3   :  { %380 = vrot.lane.b32.xlu2 %v379_v25, %s2600_s24 }
 0x32d   :  { %v2872_v27 = vpop.permute.xlu2 %380 }
 0x32e   :  { %2202 = vmatmul.msk.f32.vlgmr.msrb.gmra.mxu2 %vm176_vm2, %v2872_v27  ;;  %2203 = vmatmul.msk.f32.vlgmr.msrb.gmra.mxu3 %vm176_vm2, %v2872_v27 }
 0x32f   :  { %805 = vmatpush.msrb.mxu2 %v2671_v0  ;;  %825 = vmatpush.msrb.mxu3 %v2676_v2 }
 0x331   :  { %806 = vmatpush.msrb.mxu2 %v2673_v1  ;;  %826 = vmatpush.msrb.mxu3 %v2681_v4 }
 0x333   :  { %807 = vmatpush.msrb.mxu2 %v2678_v3  ;;  %827 = vmatpush.msrb.mxu3 %v2684_v5 }
 0x335   :  { %808 = vmatpush.msrb.mxu2 %v2686_v6  ;;  %828 = vmatpush.msrb.mxu3 %v2693_v8 }
 0x337   :  { %809 = vmatpush.msrb.mxu2 %v2702_v11  ;;  %829 = vmatpush.msrb.mxu3 %v2709_v13 }
 0x339   :  { %810 = vmatpush.msrb.mxu2 %v2714_v15  ;;  %830 = vmatpush.msrb.mxu3 %v2722_v17 }
 0x33b   :  { %811 = vmatpush.msrb.mxu2 %v2725_v18  ;;  %831 = vmatpush.msrb.mxu3 %v2730_v19 }
 0x33d   :  { %812 = vmatpush.msrb.mxu2 %v2732_v20  ;;  %832 = vmatpush.msrb.mxu3 %v2740_v22 }
 0x3b1   :  { %v401_v28 = vpop.f32.mrf.mxu2  ;;  %v421_v37 = vpop.f32.mrf.mxu3 }
 0x3b2   :  { %v426_v30 = vrot.slane %v401_v28, 4  ;;  %v427_v38 = vrot.slane %v421_v37, 4 }
 0x3b4   :  { %v430_v31 = vadd.f32 %v426_v30, %v2819_v26  ;;  %v431_v40 = vadd.f32 %v427_v38, %v2825_v34 }
 0x3b6   :  { %v2204_v33 = vmul.f32 -1.442695, %v430_v31  ;;  %v2205_v54 = vmul.f32 -1.442695, %v431_v40 }
 0x3b8   :  { %2309 = vpow2.f32 %v2204_v33 }
 0x3be   :  { %v2310_v35 = vpop.eup %2309 }
 0x3bf   :  { %v435_v36 = vadd.f32 1.0, %v2310_v35 }
 0x3c1   :  { %2311 = vrcp.f32 %v435_v36  ;;  %v447_v43 = vand.u32 2147483648, %v435_v36  ;;  %v445_v45 = vand.u32 2147483647, %v435_v36  ;;  %vm441_vm5 = vweird.f32 %v435_v36 }
 0x3c2   :  { %2313 = vtanh.f32 %v431_v40 }
 0x3c3   :  { %v448_v47 = vor.u32 1.1754944e-38, %v447_v43  ;;  %vm446_vm7 = vcmp.eq.f32.partialorder %v445_v45, 8.507059e+37  ;;  %2315 = vpow2.f32 %v2205_v54 }
 0x3c7   :  { %v2312_v39 = vpop.eup %2311 }
 0x3c8   :  { %v437_v41 = vmul.f32 %v2312_v39, %v435_v36  ;;  %vm442_vm4 = vweird.f32 %v2312_v39  ;;  %v2314_v50 = vpop.eup %2313 }
 0x3c9   :  { %vm443_vm6 = vmor %vm441_vm5, %vm442_vm4  ;;  %v2316_v55 = vpop.eup %2315 }
 0x3ca   :  { %v438_v42 = vsub.f32 1.0, %v437_v41  ;;  %v455_v56 = vadd.f32 1.0, %v2316_v55 }
 0x3cc   :  { %v439_v44 = vmul.f32 %v2312_v39, %v438_v42  ;;  %2317 = vrcp.f32 %v455_v56  ;;  %v467_v7 = vand.u32 2147483648, %v455_v56  ;;  %vm461_vm9 = vweird.f32 %v455_v56 }
 0x3cd   :  { %v465_v9 = vand.u32 2147483647, %v455_v56 }
 0x3ce   :  { %v440_v46 = vadd.f32 %v2312_v39, %v439_v44  ;;  %v468_v12 = vor.u32 1.1754944e-38, %v467_v7 }
 0x3cf   :  { %vm466_vm11 = vcmp.eq.f32.partialorder %v465_v9, 8.507059e+37  ;;  %v2944_v9 = vadd.f32 %v2863_v29, %v95_v32 }
 0x3d0   :  { %v444_v49 = vsel %vm443_vm6, %v2312_v39, %v440_v46 }
 0x3d1   :  { %v449_v51 = vsel %vm446_vm7, %v448_v47, %v444_v49 }
 0x3d2   :  { %v475_v52 = vmul.f32 %v2314_v50, %v449_v51  ;;  %v474_v53 = vmul.f32 %v472_v48, %v449_v51  ;;  %v2318_v57 = vpop.eup %2317 }
 0x3d3   :  { %v457_v58 = vmul.f32 %v2318_v57, %v455_v56  ;;  %vm462_vm8 = vweird.f32 %v2318_v57 }
 0x3d4   :  { %477 = vrot.lane.b32.xlu2 %v475_v52, %s2600_s24  ;;  %vm463_vm10 = vmor %vm461_vm9, %vm462_vm8 }
 0x3d5   :  { %v458_v59 = vsub.f32 1.0, %v457_v58  ;;  %v2938_v58 = vadd.f32 %v2860_v21, %v94_v24 }
 0x3d7   :  { %v459_v60 = vmul.f32 %v2318_v57, %v458_v59 }
 0x3d9   :  { %v460_v61 = vadd.f32 %v2318_v57, %v459_v60 }
 0x3db   :  { %v464_v10 = vsel %vm463_vm10, %v2318_v57, %v460_v61 }
 0x3dc   :  { %v469_v25 = vsel %vm466_vm11, %v468_v12, %v464_v10 }
 0x42e   :  { %v478_v62 = vpop.permute.xlu2 %477 }
 0x42f   :  { %v2898_v63 = vadd.f32 %v478_v62, %v474_v53 }
 0x431   :  { %2319 = vtanh.f32 %v2898_v63  ;;  %v577_v33 = vrot.slane %v2898_v63, 6 }
 0x437   :  { %v2320_v14 = vpop.eup %2319 }
 0x438   :  { %v482_v28 = vmul.f32 %v2320_v14, %v469_v25 }
 0x43a   :  { %v484_v30 = vrot.slane %v482_v28, 4 }
 0x43c   :  { %485 = vrot.lane.b32.xlu0 %v484_v30, %s2600_s24 }
 0x4ae   :  { %v2902_v31 = vpop.permute.xlu0 %485 }
 0x4af   :  { %2206 = vmatmul.msk.f32.vlgmr.msra.gmra.mxu0 %vm176_vm2, %v2902_v31  ;;  %2207 = vmatmul.msk.f32.vlgmr.msra.gmra.mxu1 %vm176_vm2, %v2902_v31 }
 0x4b0   :  { %910 = vmatpush.msra.mxu0 %v2671_v0  ;;  %930 = vmatpush.msra.mxu1 %v2676_v2 }
 0x4b2   :  { %911 = vmatpush.msra.mxu0 %v2673_v1  ;;  %931 = vmatpush.msra.mxu1 %v2681_v4 }
 0x4b4   :  { %912 = vmatpush.msra.mxu0 %v2678_v3  ;;  %932 = vmatpush.msra.mxu1 %v2684_v5 }
 0x4b6   :  { %913 = vmatpush.msra.mxu0 %v2686_v6  ;;  %933 = vmatpush.msra.mxu1 %v2693_v8 }
 0x4b8   :  { %914 = vmatpush.msra.mxu0 %v2702_v11  ;;  %934 = vmatpush.msra.mxu1 %v2709_v13 }
 0x4ba   :  { %915 = vmatpush.msra.mxu0 %v2714_v15  ;;  %935 = vmatpush.msra.mxu1 %v2722_v17 }
 0x4bc   :  { %916 = vmatpush.msra.mxu0 %v2725_v18  ;;  %936 = vmatpush.msra.mxu1 %v2730_v19 }
 0x4be   :  { %917 = vmatpush.msra.mxu0 %v2732_v20  ;;  %937 = vmatpush.msra.mxu1 %v2740_v22 }
 0x52c   :  { %v506_v0 = vpop.f32.mrf.mxu0  ;;  %v526_v6 = vpop.f32.mrf.mxu1 }
 0x52d   :  { %v531_v1 = vrot.slane %v506_v0, 2  ;;  %v532_v8 = vrot.slane %v526_v6, 2 }
 0x52f   :  { %v535_v2 = vadd.f32 %v531_v1, %v2819_v26  ;;  %v536_v13 = vadd.f32 %v532_v8, %v2825_v34 }
 0x531   :  { %v2208_v3 = vmul.f32 -1.442695, %v535_v2  ;;  %v2209_v34 = vmul.f32 -1.442695, %v536_v13 }
 0x533   :  { %2321 = vpow2.f32 %v2208_v3 }
 0x539   :  { %v2322_v4 = vpop.eup %2321 }
 0x53a   :  { %v540_v5 = vadd.f32 1.0, %v2322_v4 }
 0x53c   :  { %2323 = vrcp.f32 %v540_v5  ;;  %v552_v18 = vand.u32 2147483648, %v540_v5  ;;  %v550_v20 = vand.u32 2147483647, %v540_v5  ;;  %vm546_vm13 = vweird.f32 %v540_v5 }
 0x53d   :  { %2325 = vtanh.f32 %v536_v13 }
 0x53e   :  { %v553_v26 = vor.u32 1.1754944e-38, %v552_v18  ;;  %vm551_vm15 = vcmp.eq.f32.partialorder %v550_v20, 8.507059e+37  ;;  %2327 = vpow2.f32 %v2209_v34 }
 0x542   :  { %v2324_v11 = vpop.eup %2323 }
 0x543   :  { %v542_v15 = vmul.f32 %v2324_v11, %v540_v5  ;;  %vm547_vm12 = vweird.f32 %v2324_v11  ;;  %v2326_v36 = vpop.eup %2325 }
 0x544   :  { %vm548_vm14 = vmor %vm546_vm13, %vm547_vm12  ;;  %v2328_v40 = vpop.eup %2327 }
 0x545   :  { %v543_v17 = vsub.f32 1.0, %v542_v15  ;;  %v560_v41 = vadd.f32 1.0, %v2328_v40 }
 0x547   :  { %v544_v19 = vmul.f32 %v2324_v11, %v543_v17  ;;  %2329 = vrcp.f32 %v560_v41  ;;  %v572_v49 = vand.u32 2147483648, %v560_v41  ;;  %vm566_vm1 = vweird.f32 %v560_v41 }
 0x548   :  { %v570_v50 = vand.u32 2147483647, %v560_v41 }
 0x549   :  { %v545_v22 = vadd.f32 %v2324_v11, %v544_v19  ;;  %v573_v52 = vor.u32 1.1754944e-38, %v572_v49 }
 0x54a   :  { %vm571_vm4 = vcmp.eq.f32.partialorder %v570_v50, 8.507059e+37 }
 0x54b   :  { %v549_v35 = vsel %vm548_vm14, %v2324_v11, %v545_v22 }
 0x54c   :  { %v554_v37 = vsel %vm551_vm15, %v553_v26, %v549_v35 }
 0x54d   :  { %v580_v38 = vmul.f32 %v2326_v36, %v554_v37  ;;  %v579_v39 = vmul.f32 %v577_v33, %v554_v37  ;;  %v2330_v42 = vpop.eup %2329 }
 0x54e   :  { %v562_v43 = vmul.f32 %v2330_v42, %v560_v41  ;;  %vm567_vm0 = vweird.f32 %v2330_v42 }
 0x54f   :  { %582 = vrot.lane.b32.xlu1 %v580_v38, %s2600_s24  ;;  %vm568_vm3 = vmor %vm566_vm1, %vm567_vm0 }
 0x550   :  { %v563_v44 = vsub.f32 1.0, %v562_v43 }
 0x552   :  { %v564_v45 = vmul.f32 %v2330_v42, %v563_v44 }
 0x554   :  { %v565_v48 = vadd.f32 %v2330_v42, %v564_v45 }
 0x556   :  { %v569_v51 = vsel %vm568_vm3, %v2330_v42, %v565_v48 }
 0x557   :  { %v574_v54 = vsel %vm571_vm4, %v573_v52, %v569_v51 }
 0x5c1   :  { %v583_v46 = vpop.permute.xlu1 %582 }
 0x5c2   :  { %v585_v47 = vadd.f32 %v583_v46, %v579_v39 }
 0x5c4   :  { %2331 = vtanh.f32 %v585_v47  ;;  %v676_v1 = vrot.slane %v585_v47, 6 }
 0x5ca   :  { %v2332_v53 = vpop.eup %2331 }
 0x5cb   :  { %v587_v55 = vmul.f32 %v2332_v53, %v574_v54 }
 0x5cd   :  { %v589_v56 = vrot.slane %v587_v55, 6 }
 0x5cf   :  { %590 = vrot.lane.b32.xlu2 %v589_v56, %s2600_s24 }
 0x629   :  { %v2929_v57 = vpop.permute.xlu2 %590 }
 0x62a   :  { %2210 = vmatmul.msk.f32.vlgmr.msra.gmra.mxu2 %vm176_vm2, %v2929_v57  ;;  %2211 = vmatmul.msk.f32.vlgmr.msra.gmra.mxu3 %vm176_vm2, %v2929_v57 }
 0x6ad   :  { %v611_v59 = vpop.f32.mrf.mxu2  ;;  %v631_v7 = vpop.f32.mrf.mxu3 }
 0x6ae   :  { %v634_v60 = vadd.f32 %v611_v59, %v2938_v58  ;;  %v635_v12 = vadd.f32 %v631_v7, %v2944_v9 }
 0x6b0   :  { %v2212_v62 = vmul.f32 -1.442695, %v634_v60  ;;  %v2213_v4 = vmul.f32 -1.442695, %v635_v12 }
 0x6b2   :  { %2333 = vpow2.f32 %v2212_v62 }
 0x6b8   :  { %v2334_v63 = vpop.eup %2333 }
 0x6b9   :  { %v639_v61 = vadd.f32 1.0, %v2334_v63 }
 0x6bb   :  { %2335 = vrcp.f32 %v639_v61  ;;  %v651_v21 = vand.u32 2147483648, %v639_v61  ;;  %v649_v28 = vand.u32 2147483647, %v639_v61  ;;  %vm645_vm6 = vweird.f32 %v639_v61 }
 0x6bc   :  { %2337 = vtanh.f32 %v635_v12 }
 0x6bd   :  { %v652_v0 = vor.u32 1.1754944e-38, %v651_v21  ;;  %vm650_vm8 = vcmp.eq.f32.partialorder %v649_v28, 8.507059e+37  ;;  %2339 = vpow2.f32 %v2213_v4 }
 0x6c1   :  { %v2336_v10 = vpop.eup %2335 }
 0x6c2   :  { %v641_v14 = vmul.f32 %v2336_v10, %v639_v61  ;;  %vm646_vm5 = vweird.f32 %v2336_v10  ;;  %v2338_v23 = vpop.eup %2337 }
 0x6c3   :  { %vm647_vm7 = vmor %vm645_vm6, %vm646_vm5  ;;  %v2340_v5 = vpop.eup %2339 }
 0x6c4   :  { %v642_v24 = vsub.f32 1.0, %v641_v14  ;;  %v659_v6 = vadd.f32 1.0, %v2340_v5 }
 0x6c6   :  { %v643_v25 = vmul.f32 %v2336_v10, %v642_v24  ;;  %2341 = vrcp.f32 %v659_v6  ;;  %v671_v20 = vand.u32 2147483648, %v659_v6  ;;  %vm665_vm10 = vweird.f32 %v659_v6 }
 0x6c7   :  { %v669_v22 = vand.u32 2147483647, %v659_v6 }
 0x6c8   :  { %v644_v30 = vadd.f32 %v2336_v10, %v643_v25  ;;  %v672_v33 = vor.u32 1.1754944e-38, %v671_v20 }
 0x6c9   :  { %vm670_vm12 = vcmp.eq.f32.partialorder %v669_v22, 8.507059e+37 }
 0x6ca   :  { %v648_v2 = vsel %vm647_vm7, %v2336_v10, %v644_v30 }
 0x6cb   :  { %v653_v32 = vsel %vm650_vm8, %v652_v0, %v648_v2 }
 0x6cc   :  { %v679_v29 = vmul.f32 %v2338_v23, %v653_v32  ;;  %v678_v3 = vmul.f32 %v676_v1, %v653_v32  ;;  %v2342_v8 = vpop.eup %2341 }
 0x6cd   :  { %v661_v11 = vmul.f32 %v2342_v8, %v659_v6  ;;  %vm666_vm9 = vweird.f32 %v2342_v8 }
 0x6ce   :  { %681 = vrot.lane.b32.xlu0 %v679_v29, %s2600_s24  ;;  %vm667_vm11 = vmor %vm665_vm10, %vm666_vm9 }
 0x6cf   :  { %v662_v13 = vsub.f32 1.0, %v661_v11 }
 0x6d1   :  { %v663_v15 = vmul.f32 %v2342_v8, %v662_v13 }
 0x6d3   :  { %v664_v19 = vadd.f32 %v2342_v8, %v663_v15 }
 0x6d5   :  { %v668_v26 = vsel %vm667_vm11, %v2342_v8, %v664_v19 }
 0x6d6   :  { %v673_v36 = vsel %vm670_vm12, %v672_v33, %v668_v26 }
 0x740   :  { %v682_v17 = vpop.permute.xlu0 %681 }
 0x741   :  { %v684_v18 = vadd.f32 %v682_v17, %v678_v3 }
 0x743   :  { %2343 = vtanh.f32 %v684_v18  ;;  %v780_v55 = vrot.slane %v684_v18, 6 }
 0x749   :  { %v2344_v35 = vpop.eup %2343 }
 0x74a   :  { %v686_v37 = vmul.f32 %v2344_v35, %v673_v36 }
 0x74c   :  { %688 = vrot.lane.b32.xlu1 %v686_v37, %s2600_s24 }
 0x7be   :  { %v2949_v38 = vpop.permute.xlu1 %688 }
 0x7bf   :  { %2214 = vmatmul.msk.f32.vlgmr.msrb.gmra.mxu0 %vm176_vm2, %v2949_v38  ;;  %2215 = vmatmul.msk.f32.vlgmr.msrb.gmra.mxu1 %vm176_vm2, %v2949_v38 }
 0x83c   :  { %v709_v39 = vpop.f32.mrf.mxu0  ;;  %v729_v44 = vpop.f32.mrf.mxu1 }
 0x83d   :  { %v734_v34 = vrot.slane %v709_v39, 6  ;;  %v735_v45 = vrot.slane %v729_v44, 6 }
 0x83f   :  { %v738_v40 = vadd.f32 %v734_v34, %v2938_v58  ;;  %v739_v47 = vadd.f32 %v735_v45, %v2944_v9 }
 0x841   :  { %v2216_v41 = vmul.f32 -1.442695, %v738_v40  ;;  %v2217_v61 = vmul.f32 -1.442695, %v739_v47 }
 0x843   :  { %2345 = vpow2.f32 %v2216_v41 }
 0x849   :  { %v2346_v42 = vpop.eup %2345 }
 0x84a   :  { %v743_v43 = vadd.f32 1.0, %v2346_v42 }
 0x84c   :  { %2347 = vrcp.f32 %v743_v43  ;;  %v755_v50 = vand.u32 2147483648, %v743_v43  ;;  %v753_v52 = vand.u32 2147483647, %v743_v43  ;;  %vm749_vm14 = vweird.f32 %v743_v43 }
 0x84d   :  { %2349 = vtanh.f32 %v739_v47 }
 0x84e   :  { %v756_v54 = vor.u32 1.1754944e-38, %v755_v50  ;;  %vm754_vm0 = vcmp.eq.f32.partialorder %v753_v52, 8.507059e+37  ;;  %2351 = vpow2.f32 %v2217_v61  ;;  %v2975_v50 = vld [vmem:[#allocation5 + $0x78] sm:$0xff]  ;;  %v3005_v61 = vld [vmem:[#allocation5 + $0x40] sm:$0xff] }
 0x84f   :  { %1109 = vmatpush.msrb.mxu1 %v2975_v50  ;;  %v2981_v52 = vld [vmem:[#allocation7 + $0x78] sm:$0xff] }
 0x850   :  { %1069 = vmatpush.msra.mxu3 %v2981_v52 }
 0x852   :  { %v2348_v46 = vpop.eup %2347 }
 0x853   :  { %v745_v48 = vmul.f32 %v2348_v46, %v743_v43  ;;  %vm750_vm13 = vweird.f32 %v2348_v46  ;;  %v2350_v59 = vpop.eup %2349 }
 0x854   :  { %vm751_vm15 = vmor %vm749_vm14, %vm750_vm13  ;;  %v2352_v7 = vpop.eup %2351 }
 0x855   :  { %v746_v49 = vsub.f32 1.0, %v745_v48  ;;  %v763_v10 = vadd.f32 1.0, %v2352_v7  ;;  %v3007_v7 = vld [vmem:[#allocation5 + $0x48] sm:$0xff] }
 0x857   :  { %v747_v51 = vmul.f32 %v2348_v46, %v746_v49  ;;  %2353 = vrcp.f32 %v763_v10  ;;  %v775_v0 = vand.u32 2147483648, %v763_v10  ;;  %vm769_vm3 = vweird.f32 %v763_v10  ;;  %v2973_v49 = vld [vmem:[#allocation5 + $0x70] sm:$0xff] }
 0x858   :  { %v773_v1 = vand.u32 2147483647, %v763_v10  ;;  %1089 = vmatpush.msrb.mxu0 %v2973_v49 }
 0x859   :  { %v748_v53 = vadd.f32 %v2348_v46, %v747_v51  ;;  %v776_v23 = vor.u32 1.1754944e-38, %v775_v0  ;;  %v2977_v51 = vld [vmem:[#allocation7 + $0x70] sm:$0xff]  ;;  %v3030_v0 = vld [vmem:[#allocation5 + $0x20] sm:$0xff] }
 0x85a   :  { %vm774_vm5 = vcmp.eq.f32.partialorder %v773_v1, 8.507059e+37  ;;  %1049 = vmatpush.msra.mxu2 %v2977_v51  ;;  %v3032_v1 = vld [vmem:[#allocation5 + $0x28] sm:$0xff] }
 0x85b   :  { %v752_v56 = vsel %vm751_vm15, %v2348_v46, %v748_v53  ;;  %v2983_v53 = vld [vmem:[#allocation5 + $0x60] sm:$0xff] }
 0x85c   :  { %v757_v60 = vsel %vm754_vm0, %v756_v54, %v752_v56  ;;  %v2985_v54 = vld [vmem:[#allocation5 + $0x68] sm:$0xff]  ;;  %1090 = vmatpush.msrb.mxu0 %v2983_v53 }
 0x85d   :  { %v783_v62 = vmul.f32 %v2350_v59, %v757_v60  ;;  %v782_v63 = vmul.f32 %v780_v55, %v757_v60  ;;  %v2354_v12 = vpop.eup %2353  ;;  %v2989_v55 = vld [vmem:[#allocation7 + $0x60] sm:$0xff]  ;;  %v2991_v56 = vld [vmem:[#allocation7 + $0x68] sm:$0xff]  ;;  %v2993_v59 = vld [vmem:[#allocation5 + $0x50] sm:$0xff]  ;;  %1110 = vmatpush.msrb.mxu1 %v2985_v54 }
 0x85e   :  { %v765_v14 = vmul.f32 %v2354_v12, %v763_v10  ;;  %vm770_vm1 = vweird.f32 %v2354_v12  ;;  %v2997_v60 = vld [vmem:[#allocation5 + $0x58] sm:$0xff]  ;;  %1050 = vmatpush.msra.mxu2 %v2989_v55  ;;  %1070 = vmatpush.msra.mxu3 %v2991_v56 }
 0x85f   :  { %785 = vrot.lane.b32.xlu2 %v783_v62, %s2600_s24  ;;  %vm771_vm4 = vmor %vm769_vm3, %vm770_vm1  ;;  %v2999_v62 = vld [vmem:[#allocation7 + $0x50] sm:$0xff]  ;;  %1091 = vmatpush.msrb.mxu0 %v2993_v59 }
 0x860   :  { %v766_v24 = vsub.f32 1.0, %v765_v14  ;;  %1111 = vmatpush.msrb.mxu1 %v2997_v60  ;;  %v3013_v14 = vld [vmem:[#allocation7 + $0x48] sm:$0xff]  ;;  %1051 = vmatpush.msra.mxu2 %v2999_v62 }
 0x861   :  { %1092 = vmatpush.msrb.mxu0 %v3005_v61 }
 0x862   :  { %v767_v21 = vmul.f32 %v2354_v12, %v766_v24  ;;  %v3017_v24 = vld [vmem:[#allocation5 + $0x30] sm:$0xff]  ;;  %1112 = vmatpush.msrb.mxu1 %v3007_v7 }
 0x863   :  { %1093 = vmatpush.msrb.mxu0 %v3017_v24 }
 0x864   :  { %v768_v30 = vadd.f32 %v2354_v12, %v767_v21  ;;  %v3019_v21 = vld [vmem:[#allocation5 + $0x38] sm:$0xff] }
 0x865   :  { %1113 = vmatpush.msrb.mxu1 %v3019_v21  ;;  %1094 = vmatpush.msrb.mxu0 %v3030_v0 }
 0x866   :  { %v772_v2 = vsel %vm771_vm4, %v2354_v12, %v768_v30  ;;  %v3011_v12 = vld [vmem:[#allocation7 + $0x40] sm:$0xff] }
 0x867   :  { %v777_v29 = vsel %vm774_vm5, %v776_v23, %v772_v2  ;;  %1052 = vmatpush.msra.mxu2 %v3011_v12  ;;  %v3036_v2 = vld [vmem:[#allocation7 + $0x20] sm:$0xff]  ;;  %v3038_v23 = vld [vmem:[#allocation7 + $0x28] sm:$0xff]  ;;  %1114 = vmatpush.msrb.mxu1 %v3032_v1 }
 0x8b9   :  { %v786_v25 = vpop.permute.xlu2 %785 }
 0x8ba   :  { %v788_v28 = vadd.f32 %v786_v25, %v782_v63  ;;  %v3001_v63 = vld [vmem:[#allocation7 + $0x58] sm:$0xff]  ;;  %v3023_v25 = vld [vmem:[#allocation7 + $0x30] sm:$0xff] }
 0x8bb   :  { %1071 = vmatpush.msra.mxu3 %v3001_v63  ;;  %1053 = vmatpush.msra.mxu2 %v3023_v25 }
 0x8bc   :  { %2355 = vtanh.f32 %v788_v28  ;;  %v885_v40 = vrot.slane %v788_v28, 6  ;;  %v3025_v28 = vld [vmem:[#allocation7 + $0x38] sm:$0xff] }
 0x8bd   :  { %1072 = vmatpush.msra.mxu3 %v3013_v14  ;;  %1054 = vmatpush.msra.mxu2 %v3036_v2 }
 0x8bf   :  { %1073 = vmatpush.msra.mxu3 %v3025_v28 }
 0x8c1   :  { %1074 = vmatpush.msra.mxu3 %v3038_v23 }
 0x8c2   :  { %v2356_v32 = vpop.eup %2355 }
 0x8c3   :  { %v790_v3 = vmul.f32 %v2356_v32, %v777_v29  ;;  %v3042_v32 = vld [vmem:[#allocation5 + $0x10] sm:$0xff]  ;;  %v3044_v29 = vld [vmem:[#allocation5 + $0x18] sm:$0xff] }
 0x8c4   :  { %1095 = vmatpush.msrb.mxu0 %v3042_v32  ;;  %1115 = vmatpush.msrb.mxu1 %v3044_v29 }
 0x8c5   :  { %v792_v4 = vrot.slane %v790_v3, 2  ;;  %v3048_v3 = vld [vmem:[#allocation7 + $0x10] sm:$0xff] }
 0x8c6   :  { %1055 = vmatpush.msra.mxu2 %v3048_v3 }
 0x8c7   :  { %793 = vrot.lane.b32.xlu0 %v792_v4, %s2600_s24  ;;  %v3050_v4 = vld [vmem:[#allocation7 + $0x18] sm:$0xff] }
 0x8c8   :  { %1075 = vmatpush.msra.mxu3 %v3050_v4 }
 0x939   :  { %v2959_v5 = vpop.permute.xlu0 %793 }
 0x93a   :  { %2218 = vmatmul.msk.f32.vlgmr.msrb.gmra.mxu2 %vm176_vm2, %v2959_v5  ;;  %2219 = vmatmul.msk.f32.vlgmr.msrb.gmra.mxu3 %vm176_vm2, %v2959_v5 }
 0x9bd   :  { %v814_v6 = vpop.f32.mrf.mxu2  ;;  %v834_v18 = vpop.f32.mrf.mxu3 }
 0x9be   :  { %v839_v8 = vrot.slane %v814_v6, 4  ;;  %v840_v19 = vrot.slane %v834_v18, 4 }
 0x9c0   :  { %v843_v11 = vadd.f32 %v839_v8, %v2938_v58  ;;  %v844_v22 = vadd.f32 %v840_v19, %v2944_v9  ;;  %v3054_v8 = vld [vmem:[#allocation5] sm:$0xff] }
 0x9c1   :  { %1096 = vmatpush.msrb.mxu0 %v3054_v8 }
 0x9c2   :  { %v2220_v13 = vmul.f32 -1.442695, %v843_v11  ;;  %v2221_v46 = vmul.f32 -1.442695, %v844_v22  ;;  %v3056_v11 = vld [vmem:[#allocation5 + $0x8] sm:$0xff] }
 0x9c3   :  { %1116 = vmatpush.msrb.mxu1 %v3056_v11 }
 0x9c4   :  { %2357 = vpow2.f32 %v2220_v13 }
 0x9ca   :  { %v2358_v15 = vpop.eup %2357 }
 0x9cb   :  { %v848_v17 = vadd.f32 1.0, %v2358_v15 }
 0x9cd   :  { %2359 = vrcp.f32 %v848_v17  ;;  %v860_v35 = vand.u32 2147483648, %v848_v17  ;;  %v858_v37 = vand.u32 2147483647, %v848_v17  ;;  %vm854_vm7 = vweird.f32 %v848_v17 }
 0x9ce   :  { %2361 = vtanh.f32 %v844_v22 }
 0x9cf   :  { %v861_v34 = vor.u32 1.1754944e-38, %v860_v35  ;;  %vm859_vm9 = vcmp.eq.f32.partialorder %v858_v37, 8.507059e+37  ;;  %2363 = vpow2.f32 %v2221_v46 }
 0x9d3   :  { %v2360_v20 = vpop.eup %2359 }
 0x9d4   :  { %v850_v26 = vmul.f32 %v2360_v20, %v848_v17  ;;  %vm855_vm6 = vweird.f32 %v2360_v20  ;;  %v2362_v42 = vpop.eup %2361 }
 0x9d5   :  { %vm856_vm8 = vmor %vm854_vm7, %vm855_vm6  ;;  %v2364_v47 = vpop.eup %2363 }
 0x9d6   :  { %v851_v33 = vsub.f32 1.0, %v850_v26  ;;  %v2970_v48 = vadd.f32 1.0, %v2364_v47 }
 0x9d8   :  { %v852_v36 = vmul.f32 %v2360_v20, %v851_v33  ;;  %2365 = vrcp.f32 %v2970_v48  ;;  %v880_v19 = vand.u32 2147483648, %v2970_v48  ;;  %vm874_vm11 = vweird.f32 %v2970_v48 }
 0x9da   :  { %v853_v39 = vadd.f32 %v2360_v20, %v852_v36  ;;  %v881_v26 = vor.u32 1.1754944e-38, %v880_v19 }
 0x9dc   :  { %v857_v41 = vsel %vm856_vm8, %v2360_v20, %v853_v39  ;;  %v878_v20 = vand.u32 2147483647, %v2970_v48  ;;  %v3072_v39 = vld [vmem:[#allocation7] sm:$0xff] }
 0x9dd   :  { %v862_v43 = vsel %vm859_vm9, %v861_v34, %v857_v41  ;;  %v3074_v34 = vld [vmem:[#allocation7 + $0x8] sm:$0xff]  ;;  %1056 = vmatpush.msra.mxu2 %v3072_v39 }
 0x9de   :  { %v888_v44 = vmul.f32 %v2362_v42, %v862_v43  ;;  %v2967_v45 = vmul.f32 %v885_v40, %v862_v43  ;;  %v2366_v10 = vpop.eup %2365  ;;  %vm879_vm13 = vcmp.eq.f32.partialorder %v878_v20, 8.507059e+37  ;;  %v2226_v40 = vld [vmem:[%s3507_s7 + $0x2] sm:$0x3]  ;;  %1076 = vmatpush.msra.mxu3 %v3074_v34 }
 0x9df   :  { %v870_v30 = vmul.f32 %v2366_v10, %v2970_v48  ;;  %vm875_vm10 = vweird.f32 %v2366_v10  ;;  %2228 = vmatmul.msk.f32.vlgmr.msra.gmra.mxu2 %vm176_vm2, %v2226_v40  ;;  %2229 = vmatmul.msk.f32.vlgmr.msra.gmra.mxu3 %vm176_vm2, %v2226_v40 }
 0x9e0   :  { %890 = vrot.lane.b32.xlu1 %v888_v44, %s2600_s24  ;;  %vm876_vm12 = vmor %vm874_vm11, %vm875_vm10  ;;  %1193 = vmatpush.msrb.mxu2 %v2977_v51 }
 0x9e1   :  { %v871_v6 = vsub.f32 1.0, %v870_v30  ;;  %1213 = vmatpush.msrb.mxu3 %v2981_v52 }
 0x9e2   :  { %1194 = vmatpush.msrb.mxu2 %v2989_v55 }
 0x9e3   :  { %v872_v13 = vmul.f32 %v2366_v10, %v871_v6  ;;  %1214 = vmatpush.msrb.mxu3 %v2991_v56 }
 0x9e4   :  { %1195 = vmatpush.msrb.mxu2 %v2999_v62 }
 0x9e5   :  { %v873_v18 = vadd.f32 %v2366_v10, %v872_v13  ;;  %1215 = vmatpush.msrb.mxu3 %v3001_v63 }
 0x9e6   :  { %1196 = vmatpush.msrb.mxu2 %v3011_v12 }
 0x9e7   :  { %v877_v22 = vsel %vm876_vm12, %v2366_v10, %v873_v18  ;;  %1216 = vmatpush.msrb.mxu3 %v3013_v14 }
 0x9e8   :  { %v882_v35 = vsel %vm879_vm13, %v881_v26, %v877_v22  ;;  %1197 = vmatpush.msrb.mxu2 %v3023_v25 }
 0x9e9   :  { %1217 = vmatpush.msrb.mxu3 %v3025_v28 }
 0x9ea   :  { %1198 = vmatpush.msrb.mxu2 %v3036_v2 }
 0x9eb   :  { %1218 = vmatpush.msrb.mxu3 %v3038_v23 }
 0x9ec   :  { %1199 = vmatpush.msrb.mxu2 %v3048_v3 }
 0x9ed   :  { %1219 = vmatpush.msrb.mxu3 %v3050_v4 }
 0x9ee   :  { %1200 = vmatpush.msrb.mxu2 %v3072_v39 }
 0x9ef   :  { %1220 = vmatpush.msrb.mxu3 %v3074_v34 }
 0x9f0   :  { %1328 = vmatpush.msra.mxu2 %v2977_v51 }
 0x9f1   :  { %1348 = vmatpush.msra.mxu3 %v2981_v52 }
 0x9f2   :  { %1329 = vmatpush.msra.mxu2 %v2989_v55 }
 0x9f3   :  { %1349 = vmatpush.msra.mxu3 %v2991_v56 }
 0x9f4   :  { %1330 = vmatpush.msra.mxu2 %v2999_v62 }
 0x9f5   :  { %1350 = vmatpush.msra.mxu3 %v3001_v63 }
 0x9f6   :  { %1331 = vmatpush.msra.mxu2 %v3011_v12 }
 0x9f7   :  { %1351 = vmatpush.msra.mxu3 %v3013_v14 }
 0x9f8   :  { %1332 = vmatpush.msra.mxu2 %v3023_v25 }
 0x9f9   :  { %1352 = vmatpush.msra.mxu3 %v3025_v28 }
 0x9fa   :  { %1333 = vmatpush.msra.mxu2 %v3036_v2 }
 0x9fb   :  { %1353 = vmatpush.msra.mxu3 %v3038_v23 }
 0x9fc   :  { %1334 = vmatpush.msra.mxu2 %v3048_v3 }
 0x9fd   :  { %1354 = vmatpush.msra.mxu3 %v3050_v4 }
 0x9fe   :  { %1335 = vmatpush.msra.mxu2 %v3072_v39 }
 0x9ff   :  { %1355 = vmatpush.msra.mxu3 %v3074_v34 }
 0xa52   :  { %v891_v15 = vpop.permute.xlu1 %890 }
 0xa53   :  { %v3065_v17 = vadd.f32 %v891_v15, %v2967_v45 }
 0xa55   :  { %2367 = vtanh.f32 %v3065_v17  ;;  %v990_v13 = vrot.slane %v3065_v17, 6 }
 0xa5b   :  { %v2368_v33 = vpop.eup %2367 }
 0xa5c   :  { %v895_v36 = vmul.f32 %v2368_v33, %v882_v35 }
 0xa5e   :  { %v897_v37 = vrot.slane %v895_v36, 4 }
 0xa60   :  { %898 = vrot.lane.b32.xlu2 %v897_v37, %s2600_s24 }
 0xa62   :  { %v1058_v42 = vpop.f32.mrf.mxu2 }
 0xaba   :  { %v3111_v41 = vpop.permute.xlu2 %898 }
 0xabb   :  { %2222 = vmatmul.msk.f32.vlgmr.msra.gmra.mxu0 %vm176_vm2, %v3111_v41  ;;  %2223 = vmatmul.msk.f32.vlgmr.msra.gmra.mxu1 %vm176_vm2, %v3111_v41 }
 0xabc   :  { %1233 = vmatpush.msra.mxu0 %v2973_v49  ;;  %1253 = vmatpush.msra.mxu1 %v2975_v50 }
 0xabe   :  { %1234 = vmatpush.msra.mxu0 %v2983_v53  ;;  %1254 = vmatpush.msra.mxu1 %v2985_v54 }
 0xac0   :  { %1235 = vmatpush.msra.mxu0 %v2993_v59  ;;  %1255 = vmatpush.msra.mxu1 %v2997_v60 }
 0xac2   :  { %1236 = vmatpush.msra.mxu0 %v3005_v61  ;;  %1256 = vmatpush.msra.mxu1 %v3007_v7 }
 0xac3   :  { %2230 = vmatmul.msk.f32.vlgmr.msrb.gmra.mxu0 %vm176_vm2, %v2838_v16  ;;  %2231 = vmatmul.msk.f32.vlgmr.msrb.gmra.mxu1 %vm176_vm2, %v2838_v16  ;;  %v2227_v16 = vld [vmem:[%s3508_s8 + $0x2] sm:$0x3] }
 0xac4   :  { %1237 = vmatpush.msra.mxu0 %v3017_v24  ;;  %1257 = vmatpush.msra.mxu1 %v3019_v21 }
 0xac5   :  { %1168 = vrot.lane.b32.xlu0 %v2227_v16, %s2600_s24 }
 0xac6   :  { %1238 = vmatpush.msra.mxu0 %v3030_v0  ;;  %1258 = vmatpush.msra.mxu1 %v3032_v1 }
 0xac8   :  { %1239 = vmatpush.msra.mxu0 %v3042_v32  ;;  %1259 = vmatpush.msra.mxu1 %v3044_v29 }
 0xaca   :  { %1240 = vmatpush.msra.mxu0 %v3054_v8  ;;  %1260 = vmatpush.msra.mxu1 %v3056_v11 }
 0xacb   :  { %2236 = vmatmul.msk.f32.vlgmr.msra.gmra.mxu0 %vm176_vm2, %v2872_v27  ;;  %2237 = vmatmul.msk.f32.vlgmr.msra.gmra.mxu1 %vm176_vm2, %v2872_v27 }
 0xacc   :  { %1368 = vmatpush.msrb.mxu0 %v2973_v49  ;;  %1388 = vmatpush.msrb.mxu1 %v2975_v50 }
 0xace   :  { %1369 = vmatpush.msrb.mxu0 %v2983_v53  ;;  %1389 = vmatpush.msrb.mxu1 %v2985_v54 }
 0xad0   :  { %1370 = vmatpush.msrb.mxu0 %v2993_v59  ;;  %1390 = vmatpush.msrb.mxu1 %v2997_v60 }
 0xad2   :  { %1371 = vmatpush.msrb.mxu0 %v3005_v61  ;;  %1391 = vmatpush.msrb.mxu1 %v3007_v7 }
 0xad4   :  { %1372 = vmatpush.msrb.mxu0 %v3017_v24  ;;  %1392 = vmatpush.msrb.mxu1 %v3019_v21 }
 0xad6   :  { %1373 = vmatpush.msrb.mxu0 %v3030_v0  ;;  %1393 = vmatpush.msrb.mxu1 %v3032_v1 }
 0xad8   :  { %1374 = vmatpush.msrb.mxu0 %v3042_v32  ;;  %1394 = vmatpush.msrb.mxu1 %v3044_v29 }
 0xada   :  { %1375 = vmatpush.msrb.mxu0 %v3054_v8  ;;  %1395 = vmatpush.msrb.mxu1 %v3056_v11 }
 0xadb   :  { %2242 = vmatmul.msk.f32.vlgmr.msrb.gmra.mxu0 %vm176_vm2, %v2902_v31  ;;  %2243 = vmatmul.msk.f32.vlgmr.msrb.gmra.mxu1 %vm176_vm2, %v2902_v31 }
 0xadc   :  { %1503 = vmatpush.msra.mxu0 %v2973_v49  ;;  %1523 = vmatpush.msra.mxu1 %v2975_v50 }
 0xade   :  { %1504 = vmatpush.msra.mxu0 %v2983_v53  ;;  %1524 = vmatpush.msra.mxu1 %v2985_v54 }
 0xae0   :  { %1505 = vmatpush.msra.mxu0 %v2993_v59  ;;  %1525 = vmatpush.msra.mxu1 %v2997_v60 }
 0xae2   :  { %1506 = vmatpush.msra.mxu0 %v3005_v61  ;;  %1526 = vmatpush.msra.mxu1 %v3007_v7 }
 0xae4   :  { %1507 = vmatpush.msra.mxu0 %v3017_v24  ;;  %1527 = vmatpush.msra.mxu1 %v3019_v21 }
 0xae6   :  { %1508 = vmatpush.msra.mxu0 %v3030_v0  ;;  %1528 = vmatpush.msra.mxu1 %v3032_v1 }
 0xae8   :  { %1509 = vmatpush.msra.mxu0 %v3042_v32  ;;  %1529 = vmatpush.msra.mxu1 %v3044_v29 }
 0xaea   :  { %1510 = vmatpush.msra.mxu0 %v3054_v8  ;;  %1530 = vmatpush.msra.mxu1 %v3056_v11 }
 0xaeb   :  { %2248 = vmatmul.msk.f32.vlgmr.msra.gmra.mxu0 %vm176_vm2, %v2929_v57  ;;  %2249 = vmatmul.msk.f32.vlgmr.msra.gmra.mxu1 %vm176_vm2, %v2929_v57 }
 0xaec   :  { %1638 = vmatpush.msrb.mxu0 %v2973_v49  ;;  %1658 = vmatpush.msrb.mxu1 %v2975_v50 }
 0xaee   :  { %1639 = vmatpush.msrb.mxu0 %v2983_v53  ;;  %1659 = vmatpush.msrb.mxu1 %v2985_v54 }
 0xaf0   :  { %1640 = vmatpush.msrb.mxu0 %v2993_v59  ;;  %1660 = vmatpush.msrb.mxu1 %v2997_v60 }
 0xaf2   :  { %1641 = vmatpush.msrb.mxu0 %v3005_v61  ;;  %1661 = vmatpush.msrb.mxu1 %v3007_v7 }
 0xaf4   :  { %1642 = vmatpush.msrb.mxu0 %v3017_v24  ;;  %1662 = vmatpush.msrb.mxu1 %v3019_v21 }
 0xaf6   :  { %1643 = vmatpush.msrb.mxu0 %v3030_v0  ;;  %1663 = vmatpush.msrb.mxu1 %v3032_v1 }
 0xaf8   :  { %1644 = vmatpush.msrb.mxu0 %v3042_v32  ;;  %1664 = vmatpush.msrb.mxu1 %v3044_v29 }
 0xafa   :  { %1645 = vmatpush.msrb.mxu0 %v3054_v8  ;;  %1665 = vmatpush.msrb.mxu1 %v3056_v11 }
 0xafb   :  { %2254 = vmatmul.msk.f32.vlgmr.msrb.gmra.mxu0 %vm176_vm2, %v2949_v38  ;;  %2255 = vmatmul.msk.f32.vlgmr.msrb.gmra.mxu1 %vm176_vm2, %v2949_v38  ;;  %v1033_v38 = vld [vmem:[%s3506_s6] sm:$0x3] }
 0xafc   :  { %1773 = vmatpush.msra.mxu0 %v2973_v49  ;;  %1793 = vmatpush.msra.mxu1 %v2975_v50  ;;  %v3269_v43 = vperm.slane %v1033_v38, 0  ;;  %v3275_v30 = vperm.slane %v1033_v38, 1 }
 0xafe   :  { %1774 = vmatpush.msra.mxu0 %v2983_v53  ;;  %1794 = vmatpush.msra.mxu1 %v2985_v54 }
 0xb00   :  { %1775 = vmatpush.msra.mxu0 %v2993_v59  ;;  %1795 = vmatpush.msra.mxu1 %v2997_v60 }
 0xb02   :  { %1776 = vmatpush.msra.mxu0 %v3005_v61  ;;  %1796 = vmatpush.msra.mxu1 %v3007_v7 }
 0xb04   :  { %1777 = vmatpush.msra.mxu0 %v3017_v24  ;;  %1797 = vmatpush.msra.mxu1 %v3019_v21 }
 0xb06   :  { %1778 = vmatpush.msra.mxu0 %v3030_v0  ;;  %1798 = vmatpush.msra.mxu1 %v3032_v1 }
 0xb08   :  { %1779 = vmatpush.msra.mxu0 %v3042_v32  ;;  %1799 = vmatpush.msra.mxu1 %v3044_v29 }
 0xb0a   :  { %1780 = vmatpush.msra.mxu0 %v3054_v8  ;;  %1800 = vmatpush.msra.mxu1 %v3056_v11 }
 0xb0b   :  { %2260 = vmatmul.msk.f32.vlgmr.msra.gmra.mxu0 %vm176_vm2, %v2959_v5  ;;  %2261 = vmatmul.msk.f32.vlgmr.msra.gmra.mxu1 %vm176_vm2, %v2959_v5 }
 0xb0c   :  { %1908 = vmatpush.msrb.mxu0 %v2973_v49  ;;  %1928 = vmatpush.msrb.mxu1 %v2975_v50 }
 0xb0e   :  { %1909 = vmatpush.msrb.mxu0 %v2983_v53  ;;  %1929 = vmatpush.msrb.mxu1 %v2985_v54 }
 0xb10   :  { %1910 = vmatpush.msrb.mxu0 %v2993_v59  ;;  %1930 = vmatpush.msrb.mxu1 %v2997_v60 }
 0xb12   :  { %1911 = vmatpush.msrb.mxu0 %v3005_v61  ;;  %1931 = vmatpush.msrb.mxu1 %v3007_v7 }
 0xb14   :  { %1912 = vmatpush.msrb.mxu0 %v3017_v24  ;;  %1932 = vmatpush.msrb.mxu1 %v3019_v21 }
 0xb16   :  { %1913 = vmatpush.msrb.mxu0 %v3030_v0  ;;  %1933 = vmatpush.msrb.mxu1 %v3032_v1 }
 0xb18   :  { %1914 = vmatpush.msrb.mxu0 %v3042_v32  ;;  %1934 = vmatpush.msrb.mxu1 %v3044_v29 }
 0xb1a   :  { %1915 = vmatpush.msrb.mxu0 %v3054_v8  ;;  %1935 = vmatpush.msrb.mxu1 %v3056_v11 }
 0xb1b   :  { %2266 = vmatmul.msk.f32.vlgmr.msrb.gmra.mxu0 %vm176_vm2, %v3111_v41  ;;  %2267 = vmatmul.msk.f32.vlgmr.msrb.gmra.mxu1 %vm176_vm2, %v3111_v41 }
 0xb1c   :  { %2049 = vmatpush.msra.mxu0 %v2973_v49  ;;  %2069 = vmatpush.msra.mxu1 %v2975_v50 }
 0xb1e   :  { %2050 = vmatpush.msra.mxu0 %v2983_v53  ;;  %2070 = vmatpush.msra.mxu1 %v2985_v54 }
 0xb20   :  { %2051 = vmatpush.msra.mxu0 %v2993_v59  ;;  %2071 = vmatpush.msra.mxu1 %v2997_v60 }
 0xb22   :  { %2052 = vmatpush.msra.mxu0 %v3005_v61  ;;  %2072 = vmatpush.msra.mxu1 %v3007_v7  ;;  %v1078_v61 = vpop.f32.mrf.mxu3 }
 0xb24   :  { %2053 = vmatpush.msra.mxu0 %v3017_v24  ;;  %2073 = vmatpush.msra.mxu1 %v3019_v21 }
 0xb26   :  { %2054 = vmatpush.msra.mxu0 %v3030_v0  ;;  %2074 = vmatpush.msra.mxu1 %v3032_v1 }
 0xb28   :  { %2055 = vmatpush.msra.mxu0 %v3042_v32  ;;  %2075 = vmatpush.msra.mxu1 %v3044_v29 }
 0xb2a   :  { %2056 = vmatpush.msra.mxu0 %v3054_v8  ;;  %2076 = vmatpush.msra.mxu1 %v3056_v11 }
 0xb38   :  { %v919_v27 = vpop.f32.mrf.mxu0  ;;  %v939_v48 = vpop.f32.mrf.mxu1 }
 0xb39   :  { %v944_v31 = vrot.slane %v919_v27, 2 }
 0xb3b   :  { %v948_v57 = vadd.f32 %v944_v31, %v2938_v58  ;;  %v945_v58 = vrot.slane %v939_v48, 2 }
 0xb3d   :  { %v2224_v5 = vmul.f32 -1.442695, %v948_v57  ;;  %v3273_v60 = vadd.f32 %v945_v58, %v2944_v9 }
 0xb3f   :  { %2369 = vpow2.f32 %v2224_v5 }
 0xb40   :  { %v1098_v44 = vpop.f32.mrf.mxu0  ;;  %v1118_v7 = vpop.f32.mrf.mxu1 }
 0xb41   :  { %v1099_v45 = vadd.f32 %v1098_v44, %v1058_v42  ;;  %v1119_v21 = vadd.f32 %v1118_v7, %v1078_v61 }
 0xb43   :  { %v1126_v46 = vadd.f32 %v3269_v43, %v1099_v45  ;;  %v1127_v6 = vadd.f32 %v3275_v30, %v1119_v21  ;;  %v1169_v45 = vpop.permute.xlu0 %1168 }
 0xb45   :  { %v2370_v47 = vpop.eup %2369  ;;  %v2232_v49 = vmul.f32 -1.442695, %v1126_v46  ;;  %v2233_v31 = vmul.f32 -1.442695, %v1127_v6 }
 0xb46   :  { %v953_v50 = vadd.f32 1.0, %v2370_v47 }
 0xb47   :  { %2371 = vpow2.f32 %v2232_v49 }
 0xb48   :  { %2373 = vrcp.f32 %v953_v50  ;;  %v965_v0 = vand.u32 2147483648, %v953_v50  ;;  %v963_v32 = vand.u32 2147483647, %v953_v50  ;;  %vm959_vm15 = vweird.f32 %v953_v50  ;;  %v1242_v21 = vpop.f32.mrf.mxu0 }
 0xb4a   :  { %v966_v11 = vor.u32 1.1754944e-38, %v965_v0  ;;  %vm964_vm1 = vcmp.eq.f32.partialorder %v963_v32, 8.507059e+37 }
 0xb4d   :  { %v2372_v53 = vpop.eup %2371 }
 0xb4e   :  { %v2374_v54 = vpop.eup %2373  ;;  %v1131_v59 = vadd.f32 1.0, %v2372_v53 }
 0xb4f   :  { %v955_v10 = vmul.f32 %v2374_v54, %v953_v50  ;;  %vm960_vm14 = vweird.f32 %v2374_v54 }
 0xb50   :  { %2375 = vrcp.f32 %v1131_v59  ;;  %vm961_vm0 = vmor %vm959_vm15, %vm960_vm14  ;;  %v1143_v22 = vand.u32 2147483648, %v1131_v59  ;;  %v1141_v36 = vand.u32 2147483647, %v1131_v59  ;;  %vm1137_vm4 = vweird.f32 %v1131_v59 }
 0xb51   :  { %v956_v24 = vsub.f32 1.0, %v955_v10  ;;  %2377 = vtanh.f32 %v3273_v60 }
 0xb52   :  { %2379 = vtanh.f32 %v1127_v6  ;;  %v1144_v40 = vor.u32 1.1754944e-38, %v1143_v22  ;;  %vm1142_vm6 = vcmp.eq.f32.partialorder %v1141_v36, 8.507059e+37 }
 0xb53   :  { %v957_v1 = vmul.f32 %v2374_v54, %v956_v24  ;;  %2381 = vpow2.f32 %v2233_v31 }
 0xb55   :  { %v958_v8 = vadd.f32 %v2374_v54, %v957_v1 }
 0xb56   :  { %v2376_v29 = vpop.eup %2375 }
 0xb57   :  { %v1133_v9 = vmul.f32 %v2376_v29, %v1131_v59  ;;  %v962_v15 = vsel %vm961_vm0, %v2374_v54, %v958_v8  ;;  %v2378_v18 = vpop.eup %2377  ;;  %vm1138_vm3 = vweird.f32 %v2376_v29 }
 0xb58   :  { %v967_v20 = vsel %vm964_vm1, %v966_v11, %v962_v15  ;;  %vm1139_vm5 = vmor %vm1137_vm4, %vm1138_vm3  ;;  %v2380_v17 = vpop.eup %2379  ;;  %v1262_v11 = vpop.f32.mrf.mxu1 }
 0xb59   :  { %v1134_v19 = vsub.f32 1.0, %v1133_v9  ;;  %v3280_v26 = vmul.f32 %v2378_v18, %v967_v20  ;;  %v3282_v33 = vmul.f32 %v990_v13, %v967_v20  ;;  %v2382_v57 = vpop.eup %2381 }
 0xb5a   :  { %v1151_v38 = vadd.f32 1.0, %v2382_v57 }
 0xb5b   :  { %v1135_v35 = vmul.f32 %v2376_v29, %v1134_v19 }
 0xb5c   :  { %2383 = vrcp.f32 %v1151_v38  ;;  %v1163_v58 = vand.u32 2147483648, %v1151_v38  ;;  %vm1157_vm8 = vweird.f32 %v1151_v38  ;;  %v1161_v53 = vand.u32 2147483647, %v1151_v38 }
 0xb5d   :  { %v1136_v37 = vadd.f32 %v2376_v29, %v1135_v35 }
 0xb5e   :  { %v1164_v59 = vor.u32 1.1754944e-38, %v1163_v58  ;;  %vm1162_vm10 = vcmp.eq.f32.partialorder %v1161_v53, 8.507059e+37 }
 0xb5f   :  { %v1140_v41 = vsel %vm1139_vm5, %v2376_v29, %v1136_v37 }
 0xb60   :  { %v1145_v16 = vsel %vm1142_vm6, %v1144_v40, %v1140_v41 }
 0xb61   :  { %v1172_v27 = vmul.f32 %v2380_v17, %v1145_v16  ;;  %v1171_v47 = vmul.f32 %v1169_v45, %v1145_v16 }
 0xb62   :  { %v2384_v5 = vpop.eup %2383 }
 0xb63   :  { %1174 = vrot.lane.b32.xlu1 %v1172_v27, %s2600_s24  ;;  %v1153_v42 = vmul.f32 %v2384_v5, %v1151_v38  ;;  %vm1158_vm7 = vweird.f32 %v2384_v5 }
 0xb64   :  { %vm1159_vm9 = vmor %vm1157_vm8, %vm1158_vm7 }
 0xb65   :  { %v1154_v44 = vsub.f32 1.0, %v1153_v42 }
 0xb67   :  { %v1155_v46 = vmul.f32 %v2384_v5, %v1154_v44 }
 0xb69   :  { %v1156_v50 = vadd.f32 %v2384_v5, %v1155_v46 }
 0xb6b   :  { %v1160_v54 = vsel %vm1159_vm9, %v2384_v5, %v1156_v50 }
 0xb6c   :  { %v1165_v7 = vsel %vm1162_vm10, %v1164_v59, %v1160_v54 }
 0xbd5   :  { %v1175_v48 = vpop.permute.xlu1 %1174 }
 0xbd6   :  { %v3285_v49 = vadd.f32 %v1175_v48, %v1171_v47 }
 0xbd8   :  { %2385 = vtanh.f32 %v3285_v49 }
 0xbde   :  { %v2386_v61 = vpop.eup %2385 }
 0xbdf   :  { %v1179_v10 = vmul.f32 %v2386_v61, %v1165_v7 }
 0xbe1   :  { %1181 = vrot.lane.b32.xlu2 %v1179_v10, %s2600_s24 }
 0xc3b   :  { %v1182_v24 = vpop.permute.xlu2 %1181 }
 0xc3c   :  { %2234 = vmatmul.msk.f32.vlgmr.msrb.gmra.mxu2 %vm176_vm2, %v1182_v24  ;;  %2235 = vmatmul.msk.f32.vlgmr.msrb.gmra.mxu3 %vm176_vm2, %v1182_v24  ;;  %v1377_v24 = vpop.f32.mrf.mxu0 }
 0xc3d   :  { %1463 = vmatpush.msrb.mxu2 %v2977_v51  ;;  %1483 = vmatpush.msrb.mxu3 %v2981_v52 }
 0xc3f   :  { %1464 = vmatpush.msrb.mxu2 %v2989_v55  ;;  %1484 = vmatpush.msrb.mxu3 %v2991_v56 }
 0xc41   :  { %1465 = vmatpush.msrb.mxu2 %v2999_v62  ;;  %1485 = vmatpush.msrb.mxu3 %v3001_v63 }
 0xc43   :  { %1466 = vmatpush.msrb.mxu2 %v3011_v12  ;;  %1486 = vmatpush.msrb.mxu3 %v3013_v14 }
 0xc45   :  { %1467 = vmatpush.msrb.mxu2 %v3023_v25  ;;  %1487 = vmatpush.msrb.mxu3 %v3025_v28 }
 0xc47   :  { %1468 = vmatpush.msrb.mxu2 %v3036_v2  ;;  %1488 = vmatpush.msrb.mxu3 %v3038_v23 }
 0xc49   :  { %1469 = vmatpush.msrb.mxu2 %v3048_v3  ;;  %1489 = vmatpush.msrb.mxu3 %v3050_v4 }
 0xc4b   :  { %1470 = vmatpush.msrb.mxu2 %v3072_v39  ;;  %1490 = vmatpush.msrb.mxu3 %v3074_v34 }
 0xcbf   :  { %v1202_v0 = vpop.f32.mrf.mxu2  ;;  %v1222_v9 = vpop.f32.mrf.mxu3 }
 0xcc0   :  { %v1243_v1 = vadd.f32 %v1242_v21, %v1202_v0  ;;  %v1263_v13 = vadd.f32 %v1262_v11, %v1222_v9  ;;  %v1397_v9 = vpop.f32.mrf.mxu1 }
 0xcc2   :  { %v1265_v32 = vadd.f32 %v1243_v1, %v3269_v43  ;;  %v1266_v18 = vadd.f32 %v1263_v13, %v3275_v30 }
 0xcc4   :  { %v2238_v29 = vmul.f32 -1.442695, %v1265_v32  ;;  %v2239_v31 = vmul.f32 -1.442695, %v1266_v18 }
 0xcc6   :  { %2387 = vpow2.f32 %v2238_v29 }
 0xccc   :  { %v2388_v6 = vpop.eup %2387 }
 0xccd   :  { %v1270_v8 = vadd.f32 1.0, %v2388_v6 }
 0xccf   :  { %2389 = vrcp.f32 %v1270_v8  ;;  %v1282_v22 = vand.u32 2147483648, %v1270_v8  ;;  %v1280_v36 = vand.u32 2147483647, %v1270_v8  ;;  %vm1276_vm12 = vweird.f32 %v1270_v8 }
 0xcd0   :  { %2391 = vtanh.f32 %v1266_v18 }
 0xcd1   :  { %v1283_v40 = vor.u32 1.1754944e-38, %v1282_v22  ;;  %vm1281_vm14 = vcmp.eq.f32.partialorder %v1280_v36, 8.507059e+37  ;;  %2393 = vpow2.f32 %v2239_v31 }
 0xcd5   :  { %v2390_v15 = vpop.eup %2389 }
 0xcd6   :  { %v1272_v19 = vmul.f32 %v2390_v15, %v1270_v8  ;;  %vm1277_vm11 = vweird.f32 %v2390_v15  ;;  %v2392_v17 = vpop.eup %2391 }
 0xcd7   :  { %vm1278_vm13 = vmor %vm1276_vm12, %vm1277_vm11  ;;  %v2394_v57 = vpop.eup %2393 }
 0xcd8   :  { %v1273_v20 = vsub.f32 1.0, %v1272_v19  ;;  %v1290_v38 = vadd.f32 1.0, %v2394_v57 }
 0xcda   :  { %v1274_v35 = vmul.f32 %v2390_v15, %v1273_v20  ;;  %2395 = vrcp.f32 %v1290_v38  ;;  %v1302_v58 = vand.u32 2147483648, %v1290_v38  ;;  %vm1296_vm0 = vweird.f32 %v1290_v38 }
 0xcdb   :  { %v1300_v53 = vand.u32 2147483647, %v1290_v38 }
 0xcdc   :  { %v1275_v37 = vadd.f32 %v2390_v15, %v1274_v35  ;;  %v1303_v59 = vor.u32 1.1754944e-38, %v1302_v58 }
 0xcdd   :  { %vm1301_vm3 = vcmp.eq.f32.partialorder %v1300_v53, 8.507059e+37 }
 0xcde   :  { %v1279_v41 = vsel %vm1278_vm13, %v2390_v15, %v1275_v37 }
 0xcdf   :  { %v1284_v16 = vsel %vm1281_vm14, %v1283_v40, %v1279_v41 }
 0xce0   :  { %v1307_v27 = vmul.f32 %v2392_v17, %v1284_v16  ;;  %v2396_v5 = vpop.eup %2395  ;;  %v1306_v46 = vmul.f32 %v1284_v16, %v3285_v49 }
 0xce1   :  { %v1292_v42 = vmul.f32 %v2396_v5, %v1290_v38  ;;  %vm1297_vm15 = vweird.f32 %v2396_v5 }
 0xce2   :  { %1309 = vrot.lane.b32.xlu0 %v1307_v27, %s2600_s24  ;;  %vm1298_vm1 = vmor %vm1296_vm0, %vm1297_vm15 }
 0xce3   :  { %v1293_v44 = vsub.f32 1.0, %v1292_v42 }
 0xce5   :  { %v1294_v45 = vmul.f32 %v2396_v5, %v1293_v44 }
 0xce7   :  { %v1295_v50 = vadd.f32 %v2396_v5, %v1294_v45 }
 0xce9   :  { %v1299_v54 = vsel %vm1298_vm1, %v2396_v5, %v1295_v50 }
 0xcea   :  { %v1304_v7 = vsel %vm1301_vm3, %v1303_v59, %v1299_v54 }
 0xd54   :  { %v1310_v47 = vpop.permute.xlu0 %1309 }
 0xd55   :  { %v3311_v48 = vadd.f32 %v1310_v47, %v1306_v46 }
 0xd57   :  { %2397 = vtanh.f32 %v3311_v48 }
 0xd5d   :  { %v2398_v61 = vpop.eup %2397 }
 0xd5e   :  { %v1314_v10 = vmul.f32 %v2398_v61, %v1304_v7 }
 0xd60   :  { %1316 = vrot.lane.b32.xlu1 %v1314_v10, %s2600_s24 }
 0xdd2   :  { %v1317_v49 = vpop.permute.xlu1 %1316 }
 0xdd3   :  { %2240 = vmatmul.msk.f32.vlgmr.msra.gmra.mxu2 %vm176_vm2, %v1317_v49  ;;  %2241 = vmatmul.msk.f32.vlgmr.msra.gmra.mxu3 %vm176_vm2, %v1317_v49 }
 0xdd4   :  { %1598 = vmatpush.msra.mxu2 %v2977_v51  ;;  %1618 = vmatpush.msra.mxu3 %v2981_v52 }
 0xdd6   :  { %1599 = vmatpush.msra.mxu2 %v2989_v55  ;;  %1619 = vmatpush.msra.mxu3 %v2991_v56 }
 0xdd8   :  { %1600 = vmatpush.msra.mxu2 %v2999_v62  ;;  %1620 = vmatpush.msra.mxu3 %v3001_v63 }
 0xdda   :  { %1601 = vmatpush.msra.mxu2 %v3011_v12  ;;  %1621 = vmatpush.msra.mxu3 %v3013_v14 }
 0xddc   :  { %1602 = vmatpush.msra.mxu2 %v3023_v25  ;;  %1622 = vmatpush.msra.mxu3 %v3025_v28 }
 0xdde   :  { %1603 = vmatpush.msra.mxu2 %v3036_v2  ;;  %1623 = vmatpush.msra.mxu3 %v3038_v23 }
 0xde0   :  { %1604 = vmatpush.msra.mxu2 %v3048_v3  ;;  %1624 = vmatpush.msra.mxu3 %v3050_v4 }
 0xde2   :  { %1605 = vmatpush.msra.mxu2 %v3072_v39  ;;  %1625 = vmatpush.msra.mxu3 %v3074_v34 }
 0xe56   :  { %v1337_v21 = vpop.f32.mrf.mxu2  ;;  %v1357_v8 = vpop.f32.mrf.mxu3 }
 0xe57   :  { %v1378_v0 = vadd.f32 %v1377_v24, %v1337_v21  ;;  %v1398_v11 = vadd.f32 %v1397_v9, %v1357_v8 }
 0xe59   :  { %v1400_v1 = vadd.f32 %v1378_v0, %v3269_v43  ;;  %v1401_v15 = vadd.f32 %v1398_v11, %v3275_v30 }
 0xe5b   :  { %v2244_v32 = vmul.f32 -1.442695, %v1400_v1  ;;  %v2245_v27 = vmul.f32 -1.442695, %v1401_v15 }
 0xe5d   :  { %2399 = vpow2.f32 %v2244_v32 }
 0xe63   :  { %v2400_v29 = vpop.eup %2399 }
 0xe64   :  { %v1405_v6 = vadd.f32 1.0, %v2400_v29 }
 0xe66   :  { %2401 = vrcp.f32 %v1405_v6  ;;  %v1417_v20 = vand.u32 2147483648, %v1405_v6  ;;  %v1415_v35 = vand.u32 2147483647, %v1405_v6  ;;  %vm1411_vm5 = vweird.f32 %v1405_v6 }
 0xe67   :  { %2403 = vtanh.f32 %v1401_v15 }
 0xe68   :  { %v1418_v37 = vor.u32 1.1754944e-38, %v1417_v20  ;;  %vm1416_vm7 = vcmp.eq.f32.partialorder %v1415_v35, 8.507059e+37  ;;  %2405 = vpow2.f32 %v2245_v27 }
 0xe6c   :  { %v2402_v13 = vpop.eup %2401 }
 0xe6d   :  { %v1407_v18 = vmul.f32 %v2402_v13, %v1405_v6  ;;  %vm1412_vm4 = vweird.f32 %v2402_v13  ;;  %v2404_v41 = vpop.eup %2403 }
 0xe6e   :  { %vm1413_vm6 = vmor %vm1411_vm5, %vm1412_vm4  ;;  %v2406_v31 = vpop.eup %2405 }
 0xe6f   :  { %v1408_v19 = vsub.f32 1.0, %v1407_v18  ;;  %v1425_v57 = vadd.f32 1.0, %v2406_v31 }
 0xe71   :  { %v1409_v22 = vmul.f32 %v2402_v13, %v1408_v19  ;;  %2407 = vrcp.f32 %v1425_v57  ;;  %v1437_v58 = vand.u32 2147483648, %v1425_v57  ;;  %vm1431_vm9 = vweird.f32 %v1425_v57 }
 0xe72   :  { %v1435_v53 = vand.u32 2147483647, %v1425_v57 }
 0xe73   :  { %v1410_v36 = vadd.f32 %v2402_v13, %v1409_v22  ;;  %v1438_v59 = vor.u32 1.1754944e-38, %v1437_v58  ;;  %v3390_v58 = vld [vmem:[#allocation7 + $0x48] sm:$0xff] }
 0xe74   :  { %vm1436_vm11 = vcmp.eq.f32.partialorder %v1435_v53, 8.507059e+37  ;;  %v3393_v53 = vld [vmem:[#allocation7 + $0x30] sm:$0xff] }
 0xe75   :  { %v1414_v40 = vsel %vm1413_vm6, %v2402_v13, %v1410_v36 }
 0xe76   :  { %v1419_v17 = vsel %vm1416_vm7, %v1418_v37, %v1414_v40 }
 0xe77   :  { %v1442_v16 = vmul.f32 %v2404_v41, %v1419_v17  ;;  %v2408_v38 = vpop.eup %2407  ;;  %v1441_v45 = vmul.f32 %v1419_v17, %v3311_v48 }
 0xe78   :  { %v1427_v5 = vmul.f32 %v2408_v38, %v1425_v57  ;;  %vm1432_vm8 = vweird.f32 %v2408_v38 }
 0xe79   :  { %1444 = vrot.lane.b32.xlu2 %v1442_v16, %s2600_s24  ;;  %vm1433_vm10 = vmor %vm1431_vm9, %vm1432_vm8 }
 0xe7a   :  { %v1428_v42 = vsub.f32 1.0, %v1427_v5  ;;  %v3369_v5 = vld [vmem:[#allocation7 + $0x70] sm:$0xff] }
 0xe7c   :  { %v1429_v44 = vmul.f32 %v2408_v38, %v1428_v42  ;;  %v3372_v42 = vld [vmem:[#allocation7 + $0x78] sm:$0xff] }
 0xe7e   :  { %v1430_v50 = vadd.f32 %v2408_v38, %v1429_v44  ;;  %v3375_v44 = vld [vmem:[#allocation7 + $0x60] sm:$0xff] }
 0xe80   :  { %v1434_v54 = vsel %vm1433_vm10, %v2408_v38, %v1430_v50  ;;  %v3387_v50 = vld [vmem:[#allocation7 + $0x40] sm:$0xff] }
 0xe81   :  { %v1439_v7 = vsel %vm1436_vm11, %v1438_v59, %v1434_v54  ;;  %v3396_v54 = vld [vmem:[#allocation7 + $0x38] sm:$0xff]  ;;  %v3399_v59 = vld [vmem:[#allocation7 + $0x20] sm:$0xff] }
 0xed3   :  { %v1445_v46 = vpop.permute.xlu2 %1444 }
 0xed4   :  { %v3337_v47 = vadd.f32 %v1445_v46, %v1441_v45  ;;  %v3378_v45 = vld [vmem:[#allocation7 + $0x68] sm:$0xff]  ;;  %v3381_v46 = vld [vmem:[#allocation7 + $0x50] sm:$0xff] }
 0xed6   :  { %2409 = vtanh.f32 %v3337_v47 }
 0xedc   :  { %v2410_v61 = vpop.eup %2409 }
 0xedd   :  { %v1449_v10 = vmul.f32 %v2410_v61, %v1439_v7  ;;  %v3402_v61 = vld [vmem:[#allocation7 + $0x28] sm:$0xff]  ;;  %v3405_v7 = vld [vmem:[#allocation7 + $0x10] sm:$0xff] }
 0xedf   :  { %1451 = vrot.lane.b32.xlu0 %v1449_v10, %s2600_s24  ;;  %v3408_v10 = vld [vmem:[#allocation7 + $0x18] sm:$0xff] }
 0xf51   :  { %v1452_v48 = vpop.permute.xlu0 %1451 }
 0xf52   :  { %2246 = vmatmul.msk.f32.vlgmr.msrb.gmra.mxu2 %vm176_vm2, %v1452_v48  ;;  %2247 = vmatmul.msk.f32.vlgmr.msrb.gmra.mxu3 %vm176_vm2, %v1452_v48 }
 0xf53   :  { %1733 = vmatpush.msrb.mxu2 %v2977_v51  ;;  %1753 = vmatpush.msrb.mxu3 %v2981_v52  ;;  %v1512_v51 = vpop.f32.mrf.mxu0 }
 0xf55   :  { %1734 = vmatpush.msrb.mxu2 %v2989_v55  ;;  %1754 = vmatpush.msrb.mxu3 %v2991_v56 }
 0xf57   :  { %1735 = vmatpush.msrb.mxu2 %v2999_v62  ;;  %1755 = vmatpush.msrb.mxu3 %v3001_v63 }
 0xf59   :  { %1736 = vmatpush.msrb.mxu2 %v3011_v12  ;;  %1756 = vmatpush.msrb.mxu3 %v3013_v14 }
 0xf5b   :  { %1737 = vmatpush.msrb.mxu2 %v3023_v25  ;;  %1757 = vmatpush.msrb.mxu3 %v3025_v28  ;;  %v1532_v25 = vpop.f32.mrf.mxu1  ;;  %v1647_v48 = vpop.f32.mrf.mxu0 }
 0xf5d   :  { %1738 = vmatpush.msrb.mxu2 %v3036_v2  ;;  %1758 = vmatpush.msrb.mxu3 %v3038_v23 }
 0xf5f   :  { %1739 = vmatpush.msrb.mxu2 %v3048_v3  ;;  %1759 = vmatpush.msrb.mxu3 %v3050_v4 }
 0xf61   :  { %1740 = vmatpush.msrb.mxu2 %v3072_v39  ;;  %1760 = vmatpush.msrb.mxu3 %v3074_v34 }
 0xfd5   :  { %v1472_v52 = vpop.f32.mrf.mxu2  ;;  %v1492_v14 = vpop.f32.mrf.mxu3 }
 0xfd6   :  { %v1513_v55 = vadd.f32 %v1512_v51, %v1472_v52  ;;  %v1533_v28 = vadd.f32 %v1532_v25, %v1492_v14  ;;  %v1667_v14 = vpop.f32.mrf.mxu1 }
 0xfd8   :  { %v1535_v56 = vadd.f32 %v1513_v55, %v3269_v43  ;;  %v1536_v23 = vadd.f32 %v1533_v28, %v3275_v30 }
 0xfda   :  { %v2250_v62 = vmul.f32 -1.442695, %v1535_v56  ;;  %v2251_v9 = vmul.f32 -1.442695, %v1536_v23 }
 0xfdc   :  { %2411 = vpow2.f32 %v2250_v62 }
 0xfe2   :  { %v2412_v63 = vpop.eup %2411 }
 0xfe3   :  { %v1540_v12 = vadd.f32 1.0, %v2412_v63 }
 0xfe5   :  { %2413 = vrcp.f32 %v1540_v12  ;;  %v1552_v49 = vand.u32 2147483648, %v1540_v12  ;;  %v1550_v21 = vand.u32 2147483647, %v1540_v12  ;;  %vm1546_vm13 = vweird.f32 %v1540_v12 }
 0xfe6   :  { %2415 = vtanh.f32 %v1536_v23 }
 0xfe7   :  { %v1553_v1 = vor.u32 1.1754944e-38, %v1552_v49  ;;  %vm1551_vm15 = vcmp.eq.f32.partialorder %v1550_v21, 8.507059e+37  ;;  %2417 = vpow2.f32 %v2251_v9 }
 0xfeb   :  { %v2414_v2 = vpop.eup %2413 }
 0xfec   :  { %v1542_v3 = vmul.f32 %v2414_v2, %v1540_v12  ;;  %vm1547_vm12 = vweird.f32 %v2414_v2  ;;  %v2416_v29 = vpop.eup %2415 }
 0xfed   :  { %vm1548_vm14 = vmor %vm1546_vm13, %vm1547_vm12  ;;  %v2418_v11 = vpop.eup %2417 }
 0xfee   :  { %v1543_v4 = vsub.f32 1.0, %v1542_v3  ;;  %v1560_v13 = vadd.f32 1.0, %v2418_v11 }
 0xff0   :  { %v1544_v24 = vmul.f32 %v2414_v2, %v1543_v4  ;;  %2419 = vrcp.f32 %v1560_v13  ;;  %v1572_v40 = vand.u32 2147483648, %v1560_v13  ;;  %vm1566_vm1 = vweird.f32 %v1560_v13 }
 0xff1   :  { %v1570_v41 = vand.u32 2147483647, %v1560_v13 }
 0xff2   :  { %v1545_v0 = vadd.f32 %v2414_v2, %v1544_v24  ;;  %v1573_v16 = vor.u32 1.1754944e-38, %v1572_v40 }
 0xff3   :  { %vm1571_vm4 = vcmp.eq.f32.partialorder %v1570_v41, 8.507059e+37 }
 0xff4   :  { %v1549_v32 = vsel %vm1548_vm14, %v2414_v2, %v1545_v0 }
 0xff5   :  { %v1554_v6 = vsel %vm1551_vm15, %v1553_v1, %v1549_v32 }
 0xff6   :  { %v1577_v8 = vmul.f32 %v2416_v29, %v1554_v6  ;;  %v2420_v15 = vpop.eup %2419  ;;  %v1576_v22 = vmul.f32 %v1554_v6, %v3337_v47  ;;  %v3384_v47 = vld [vmem:[#allocation7 + $0x58] sm:$0xff] }
 0xff7   :  { %v1562_v18 = vmul.f32 %v2420_v15, %v1560_v13  ;;  %vm1567_vm0 = vweird.f32 %v2420_v15 }
 0xff8   :  { %1579 = vrot.lane.b32.xlu1 %v1577_v8, %s2600_s24  ;;  %vm1568_vm3 = vmor %vm1566_vm1, %vm1567_vm0 }
 0xff9   :  { %v1563_v19 = vsub.f32 1.0, %v1562_v18 }
 0xffb   :  { %v1564_v20 = vmul.f32 %v2420_v15, %v1563_v19 }
 0xffd   :  { %v1565_v37 = vadd.f32 %v2420_v15, %v1564_v20 }
 0xfff   :  { %v1569_v17 = vsel %vm1568_vm3, %v2420_v15, %v1565_v37 }
0x1000   :  { %v1574_v31 = vsel %vm1571_vm4, %v1573_v16, %v1569_v17 }
0x106a   :  { %v1580_v35 = vpop.permute.xlu1 %1579 }
0x106b   :  { %v3363_v36 = vadd.f32 %v1580_v35, %v1576_v22 }
0x106d   :  { %2421 = vtanh.f32 %v3363_v36 }
0x1073   :  { %v2422_v27 = vpop.eup %2421 }
0x1074   :  { %v1584_v57 = vmul.f32 %v2422_v27, %v1574_v31  ;;  %v2491_v31 = vld [vmem:[#allocation7] sm:$0xff] }
0x1076   :  { %1586 = vrot.lane.b32.xlu2 %v1584_v57, %s2600_s24  ;;  %v2492_v57 = vld [vmem:[#allocation7 + $0x8] sm:$0xff] }
0x10d0   :  { %v1587_v38 = vpop.permute.xlu2 %1586 }
0x10d1   :  { %2252 = vmatmul.msk.f32.vlgmr.msra.gmra.mxu2 %vm176_vm2, %v1587_v38  ;;  %2253 = vmatmul.msk.f32.vlgmr.msra.gmra.mxu3 %vm176_vm2, %v1587_v38  ;;  %v1782_v38 = vpop.f32.mrf.mxu0 }
0x10d2   :  { %1868 = vmatpush.msra.mxu2 %v3369_v5  ;;  %1888 = vmatpush.msra.mxu3 %v3372_v42 }
0x10d4   :  { %1869 = vmatpush.msra.mxu2 %v3375_v44  ;;  %1889 = vmatpush.msra.mxu3 %v3378_v45 }
0x10d6   :  { %1870 = vmatpush.msra.mxu2 %v3381_v46  ;;  %1890 = vmatpush.msra.mxu3 %v3384_v47 }
0x10d8   :  { %1871 = vmatpush.msra.mxu2 %v3387_v50  ;;  %1891 = vmatpush.msra.mxu3 %v3390_v58 }
0x10da   :  { %1872 = vmatpush.msra.mxu2 %v3393_v53  ;;  %1892 = vmatpush.msra.mxu3 %v3396_v54 }
0x10dc   :  { %1873 = vmatpush.msra.mxu2 %v3399_v59  ;;  %1893 = vmatpush.msra.mxu3 %v3402_v61 }
0x10de   :  { %1874 = vmatpush.msra.mxu2 %v3405_v7  ;;  %1894 = vmatpush.msra.mxu3 %v3408_v10 }
0x10e0   :  { %1875 = vmatpush.msra.mxu2 %v3072_v39  ;;  %1895 = vmatpush.msra.mxu3 %v3074_v34 }
0x1154   :  { %v1607_v51 = vpop.f32.mrf.mxu2  ;;  %v1627_v12 = vpop.f32.mrf.mxu3 }
0x1155   :  { %v1648_v52 = vadd.f32 %v1647_v48, %v1607_v51  ;;  %v1668_v25 = vadd.f32 %v1667_v14, %v1627_v12 }
0x1157   :  { %v1670_v55 = vadd.f32 %v1648_v52, %v3269_v43  ;;  %v1671_v2 = vadd.f32 %v1668_v25, %v3275_v30  ;;  %v2225_v25 = vmul.f32 -1.442695, %v3273_v60 }
0x1159   :  { %v2256_v56 = vmul.f32 -1.442695, %v1670_v55  ;;  %v2257_v29 = vmul.f32 -1.442695, %v1671_v2 }
0x115b   :  { %2423 = vpow2.f32 %v2256_v56 }
0x1161   :  { %v2424_v62 = vpop.eup %2423 }
0x1162   :  { %v1675_v63 = vadd.f32 1.0, %v2424_v62 }
0x1164   :  { %2425 = vrcp.f32 %v1675_v63  ;;  %v1687_v34 = vand.u32 2147483648, %v1675_v63  ;;  %v1685_v4 = vand.u32 2147483647, %v1675_v63  ;;  %vm1681_vm6 = vweird.f32 %v1675_v63 }
0x1165   :  { %2427 = vtanh.f32 %v1671_v2 }
0x1166   :  { %v1688_v24 = vor.u32 1.1754944e-38, %v1687_v34  ;;  %vm1686_vm8 = vcmp.eq.f32.partialorder %v1685_v4, 8.507059e+37  ;;  %2429 = vpow2.f32 %v2257_v29 }
0x116a   :  { %v2426_v28 = vpop.eup %2425 }
0x116b   :  { %v1677_v23 = vmul.f32 %v2426_v28, %v1675_v63  ;;  %vm1682_vm5 = vweird.f32 %v2426_v28  ;;  %v2428_v0 = vpop.eup %2427 }
0x116c   :  { %vm1683_vm7 = vmor %vm1681_vm6, %vm1682_vm5  ;;  %v2430_v6 = vpop.eup %2429 }
0x116d   :  { %v1678_v39 = vsub.f32 1.0, %v1677_v23  ;;  %v1695_v8 = vadd.f32 1.0, %v2430_v6 }
0x116f   :  { %v1679_v3 = vmul.f32 %v2426_v28, %v1678_v39  ;;  %2431 = vrcp.f32 %v1695_v8  ;;  %v1707_v35 = vand.u32 2147483648, %v1695_v8  ;;  %vm1701_vm10 = vweird.f32 %v1695_v8 }
0x1170   :  { %v1705_v37 = vand.u32 2147483647, %v1695_v8 }
0x1171   :  { %v1680_v49 = vadd.f32 %v2426_v28, %v1679_v3  ;;  %v1708_v41 = vor.u32 1.1754944e-38, %v1707_v35 }
0x1172   :  { %vm1706_vm12 = vcmp.eq.f32.partialorder %v1705_v37, 8.507059e+37 }
0x1173   :  { %v1684_v21 = vsel %vm1683_vm7, %v2426_v28, %v1680_v49 }
0x1174   :  { %v1689_v1 = vsel %vm1686_vm8, %v1688_v24, %v1684_v21 }
0x1175   :  { %v1712_v32 = vmul.f32 %v2428_v0, %v1689_v1  ;;  %v2432_v9 = vpop.eup %2431  ;;  %v1711_v18 = vmul.f32 %v1689_v1, %v3363_v36 }
0x1176   :  { %v1697_v11 = vmul.f32 %v2432_v9, %v1695_v8  ;;  %vm1702_vm9 = vweird.f32 %v2432_v9 }
0x1177   :  { %1714 = vrot.lane.b32.xlu0 %v1712_v32, %s2600_s24  ;;  %vm1703_vm11 = vmor %vm1701_vm10, %vm1702_vm9 }
0x1178   :  { %v1698_v13 = vsub.f32 1.0, %v1697_v11 }
0x117a   :  { %v1699_v15 = vmul.f32 %v2432_v9, %v1698_v13 }
0x117c   :  { %v1700_v22 = vadd.f32 %v2432_v9, %v1699_v15 }
0x117e   :  { %v1704_v40 = vsel %vm1703_vm11, %v2432_v9, %v1700_v22 }
0x117f   :  { %v1709_v16 = vsel %vm1706_vm12, %v1708_v41, %v1704_v40 }
0x11e9   :  { %v1715_v19 = vpop.permute.xlu0 %1714 }
0x11ea   :  { %v3417_v20 = vadd.f32 %v1715_v19, %v1711_v18 }
0x11ec   :  { %2433 = vtanh.f32 %v3417_v20 }
0x11f2   :  { %v2434_v17 = vpop.eup %2433 }
0x11f3   :  { %v1719_v27 = vmul.f32 %v2434_v17, %v1709_v16 }
0x11f5   :  { %1721 = vrot.lane.b32.xlu1 %v1719_v27, %s2600_s24 }
0x1267   :  { %v1722_v36 = vpop.permute.xlu1 %1721 }
0x1268   :  { %2258 = vmatmul.msk.f32.vlgmr.msrb.gmra.mxu2 %vm176_vm2, %v1722_v36  ;;  %2259 = vmatmul.msk.f32.vlgmr.msrb.gmra.mxu3 %vm176_vm2, %v1722_v36 }
0x1269   :  { %2003 = vmatpush.msrb.mxu2 %v3369_v5  ;;  %2023 = vmatpush.msrb.mxu3 %v3372_v42 }
0x126b   :  { %2004 = vmatpush.msrb.mxu2 %v3375_v44  ;;  %2024 = vmatpush.msrb.mxu3 %v3378_v45 }
0x126d   :  { %2005 = vmatpush.msrb.mxu2 %v3381_v46  ;;  %2025 = vmatpush.msrb.mxu3 %v3384_v47 }
0x126f   :  { %2006 = vmatpush.msrb.mxu2 %v3387_v50  ;;  %2026 = vmatpush.msrb.mxu3 %v3390_v58  ;;  %v1802_v58 = vpop.f32.mrf.mxu1 }
0x1271   :  { %2007 = vmatpush.msrb.mxu2 %v3393_v53  ;;  %2027 = vmatpush.msrb.mxu3 %v3396_v54 }
0x1273   :  { %2008 = vmatpush.msrb.mxu2 %v3399_v59  ;;  %2028 = vmatpush.msrb.mxu3 %v3402_v61 }
0x1275   :  { %2009 = vmatpush.msrb.mxu2 %v3405_v7  ;;  %2029 = vmatpush.msrb.mxu3 %v3408_v10 }
0x1277   :  { %2010 = vmatpush.msrb.mxu2 %v2491_v31  ;;  %2030 = vmatpush.msrb.mxu3 %v2492_v57 }
0x12eb   :  { %v1742_v5 = vpop.f32.mrf.mxu2  ;;  %v1762_v50 = vpop.f32.mrf.mxu3 }
0x12ec   :  { %v1783_v42 = vadd.f32 %v1782_v38, %v1742_v5  ;;  %v1803_v53 = vadd.f32 %v1802_v58, %v1762_v50 }
0x12ee   :  { %v1805_v44 = vadd.f32 %v1783_v42, %v3269_v43  ;;  %v1806_v59 = vadd.f32 %v1803_v53, %v3275_v30 }
0x12f0   :  { %v2262_v45 = vmul.f32 -1.442695, %v1805_v44  ;;  %v2263_v14 = vmul.f32 -1.442695, %v1806_v59 }
0x12f2   :  { %2435 = vpow2.f32 %v2262_v45 }
0x12f8   :  { %v2436_v46 = vpop.eup %2435 }
0x12f9   :  { %v1810_v47 = vadd.f32 1.0, %v2436_v46  ;;  %v1937_v46 = vpop.f32.mrf.mxu1 }
0x12fb   :  { %2437 = vrcp.f32 %v1810_v47  ;;  %v1822_v10 = vand.u32 2147483648, %v1810_v47  ;;  %v1820_v51 = vand.u32 2147483647, %v1810_v47  ;;  %vm1816_vm14 = vweird.f32 %v1810_v47 }
0x12fc   :  { %2439 = vtanh.f32 %v1806_v59 }
0x12fd   :  { %v1823_v55 = vor.u32 1.1754944e-38, %v1822_v10  ;;  %vm1821_vm0 = vcmp.eq.f32.partialorder %v1820_v51, 8.507059e+37  ;;  %2441 = vpow2.f32 %v2263_v14 }
0x12fe   :  { %2443 = vpow2.f32 %v2225_v25 }
0x1301   :  { %v2438_v54 = vpop.eup %2437 }
0x1302   :  { %v1812_v61 = vmul.f32 %v2438_v54, %v1810_v47  ;;  %vm1817_vm13 = vweird.f32 %v2438_v54  ;;  %v2440_v62 = vpop.eup %2439 }
0x1303   :  { %vm1818_vm15 = vmor %vm1816_vm14, %vm1817_vm13  ;;  %v2442_v28 = vpop.eup %2441 }
0x1304   :  { %v1813_v7 = vsub.f32 1.0, %v1812_v61  ;;  %v1830_v2 = vadd.f32 1.0, %v2442_v28  ;;  %v2444_v23 = vpop.eup %2443 }
0x1305   :  { %v973_v39 = vadd.f32 1.0, %v2444_v23 }
0x1306   :  { %v1814_v48 = vmul.f32 %v2438_v54, %v1813_v7  ;;  %2445 = vrcp.f32 %v1830_v2  ;;  %v1842_v29 = vand.u32 2147483648, %v1830_v2  ;;  %vm1836_vm3 = vweird.f32 %v1830_v2 }
0x1307   :  { %2447 = vrcp.f32 %v973_v39  ;;  %v1840_v6 = vand.u32 2147483647, %v1830_v2  ;;  %v985_v35 = vand.u32 2147483648, %v973_v39  ;;  %vm979_vm7 = vweird.f32 %v973_v39 }
0x1308   :  { %v1815_v52 = vadd.f32 %v2438_v54, %v1814_v48  ;;  %v1843_v11 = vor.u32 1.1754944e-38, %v1842_v29  ;;  %v983_v37 = vand.u32 2147483647, %v973_v39 }
0x1309   :  { %vm1841_vm5 = vcmp.eq.f32.partialorder %v1840_v6, 8.507059e+37  ;;  %v986_v41 = vor.u32 1.1754944e-38, %v985_v35 }
0x130a   :  { %v1819_v56 = vsel %vm1818_vm15, %v2438_v54, %v1815_v52  ;;  %vm984_vm9 = vcmp.eq.f32.partialorder %v983_v37, 8.507059e+37 }
0x130b   :  { %v1824_v63 = vsel %vm1821_vm0, %v1823_v55, %v1819_v56 }
0x130c   :  { %v1847_v12 = vmul.f32 %v2440_v62, %v1824_v63  ;;  %v2446_v34 = vpop.eup %2445  ;;  %v1846_v0 = vmul.f32 %v1824_v63, %v3417_v20 }
0x130d   :  { %v1832_v3 = vmul.f32 %v2446_v34, %v1830_v2  ;;  %v2448_v49 = vpop.eup %2447  ;;  %vm1837_vm1 = vweird.f32 %v2446_v34 }
0x130e   :  { %1849 = vrot.lane.b32.xlu2 %v1847_v12, %s2600_s24  ;;  %v975_v21 = vmul.f32 %v2448_v49, %v973_v39  ;;  %vm1838_vm4 = vmor %vm1836_vm3, %vm1837_vm1  ;;  %vm980_vm6 = vweird.f32 %v2448_v49 }
0x130f   :  { %v1833_v4 = vsub.f32 1.0, %v1832_v3  ;;  %vm981_vm8 = vmor %vm979_vm7, %vm980_vm6 }
0x1310   :  { %v976_v60 = vsub.f32 1.0, %v975_v21 }
0x1311   :  { %v1834_v24 = vmul.f32 %v2446_v34, %v1833_v4 }
0x1312   :  { %v977_v9 = vmul.f32 %v2448_v49, %v976_v60 }
0x1313   :  { %v1835_v32 = vadd.f32 %v2446_v34, %v1834_v24 }
0x1314   :  { %v978_v22 = vadd.f32 %v2448_v49, %v977_v9 }
0x1315   :  { %v1839_v8 = vsel %vm1838_vm4, %v2446_v34, %v1835_v32 }
0x1316   :  { %995 = vrot.lane.b32.xlu2 %v3280_v26, %s2600_s24  ;;  %v1844_v19 = vsel %vm1841_vm5, %v1843_v11, %v1839_v8  ;;  %v982_v40 = vsel %vm981_vm8, %v2448_v49, %v978_v22 }
0x1317   :  { %v987_v16 = vsel %vm984_vm9, %v986_v41, %v982_v40 }
0x1368   :  { %v1850_v26 = vpop.permute.xlu2 %1849 }
0x1369   :  { %v3444_v1 = vadd.f32 %v1850_v26, %v1846_v0 }
0x136b   :  { %2449 = vtanh.f32 %v3444_v1 }
0x1370   :  { %v996_v13 = vpop.permute.xlu2 %995 }
0x1371   :  { %v2450_v15 = vpop.eup %2449  ;;  %v998_v18 = vadd.f32 %v996_v13, %v3282_v33  ;;  %v1917_v33 = vpop.f32.mrf.mxu0 }
0x1372   :  { %v1854_v20 = vmul.f32 %v2450_v15, %v1844_v19 }
0x1373   :  { %2451 = vtanh.f32 %v998_v18 }
0x1374   :  { %1856 = vrot.lane.b32.xlu0 %v1854_v20, %s2600_s24 }
0x1379   :  { %v2452_v17 = vpop.eup %2451 }
0x137a   :  { %v1000_v27 = vmul.f32 %v2452_v17, %v987_v16 }
0x137c   :  { %v2036_v62 = vrot.slane %v1000_v27, 6 }
0x13e6   :  { %v1857_v36 = vpop.permute.xlu0 %1856 }
0x13e7   :  { %2264 = vmatmul.msk.f32.vlgmr.msra.gmra.mxu2 %vm176_vm2, %v1857_v36  ;;  %2265 = vmatmul.msk.f32.vlgmr.msra.gmra.mxu3 %vm176_vm2, %v1857_v36 }
0x146a   :  { %v1877_v31 = vpop.f32.mrf.mxu2  ;;  %v1897_v45 = vpop.f32.mrf.mxu3 }
0x146b   :  { %v1918_v57 = vadd.f32 %v1917_v33, %v1877_v31  ;;  %v1938_v47 = vadd.f32 %v1937_v46, %v1897_v45  ;;  %v2137_v45 = vld [vmem:[%s3509_s9 + $0x30] sm:$0xff]  ;;  %v2136_v46 = vld [vmem:[%s3509_s9 + $0x28] sm:$0xff] }
0x146d   :  { %v1940_v38 = vadd.f32 %v1918_v57, %v3269_v43  ;;  %v1941_v58 = vadd.f32 %v1938_v47, %v3275_v30  ;;  %v2135_v47 = vld [vmem:[%s3509_s9 + $0x20] sm:$0xff] }
0x146f   :  { %v2268_v5 = vmul.f32 -1.442695, %v1940_v38  ;;  %v2269_v63 = vmul.f32 -1.442695, %v1941_v58 }
0x1471   :  { %2453 = vpow2.f32 %v2268_v5 }
0x1477   :  { %v2454_v42 = vpop.eup %2453 }
0x1478   :  { %v1945_v44 = vadd.f32 1.0, %v2454_v42 }
0x147a   :  { %2455 = vrcp.f32 %v1945_v44  ;;  %v1957_v59 = vand.u32 2147483648, %v1945_v44  ;;  %v1955_v7 = vand.u32 2147483647, %v1945_v44  ;;  %vm1951_vm11 = vweird.f32 %v1945_v44 }
0x147b   :  { %2457 = vtanh.f32 %v1941_v58 }
0x147c   :  { %v1958_v48 = vor.u32 1.1754944e-38, %v1957_v59  ;;  %vm1956_vm13 = vcmp.eq.f32.partialorder %v1955_v7, 8.507059e+37  ;;  %2459 = vpow2.f32 %v2269_v63  ;;  %v2132_v59 = vld [vmem:[%s3509_s9 + $0x8] sm:$0xff] }
0x1480   :  { %v2456_v50 = vpop.eup %2455 }
0x1481   :  { %v1947_v53 = vmul.f32 %v2456_v50, %v1945_v44  ;;  %vm1952_vm10 = vweird.f32 %v2456_v50  ;;  %v2458_v52 = vpop.eup %2457  ;;  %v2138_v44 = vld [vmem:[%s3509_s9 + $0x38] sm:$0xff] }
0x1482   :  { %vm1953_vm12 = vmor %vm1951_vm11, %vm1952_vm10  ;;  %v2460_v12 = vpop.eup %2459  ;;  %2156 = vmatpush.msra.mxu2 %v2138_v44  ;;  %vm2168_vm11 = vcmask 50176  }
0x1483   :  { %v1948_v54 = vsub.f32 1.0, %v1947_v53  ;;  %v1965_v14 = vadd.f32 1.0, %v2460_v12  ;;  %v2133_v53 = vld [vmem:[%s3509_s9 + $0x10] sm:$0xff] }
0x1484   :  { %2157 = vmatpush.msra.mxu2 %v2137_v45 }
0x1485   :  { %v1949_v61 = vmul.f32 %v2456_v50, %v1948_v54  ;;  %2461 = vrcp.f32 %v1965_v14  ;;  %v1977_v49 = vand.u32 2147483648, %v1965_v14  ;;  %vm1971_vm15 = vweird.f32 %v1965_v14 }
0x1486   :  { %v1975_v24 = vand.u32 2147483647, %v1965_v14  ;;  %2158 = vmatpush.msra.mxu2 %v2136_v46 }
0x1487   :  { %v1950_v10 = vadd.f32 %v2456_v50, %v1949_v61  ;;  %v1978_v0 = vor.u32 1.1754944e-38, %v1977_v49  ;;  %v2131_v61 = vld [vmem:[%s3509_s9] sm:$0xff] }
0x1488   :  { %vm1976_vm1 = vcmp.eq.f32.partialorder %v1975_v24, 8.507059e+37  ;;  %2159 = vmatpush.msra.mxu2 %v2135_v47 }
0x1489   :  { %v1954_v51 = vsel %vm1953_vm12, %v2456_v50, %v1950_v10  ;;  %v2134_v50 = vld [vmem:[%s3509_s9 + $0x18] sm:$0xff] }
0x148a   :  { %v1959_v55 = vsel %vm1956_vm13, %v1958_v48, %v1954_v51  ;;  %2160 = vmatpush.msra.mxu2 %v2134_v50 }
0x148b   :  { %v1982_v56 = vmul.f32 %v2458_v52, %v1959_v55  ;;  %v2462_v25 = vpop.eup %2461  ;;  %v1981_v39 = vmul.f32 %v1959_v55, %v3444_v1 }
0x148c   :  { %v1967_v28 = vmul.f32 %v2462_v25, %v1965_v14  ;;  %vm1972_vm14 = vweird.f32 %v2462_v25  ;;  %2161 = vmatpush.msra.mxu2 %v2133_v53 }
0x148d   :  { %1984 = vrot.lane.b32.xlu1 %v1982_v56, %s2600_s24  ;;  %vm1973_vm0 = vmor %vm1971_vm15, %vm1972_vm14 }
0x148e   :  { %v1968_v2 = vsub.f32 1.0, %v1967_v28  ;;  %2162 = vmatpush.msra.mxu2 %v2132_v59 }
0x1490   :  { %v1969_v23 = vmul.f32 %v2462_v25, %v1968_v2  ;;  %2163 = vmatpush.msra.mxu2 %v2131_v61 }
0x1492   :  { %v1970_v4 = vadd.f32 %v2462_v25, %v1969_v23  ;;  %v2284_v23 = vld [vmem:[%s3510_s10] ss:$0 sm:$0xff] }
0x1494   :  { %v1974_v21 = vsel %vm1973_vm0, %v2462_v25, %v1970_v4 }
0x1495   :  { %2037 = vrot.lane.b32.xlu1 %v2036_v62, %s2600_s24  ;;  %v1979_v1 = vsel %vm1976_vm1, %v1978_v0, %v1974_v21 }
0x14ff   :  { %v1985_v34 = vpop.permute.xlu1 %1984 }
0x1500   :  { %v3456_v3 = vadd.f32 %v1985_v34, %v1981_v39 }
0x1502   :  { %2463 = vtanh.f32 %v3456_v3 }
0x1507   :  { %v2038_v26 = vpop.permute.xlu1 %2037 }
0x1508   :  { %v2464_v32 = vpop.eup %2463  ;;  %2272 = vmatmul.msk.f32.vlgmr.msra.gmra.mxu0 %vm176_vm2, %v2038_v26  ;;  %2273 = vmatmul.msk.f32.vlgmr.msra.gmra.mxu1 %vm176_vm2, %v2038_v26 }
0x1509   :  { %v1989_v60 = vmul.f32 %v2464_v32, %v1979_v1 }
0x150b   :  { %1991 = vrot.lane.b32.xlu0 %v1989_v60, %s2600_s24 }
0x157d   :  { %v1992_v29 = vpop.permute.xlu0 %1991 }
0x157e   :  { %2270 = vmatmul.msk.f32.vlgmr.msrb.gmra.mxu2 %vm176_vm2, %v1992_v29  ;;  %2271 = vmatmul.msk.f32.vlgmr.msrb.gmra.mxu3 %vm176_vm2, %v1992_v29 }
0x1585   :  { %v2058_v6 = vpop.f32.mrf.mxu0  ;;  %v2078_v20 = vpop.f32.mrf.mxu1 }
0x1601   :  { %v2012_v8 = vpop.f32.mrf.mxu2  ;;  %v2032_v19 = vpop.f32.mrf.mxu3 }
0x1602   :  { %v2059_v9 = vadd.f32 %v2058_v6, %v2012_v8  ;;  %v2079_v22 = vadd.f32 %v2078_v20, %v2032_v19 }
0x1604   :  { %v2081_v11 = vadd.f32 %v2059_v9, %v3269_v43  ;;  %v2082_v37 = vadd.f32 %v2079_v22, %v3275_v30 }
0x1606   :  { %v2274_v13 = vmul.f32 -1.442695, %v2081_v11  ;;  %v2275_v5 = vmul.f32 -1.442695, %v2082_v37 }
0x1608   :  { %2465 = vpow2.f32 %v2274_v13 }
0x160e   :  { %v2466_v15 = vpop.eup %2465 }
0x160f   :  { %v2086_v18 = vadd.f32 1.0, %v2466_v15 }
0x1611   :  { %2467 = vrcp.f32 %v2086_v18  ;;  %v2098_v17 = vand.u32 2147483648, %v2086_v18  ;;  %v2096_v27 = vand.u32 2147483647, %v2086_v18  ;;  %vm2092_vm4 = vweird.f32 %v2086_v18 }
0x1612   :  { %2469 = vtanh.f32 %v2082_v37 }
0x1613   :  { %v2099_v43 = vor.u32 1.1754944e-38, %v2098_v17  ;;  %vm2097_vm6 = vcmp.eq.f32.partialorder %v2096_v27, 8.507059e+37  ;;  %2471 = vpow2.f32 %v2275_v5 }
0x1617   :  { %v2468_v35 = vpop.eup %2467 }
0x1618   :  { %v2088_v40 = vmul.f32 %v2468_v35, %v2086_v18  ;;  %vm2093_vm3 = vweird.f32 %v2468_v35  ;;  %v2470_v31 = vpop.eup %2469 }
0x1619   :  { %vm2094_vm5 = vmor %vm2092_vm4, %vm2093_vm3  ;;  %v2472_v30 = vpop.eup %2471 }
0x161a   :  { %v2089_v41 = vsub.f32 1.0, %v2088_v40  ;;  %v2106_v42 = vadd.f32 1.0, %v2472_v30 }
0x161c   :  { %v2090_v16 = vmul.f32 %v2468_v35, %v2089_v41  ;;  %2473 = vrcp.f32 %v2106_v42  ;;  %v2118_v56 = vand.u32 2147483648, %v2106_v42  ;;  %vm2112_vm8 = vweird.f32 %v2106_v42 }
0x161d   :  { %v2116_v62 = vand.u32 2147483647, %v2106_v42 }
0x161e   :  { %v2091_v36 = vadd.f32 %v2468_v35, %v2090_v16  ;;  %v2119_v12 = vor.u32 1.1754944e-38, %v2118_v56 }
0x161f   :  { %vm2117_vm10 = vcmp.eq.f32.partialorder %v2116_v62, 8.507059e+37 }
0x1620   :  { %v2095_v33 = vsel %vm2094_vm5, %v2468_v35, %v2091_v36 }
0x1621   :  { %v2100_v57 = vsel %vm2097_vm6, %v2099_v43, %v2095_v33 }
0x1622   :  { %v2123_v38 = vmul.f32 %v2470_v31, %v2100_v57  ;;  %v2474_v58 = vpop.eup %2473  ;;  %v2122_v48 = vmul.f32 %v2100_v57, %v3456_v3 }
0x1623   :  { %v2108_v54 = vmul.f32 %v2474_v58, %v2106_v42  ;;  %vm2113_vm7 = vweird.f32 %v2474_v58 }
0x1624   :  { %2125 = vrot.lane.b32.xlu2 %v2123_v38, %s2600_s24  ;;  %vm2114_vm9 = vmor %vm2112_vm8, %vm2113_vm7 }
0x1625   :  { %v2109_v7 = vsub.f32 1.0, %v2108_v54 }
0x1627   :  { %v2110_v10 = vmul.f32 %v2474_v58, %v2109_v7 }
0x1629   :  { %v2111_v55 = vadd.f32 %v2474_v58, %v2110_v10 }
0x162b   :  { %v2115_v63 = vsel %vm2114_vm9, %v2474_v58, %v2111_v55 }
0x162c   :  { %v2120_v25 = vsel %vm2117_vm10, %v2119_v12, %v2115_v63 }
0x167e   :  { %v2126_v51 = vpop.permute.xlu2 %2125 }
0x167f   :  { %v2128_v52 = vadd.f32 %v2126_v51, %v2122_v48 }
0x1681   :  { %2475 = vtanh.f32 %v2128_v52 }
0x1687   :  { %v2476_v14 = vpop.eup %2475 }
0x1688   :  { %v2130_v28 = vmul.f32 %v2476_v14, %v2120_v25 }
0x168a   :  { %2144 = vrot.lane.b32.xlu0 %v2130_v28, %s2600_s24 }
0x16fc   :  { %v2145_v2 = vpop.permute.xlu0 %2144 }
0x16fd   :  { %2276 = vmatmul.msk.f32.vlgmr.msra.gmra.mxu2 %vm176_vm2, %v2145_v2 }
0x1780   :  { %v2165_v39 = vpop.f32.mrf.mxu2 }
0x1781   :  { %v2166_v34 = vadd.f32 %v2284_v23, %v2165_v39 }
0x1783   :  { %2169 = vst.msk [vmem:[#allocation8] sm:$0x3] %vm2168_vm11, %v2166_v34 }
0x1784   :  { %2180 = dma.vmem_to_hbm [thread:$0]  %s2176_s27, 32, %s2178_s0, [#allocation4]  }
0x1785   :  { %2593 = dma.done.wait [#allocation4], 32  }
0x1786   :  { %2594 = vsyncadd [#allocation4], 4294967264 }
0x1787   :  { %2185 = vsyncpa [#allocation3], 1 }
0x1788   :  { %2186 = vsyncpa [#allocation6], 1 }
0x1789   :  { %2187 = vsyncpa [#allocation4], 1 }

</bundles_post_ra>
